<compile_context>
chip_gen: v5e
topology: v5e:2x2
jax: 0.10.0
libtpu: 0.0.40
codegen_flags: <defaults>
</compile_context>

<pallas_src>
import numpy as np
import jax
import jax.numpy as jnp
from jax.experimental import pallas as pl
from jax.experimental.pallas import tpu as pltpu


# ----------------------------- fused Pallas kernel ---------------------------

def _lenet_kernel(x_ref, m1_ref, b1_ref, m2_ref, b2_ref,
                  g1_ref, bf1_ref, w2t_ref, bf2_ref, w3t_ref, bf3_ref,
                  o_ref):
    f32, bf16 = jnp.float32, jnp.bfloat16
    bt = x_ref.shape[1]                            # batch tile (multiple of 8)

    x = x_ref[...]                                 # (32, bt, 32)  h-major, f32

    # conv1 (1->6, 5x5, valid) + ReLU as 5 shifted MXU matmuls.
    # rows = h*bt + b ; lanes = w*6 + co  (28 output rows -> 168 lanes)
    def c1_tap(kh):
        xs = x[kh:kh + 28].reshape(28 * bt, 32).astype(bf16)
        return jnp.dot(xs, m1_ref[kh], preferred_element_type=f32)
    a1 = c1_tap(0)
    for kh in range(1, 5):
        a1 = a1 + c1_tap(kh)
    a1 = jnp.maximum(a1 + b1_ref[...], 0.0)        # (28*bt, 168)

    # max_pool2d 2x2 (stage 1): h pair-max via tile-aligned regroup,
    # w pair-max via a 6-lane shift.  Valid pooled values land at lanes
    # 12*j + ci; the other lanes hit zero rows of m2, so no compaction needed.
    a1 = a1.reshape(14, 2 * bt, 168)
    p1 = jnp.maximum(a1[:, :bt, :], a1[:, bt:, :])         # (14, bt, 168)
    wm1 = jnp.maximum(p1[..., 0:162], p1[..., 6:168])      # (14, bt, 162)

    # conv2 (6->16, 5x5, valid) + ReLU as 5 shifted MXU matmuls.
    # lanes = w*16 + co (10 output rows -> 160 lanes)
    def c2_tap(kh):
        ws = wm1[kh:kh + 10].reshape(10 * bt, 162).astype(bf16)
        return jnp.dot(ws, m2_ref[kh], preferred_element_type=f32)
    a2 = c2_tap(0)
    for kh in range(1, 5):
        a2 = a2 + c2_tap(kh)
    a2 = jnp.maximum(a2 + b2_ref[...], 0.0)        # (10*bt, 160)

    # max_pool2d 2x2 (stage 2).  Valid pooled values at lanes 32*w + c.
    a2 = a2.reshape(5, 2 * bt, 160)
    p2 = jnp.maximum(a2[:, :bt, :], a2[:, bt:, :])         # (5, bt, 160)
    wm2 = jnp.maximum(p2[..., 0:144], p2[..., 16:160])     # (5, bt, 144)

    # flatten + fc1, folded: g1[h] has zero rows at the garbage lanes and is
    # pre-permuted to torch.flatten(x, 1) (c, h, w) order.
    z1 = jnp.dot(wm2[0].astype(bf16), g1_ref[0], preferred_element_type=f32)
    for h in range(1, 5):
        z1 = z1 + jnp.dot(wm2[h].astype(bf16), g1_ref[h],
                          preferred_element_type=f32)
    z1 = jnp.maximum(z1 + bf1_ref[...], 0.0)       # (bt, 120)

    # fc2 -> relu -> fc3 (fc3 padded to 128 lanes for a lane-dense store).
    z2 = jnp.maximum(
        jnp.dot(z1.astype(bf16), w2t_ref[...], preferred_element_type=f32)
        + bf2_ref[...], 0.0)                       # (bt, 84)
    o_ref[...] = (jnp.dot(z2.astype(bf16), w3t_ref[...],
                          preferred_element_type=f32)
                  + bf3_ref[...])                  # (bt, 128)


# ------------------------- host-side weight preparation ----------------------

def prepare_params(params):
    """Fold conv taps, pooling compaction, flatten order and output padding
    into matrices, once.  Matmul weights are stored in bf16 (single-pass MXU);
    biases stay f32."""
    (w1, b1, w2, b2, wf1, bf1, wf2, bf2, wf3, bf3) = [
        np.asarray(p, np.float32) for p in params]

    # conv1:  m1[kh, w+kw, w*6+co] = w1[co, 0, kh, kw]
    m1 = np.zeros((5, 32, 28 * 6), np.float32)
    for kh in range(5):
        for kw in range(5):
            for w in range(28):
                m1[kh, w + kw, w * 6:(w + 1) * 6] = w1[:, 0, kh, kw]
    b1f = np.tile(b1, 28).reshape(1, 168)

    # conv2 (pool1 w-compaction folded in via zero rows):
    #   m2[kh, 12*(w+kw)+ci, w*16+co] = w2[co, ci, kh, kw]
    m2 = np.zeros((5, 162, 10 * 16), np.float32)
    for kh in range(5):
        for kw in range(5):
            for w in range(10):
                for ci in range(6):
                    m2[kh, 12 * (w + kw) + ci, w * 16:(w + 1) * 16] = w2[:, ci, kh, kw]
    b2f = np.tile(b2, 10).reshape(1, 160)

    # fc1 folded with pool2 lane layout (valid lanes 32*w+c, c<16, zero rows
    # elsewhere) and torch.flatten(x, 1) (c, h, w) ordering.
    g1 = np.zeros((5, 144, 120), np.float32)
    wf1_r = wf1.reshape(120, 16, 5, 5)             # (o, c, h, w)
    for h in range(5):
        for w in range(5):
            for c in range(16):
                g1[h, 32 * w + c, :] = wf1_r[:, c, h, w]

    # fc3 padded to 128 output lanes for an unmasked, lane-dense store.
    w3p = np.zeros((84, 128), np.float32)
    w3p[:, :10] = wf3.T
    b3p = np.zeros((1, 128), np.float32)
    b3p[0, :10] = bf3

    bf = jnp.bfloat16
    f32 = jnp.float32
    return (jnp.asarray(m1, bf), jnp.asarray(b1f, f32),
            jnp.asarray(m2, bf), jnp.asarray(b2f, f32),
            jnp.asarray(g1, bf), jnp.asarray(bf1.reshape(1, 120), f32),
            jnp.asarray(wf2.T, bf), jnp.asarray(bf2.reshape(1, 84), f32),
            jnp.asarray(w3p, bf), jnp.asarray(b3p, f32))


# ----------------------------------- forward ---------------------------------

def _round_up(x, m):
    return (x + m - 1) // m * m


def _full_spec(a):
    zeros = (0,) * a.ndim
    return pl.BlockSpec(a.shape, lambda b, _z=zeros: _z)


def forward(x_nchw, prepped, *, batch_tile=None):
    n = x_nchw.shape[0]
    if batch_tile is None:
        # Multiple of 8 (layout-friendly merges); capped so VMEM stays well
        # under the default scoped limit on v5e (16 MiB) and v7x's 64 MiB/TC.
        batch_tile = min(64, _round_up(n, 8))
    bt = _round_up(batch_tile, 8)
    n_pad = _round_up(n, bt)

    x = x_nchw.reshape(n, 32, 32)          # C == 1, so NCHW -> (N, H, W)
    if n_pad != n:
        x = jnp.pad(x, ((0, n_pad - n), (0, 0), (0, 0)))
    xh = jnp.transpose(x, (1, 0, 2))       # h-major: (32, n_pad, 32)

    out = pl.pallas_call(
        _lenet_kernel,
        out_shape=jax.ShapeDtypeStruct((n_pad, 128), jnp.float32),
        grid_spec=pltpu.PrefetchScalarGridSpec(
            num_scalar_prefetch=0,
            grid=(n_pad // bt,),
            in_specs=[pl.BlockSpec((32, bt, 32), lambda b: (0, b, 0))]
                     + [_full_spec(a) for a in prepped],
            out_specs=pl.BlockSpec((bt, 128), lambda b: (b, 0)),
        ),
        compiler_params=pltpu.CompilerParams(
            dimension_semantics=("parallel",)),
    )(xh, *prepped)
    return out[:n, :10]


# ----------------------------- pure-JAX reference ----------------------------

def reference_forward(x_nchw, params):
    (w1, b1, w2, b2, wf1, bf1, wf2, bf2, wf3, bf3) = params
    hp = jax.lax.Precision.HIGHEST
    dn = ("NCHW", "OIHW", "NCHW")
    y = jax.lax.conv_general_dilated(x_nchw, w1, (1, 1), "VALID",
                                     dimension_numbers=dn, precision=hp)
    y = jnp.maximum(y + b1.reshape(1, 6, 1, 1), 0.0)
    y = jax.lax.reduce_window(y, -jnp.inf, jax.lax.max,
                              (1, 1, 2, 2), (1, 1, 2, 2), "VALID")
    y = jax.lax.conv_general_dilated(y, w2, (1, 1), "VALID",
                                     dimension_numbers=dn, precision=hp)
    y = jnp.maximum(y + b2.reshape(1, 16, 1, 1), 0.0)
    y = jax.lax.reduce_window(y, -jnp.inf, jax.lax.max,
                              (1, 1, 2, 2), (1, 1, 2, 2), "VALID")
    y = y.reshape(y.shape[0], -1)
    y = jnp.maximum(jnp.dot(y, wf1.T, precision=hp) + bf1, 0.0)
    y = jnp.maximum(jnp.dot(y, wf2.T, precision=hp) + bf2, 0.0)
    return jnp.dot(y, wf3.T, precision=hp) + bf3


# ------------------------------------ init -----------------------------------

def init_params(key):
    """Deterministic init mimicking PyTorch default U(-1/sqrt(fan_in), 1/sqrt(fan_in))."""
    def uni(k, shape, fan_in):
        bound = 1.0 / float(fan_in) ** 0.5
        return jax.random.uniform(k, shape, jnp.float32, -bound, bound)

    ks = jax.random.split(key, 10)
    w1 = uni(ks[0], (6, 1, 5, 5), 1 * 25)
    b1 = uni(ks[1], (6,), 1 * 25)
    w2 = uni(ks[2], (16, 6, 5, 5), 6 * 25)
    b2 = uni(ks[3], (16,), 6 * 25)
    wf1 = uni(ks[4], (120, 400), 400)
    bf1 = uni(ks[5], (120,), 400)
    wf2 = uni(ks[6], (84, 120), 120)
    bf2 = uni(ks[7], (84,), 120)
    wf3 = uni(ks[8], (10, 84), 84)
    bf3 = uni(ks[9], (10,), 84)
    return (w1, b1, w2, b2, wf1, bf1, wf2, bf2, wf3, bf3)


if __name__ == "__main__":
    key = jax.random.PRNGKey(0)
    pkey, xkey = jax.random.split(key)
    params = init_params(pkey)
    prepped = prepare_params(params)          # hoisted weight preprocessing (once)

    # The module requires 32x32 inputs so the conv/pool stack yields 16*5*5 features.
    x = jax.random.normal(xkey, (4, 1, 32, 32), jnp.float32)

    out = jax.jit(forward)(x, prepped)
    out = jax.block_until_ready(out)
    assert out.shape == (4, 10) and out.dtype == jnp.float32

    ref = reference_forward(x, params)
    err = float(jnp.max(jnp.abs(out - ref)))
    assert err < 5e-2, f"mismatch vs reference: {err}"

    print("KERNEL_OK")
</pallas_src>

<mosaic_0001>
module attributes {stable_mosaic.version = 11 : i64} {
  func.func @_lenet_kernel(%arg0: i32, %arg1: memref<32x8x32xf32, #tpu.memory_space<vmem>>, %arg2: memref<5x32x168xbf16, #tpu.memory_space<vmem>>, %arg3: memref<1x168xf32, #tpu.memory_space<vmem>>, %arg4: memref<5x162x160xbf16, #tpu.memory_space<vmem>>, %arg5: memref<1x160xf32, #tpu.memory_space<vmem>>, %arg6: memref<5x144x120xbf16, #tpu.memory_space<vmem>>, %arg7: memref<1x120xf32, #tpu.memory_space<vmem>>, %arg8: memref<120x84xbf16, #tpu.memory_space<vmem>>, %arg9: memref<1x84xf32, #tpu.memory_space<vmem>>, %arg10: memref<84x128xbf16, #tpu.memory_space<vmem>>, %arg11: memref<1x128xf32, #tpu.memory_space<vmem>>, %arg12: memref<8x128xf32, #tpu.memory_space<vmem>>) attributes {dimension_semantics = [#tpu.dimension_semantics<parallel>], iteration_bounds = array<i64: 1>, scalar_prefetch = 0 : i64, scratch_operands = 0 : i64, tpu.core_type = #tpu.core_type<tc>, window_params = [{transform_indices = @transform_0, window_bounds = array<i64: 32, 8, 32>}, {pipeline_mode = #tpu.pipeline_mode<synchronous>, transform_indices = @transform_1, window_bounds = array<i64: 5, 32, 168>}, {pipeline_mode = #tpu.pipeline_mode<synchronous>, transform_indices = @transform_2, window_bounds = array<i64: 1, 168>}, {pipeline_mode = #tpu.pipeline_mode<synchronous>, transform_indices = @transform_3, window_bounds = array<i64: 5, 162, 160>}, {pipeline_mode = #tpu.pipeline_mode<synchronous>, transform_indices = @transform_4, window_bounds = array<i64: 1, 160>}, {pipeline_mode = #tpu.pipeline_mode<synchronous>, transform_indices = @transform_5, window_bounds = array<i64: 5, 144, 120>}, {pipeline_mode = #tpu.pipeline_mode<synchronous>, transform_indices = @transform_6, window_bounds = array<i64: 1, 120>}, {pipeline_mode = #tpu.pipeline_mode<synchronous>, transform_indices = @transform_7, window_bounds = array<i64: 120, 84>}, {pipeline_mode = #tpu.pipeline_mode<synchronous>, transform_indices = @transform_8, window_bounds = array<i64: 1, 84>}, {pipeline_mode = #tpu.pipeline_mode<synchronous>, transform_indices = @transform_9, window_bounds = array<i64: 84, 128>}, {pipeline_mode = #tpu.pipeline_mode<synchronous>, transform_indices = @transform_10, window_bounds = array<i64: 1, 128>}, {transform_indices = @transform_11, window_bounds = array<i64: 8, 128>}]} {
    %c0 = arith.constant 0 : index
    %c0_0 = arith.constant 0 : index
    %c0_1 = arith.constant 0 : index
    %0 = vector.load %arg1[%c0, %c0_0, %c0_1] : memref<32x8x32xf32, #tpu.memory_space<vmem>>, vector<32x8x32xf32>
    %1 = vector.extract_strided_slice %0 {offsets = [0, 0, 0], sizes = [28, 8, 32], strides = [1, 1, 1]} : vector<32x8x32xf32> to vector<28x8x32xf32>
    %2 = vector.shape_cast %1 : vector<28x8x32xf32> to vector<224x32xf32>
    %3 = arith.truncf %2 : vector<224x32xf32> to vector<224x32xbf16>
    %c0_2 = arith.constant 0 : index
    %c0_3 = arith.constant 0 : index
    %c0_4 = arith.constant 0 : index
    %4 = vector.load %arg2[%c0_2, %c0_3, %c0_4] : memref<5x32x168xbf16, #tpu.memory_space<vmem>>, vector<1x32x168xbf16>
    %5 = vector.shape_cast %4 : vector<1x32x168xbf16> to vector<32x168xbf16>
    %cst = arith.constant dense<0.000000e+00> : vector<224x168xf32>
    %6 = tpu.matmul %3, %5, %cst {dimension_numbers = #tpu.dot_dimension_numbers<[1], [0], [0], [1], [0, 0, 1, 1], [], []>} : vector<224x32xbf16>, vector<32x168xbf16>, vector<224x168xf32> -> vector<224x168xf32>
    %7 = vector.extract_strided_slice %0 {offsets = [1, 0, 0], sizes = [28, 8, 32], strides = [1, 1, 1]} : vector<32x8x32xf32> to vector<28x8x32xf32>
    %8 = vector.shape_cast %7 : vector<28x8x32xf32> to vector<224x32xf32>
    %9 = arith.truncf %8 : vector<224x32xf32> to vector<224x32xbf16>
    %c1 = arith.constant 1 : index
    %c0_5 = arith.constant 0 : index
    %c0_6 = arith.constant 0 : index
    %10 = vector.load %arg2[%c1, %c0_5, %c0_6] : memref<5x32x168xbf16, #tpu.memory_space<vmem>>, vector<1x32x168xbf16>
    %11 = vector.shape_cast %10 : vector<1x32x168xbf16> to vector<32x168xbf16>
    %cst_7 = arith.constant dense<0.000000e+00> : vector<224x168xf32>
    %12 = tpu.matmul %9, %11, %cst_7 {dimension_numbers = #tpu.dot_dimension_numbers<[1], [0], [0], [1], [0, 0, 1, 1], [], []>} : vector<224x32xbf16>, vector<32x168xbf16>, vector<224x168xf32> -> vector<224x168xf32>
    %13 = arith.addf %6, %12 : vector<224x168xf32>
    %14 = vector.extract_strided_slice %0 {offsets = [2, 0, 0], sizes = [28, 8, 32], strides = [1, 1, 1]} : vector<32x8x32xf32> to vector<28x8x32xf32>
    %15 = vector.shape_cast %14 : vector<28x8x32xf32> to vector<224x32xf32>
    %16 = arith.truncf %15 : vector<224x32xf32> to vector<224x32xbf16>
    %c2 = arith.constant 2 : index
    %c0_8 = arith.constant 0 : index
    %c0_9 = arith.constant 0 : index
    %17 = vector.load %arg2[%c2, %c0_8, %c0_9] : memref<5x32x168xbf16, #tpu.memory_space<vmem>>, vector<1x32x168xbf16>
    %18 = vector.shape_cast %17 : vector<1x32x168xbf16> to vector<32x168xbf16>
    %cst_10 = arith.constant dense<0.000000e+00> : vector<224x168xf32>
    %19 = tpu.matmul %16, %18, %cst_10 {dimension_numbers = #tpu.dot_dimension_numbers<[1], [0], [0], [1], [0, 0, 1, 1], [], []>} : vector<224x32xbf16>, vector<32x168xbf16>, vector<224x168xf32> -> vector<224x168xf32>
    %20 = arith.addf %13, %19 : vector<224x168xf32>
    %21 = vector.extract_strided_slice %0 {offsets = [3, 0, 0], sizes = [28, 8, 32], strides = [1, 1, 1]} : vector<32x8x32xf32> to vector<28x8x32xf32>
    %22 = vector.shape_cast %21 : vector<28x8x32xf32> to vector<224x32xf32>
    %23 = arith.truncf %22 : vector<224x32xf32> to vector<224x32xbf16>
    %c3 = arith.constant 3 : index
    %c0_11 = arith.constant 0 : index
    %c0_12 = arith.constant 0 : index
    %24 = vector.load %arg2[%c3, %c0_11, %c0_12] : memref<5x32x168xbf16, #tpu.memory_space<vmem>>, vector<1x32x168xbf16>
    %25 = vector.shape_cast %24 : vector<1x32x168xbf16> to vector<32x168xbf16>
    %cst_13 = arith.constant dense<0.000000e+00> : vector<224x168xf32>
    %26 = tpu.matmul %23, %25, %cst_13 {dimension_numbers = #tpu.dot_dimension_numbers<[1], [0], [0], [1], [0, 0, 1, 1], [], []>} : vector<224x32xbf16>, vector<32x168xbf16>, vector<224x168xf32> -> vector<224x168xf32>
    %27 = arith.addf %20, %26 : vector<224x168xf32>
    %28 = vector.extract_strided_slice %0 {offsets = [4, 0, 0], sizes = [28, 8, 32], strides = [1, 1, 1]} : vector<32x8x32xf32> to vector<28x8x32xf32>
    %29 = vector.shape_cast %28 : vector<28x8x32xf32> to vector<224x32xf32>
    %30 = arith.truncf %29 : vector<224x32xf32> to vector<224x32xbf16>
    %c4 = arith.constant 4 : index
    %c0_14 = arith.constant 0 : index
    %c0_15 = arith.constant 0 : index
    %31 = vector.load %arg2[%c4, %c0_14, %c0_15] : memref<5x32x168xbf16, #tpu.memory_space<vmem>>, vector<1x32x168xbf16>
    %32 = vector.shape_cast %31 : vector<1x32x168xbf16> to vector<32x168xbf16>
    %cst_16 = arith.constant dense<0.000000e+00> : vector<224x168xf32>
    %33 = tpu.matmul %30, %32, %cst_16 {dimension_numbers = #tpu.dot_dimension_numbers<[1], [0], [0], [1], [0, 0, 1, 1], [], []>} : vector<224x32xbf16>, vector<32x168xbf16>, vector<224x168xf32> -> vector<224x168xf32>
    %34 = arith.addf %27, %33 : vector<224x168xf32>
    %c0_17 = arith.constant 0 : index
    %c0_18 = arith.constant 0 : index
    %35 = vector.load %arg3[%c0_17, %c0_18] : memref<1x168xf32, #tpu.memory_space<vmem>>, vector<1x168xf32>
    %36 = vector.broadcast %35 : vector<1x168xf32> to vector<224x168xf32>
    %37 = arith.addf %34, %36 : vector<224x168xf32>
    %cst_19 = arith.constant 0.000000e+00 : f32
    %38 = vector.broadcast %cst_19 : f32 to vector<224x168xf32>
    %39 = arith.maximumf %37, %38 : vector<224x168xf32>
    %40 = vector.shape_cast %39 : vector<224x168xf32> to vector<14x16x168xf32>
    %41 = vector.extract_strided_slice %40 {offsets = [0, 0, 0], sizes = [14, 8, 168], strides = [1, 1, 1]} : vector<14x16x168xf32> to vector<14x8x168xf32>
    %42 = vector.extract_strided_slice %40 {offsets = [0, 8, 0], sizes = [14, 8, 168], strides = [1, 1, 1]} : vector<14x16x168xf32> to vector<14x8x168xf32>
    %43 = arith.maximumf %41, %42 : vector<14x8x168xf32>
    %44 = vector.extract_strided_slice %43 {offsets = [0, 0, 0], sizes = [14, 8, 162], strides = [1, 1, 1]} : vector<14x8x168xf32> to vector<14x8x162xf32>
    %45 = vector.extract_strided_slice %43 {offsets = [0, 0, 6], sizes = [14, 8, 162], strides = [1, 1, 1]} : vector<14x8x168xf32> to vector<14x8x162xf32>
    %46 = arith.maximumf %44, %45 : vector<14x8x162xf32>
    %47 = vector.extract_strided_slice %46 {offsets = [0, 0, 0], sizes = [10, 8, 162], strides = [1, 1, 1]} : vector<14x8x162xf32> to vector<10x8x162xf32>
    %48 = vector.shape_cast %47 : vector<10x8x162xf32> to vector<80x162xf32>
    %49 = arith.truncf %48 : vector<80x162xf32> to vector<80x162xbf16>
    %c0_20 = arith.constant 0 : index
    %c0_21 = arith.constant 0 : index
    %c0_22 = arith.constant 0 : index
    %50 = vector.load %arg4[%c0_20, %c0_21, %c0_22] : memref<5x162x160xbf16, #tpu.memory_space<vmem>>, vector<1x162x160xbf16>
    %51 = vector.shape_cast %50 : vector<1x162x160xbf16> to vector<162x160xbf16>
    %cst_23 = arith.constant dense<0.000000e+00> : vector<80x160xf32>
    %52 = tpu.matmul %49, %51, %cst_23 {dimension_numbers = #tpu.dot_dimension_numbers<[1], [0], [0], [1], [0, 0, 1, 1], [], []>} : vector<80x162xbf16>, vector<162x160xbf16>, vector<80x160xf32> -> vector<80x160xf32>
    %53 = vector.extract_strided_slice %46 {offsets = [1, 0, 0], sizes = [10, 8, 162], strides = [1, 1, 1]} : vector<14x8x162xf32> to vector<10x8x162xf32>
    %54 = vector.shape_cast %53 : vector<10x8x162xf32> to vector<80x162xf32>
    %55 = arith.truncf %54 : vector<80x162xf32> to vector<80x162xbf16>
    %c1_24 = arith.constant 1 : index
    %c0_25 = arith.constant 0 : index
    %c0_26 = arith.constant 0 : index
    %56 = vector.load %arg4[%c1_24, %c0_25, %c0_26] : memref<5x162x160xbf16, #tpu.memory_space<vmem>>, vector<1x162x160xbf16>
    %57 = vector.shape_cast %56 : vector<1x162x160xbf16> to vector<162x160xbf16>
    %cst_27 = arith.constant dense<0.000000e+00> : vector<80x160xf32>
    %58 = tpu.matmul %55, %57, %cst_27 {dimension_numbers = #tpu.dot_dimension_numbers<[1], [0], [0], [1], [0, 0, 1, 1], [], []>} : vector<80x162xbf16>, vector<162x160xbf16>, vector<80x160xf32> -> vector<80x160xf32>
    %59 = arith.addf %52, %58 : vector<80x160xf32>
    %60 = vector.extract_strided_slice %46 {offsets = [2, 0, 0], sizes = [10, 8, 162], strides = [1, 1, 1]} : vector<14x8x162xf32> to vector<10x8x162xf32>
    %61 = vector.shape_cast %60 : vector<10x8x162xf32> to vector<80x162xf32>
    %62 = arith.truncf %61 : vector<80x162xf32> to vector<80x162xbf16>
    %c2_28 = arith.constant 2 : index
    %c0_29 = arith.constant 0 : index
    %c0_30 = arith.constant 0 : index
    %63 = vector.load %arg4[%c2_28, %c0_29, %c0_30] : memref<5x162x160xbf16, #tpu.memory_space<vmem>>, vector<1x162x160xbf16>
    %64 = vector.shape_cast %63 : vector<1x162x160xbf16> to vector<162x160xbf16>
    %cst_31 = arith.constant dense<0.000000e+00> : vector<80x160xf32>
    %65 = tpu.matmul %62, %64, %cst_31 {dimension_numbers = #tpu.dot_dimension_numbers<[1], [0], [0], [1], [0, 0, 1, 1], [], []>} : vector<80x162xbf16>, vector<162x160xbf16>, vector<80x160xf32> -> vector<80x160xf32>
    %66 = arith.addf %59, %65 : vector<80x160xf32>
    %67 = vector.extract_strided_slice %46 {offsets = [3, 0, 0], sizes = [10, 8, 162], strides = [1, 1, 1]} : vector<14x8x162xf32> to vector<10x8x162xf32>
    %68 = vector.shape_cast %67 : vector<10x8x162xf32> to vector<80x162xf32>
    %69 = arith.truncf %68 : vector<80x162xf32> to vector<80x162xbf16>
    %c3_32 = arith.constant 3 : index
    %c0_33 = arith.constant 0 : index
    %c0_34 = arith.constant 0 : index
    %70 = vector.load %arg4[%c3_32, %c0_33, %c0_34] : memref<5x162x160xbf16, #tpu.memory_space<vmem>>, vector<1x162x160xbf16>
    %71 = vector.shape_cast %70 : vector<1x162x160xbf16> to vector<162x160xbf16>
    %cst_35 = arith.constant dense<0.000000e+00> : vector<80x160xf32>
    %72 = tpu.matmul %69, %71, %cst_35 {dimension_numbers = #tpu.dot_dimension_numbers<[1], [0], [0], [1], [0, 0, 1, 1], [], []>} : vector<80x162xbf16>, vector<162x160xbf16>, vector<80x160xf32> -> vector<80x160xf32>
    %73 = arith.addf %66, %72 : vector<80x160xf32>
    %74 = vector.extract_strided_slice %46 {offsets = [4, 0, 0], sizes = [10, 8, 162], strides = [1, 1, 1]} : vector<14x8x162xf32> to vector<10x8x162xf32>
    %75 = vector.shape_cast %74 : vector<10x8x162xf32> to vector<80x162xf32>
    %76 = arith.truncf %75 : vector<80x162xf32> to vector<80x162xbf16>
    %c4_36 = arith.constant 4 : index
    %c0_37 = arith.constant 0 : index
    %c0_38 = arith.constant 0 : index
    %77 = vector.load %arg4[%c4_36, %c0_37, %c0_38] : memref<5x162x160xbf16, #tpu.memory_space<vmem>>, vector<1x162x160xbf16>
    %78 = vector.shape_cast %77 : vector<1x162x160xbf16> to vector<162x160xbf16>
    %cst_39 = arith.constant dense<0.000000e+00> : vector<80x160xf32>
    %79 = tpu.matmul %76, %78, %cst_39 {dimension_numbers = #tpu.dot_dimension_numbers<[1], [0], [0], [1], [0, 0, 1, 1], [], []>} : vector<80x162xbf16>, vector<162x160xbf16>, vector<80x160xf32> -> vector<80x160xf32>
    %80 = arith.addf %73, %79 : vector<80x160xf32>
    %c0_40 = arith.constant 0 : index
    %c0_41 = arith.constant 0 : index
    %81 = vector.load %arg5[%c0_40, %c0_41] : memref<1x160xf32, #tpu.memory_space<vmem>>, vector<1x160xf32>
    %82 = vector.broadcast %81 : vector<1x160xf32> to vector<80x160xf32>
    %83 = arith.addf %80, %82 : vector<80x160xf32>
    %cst_42 = arith.constant 0.000000e+00 : f32
    %84 = vector.broadcast %cst_42 : f32 to vector<80x160xf32>
    %85 = arith.maximumf %83, %84 : vector<80x160xf32>
    %86 = vector.shape_cast %85 : vector<80x160xf32> to vector<5x16x160xf32>
    %87 = vector.extract_strided_slice %86 {offsets = [0, 0, 0], sizes = [5, 8, 160], strides = [1, 1, 1]} : vector<5x16x160xf32> to vector<5x8x160xf32>
    %88 = vector.extract_strided_slice %86 {offsets = [0, 8, 0], sizes = [5, 8, 160], strides = [1, 1, 1]} : vector<5x16x160xf32> to vector<5x8x160xf32>
    %89 = arith.maximumf %87, %88 : vector<5x8x160xf32>
    %90 = vector.extract_strided_slice %89 {offsets = [0, 0, 0], sizes = [5, 8, 144], strides = [1, 1, 1]} : vector<5x8x160xf32> to vector<5x8x144xf32>
    %91 = vector.extract_strided_slice %89 {offsets = [0, 0, 16], sizes = [5, 8, 144], strides = [1, 1, 1]} : vector<5x8x160xf32> to vector<5x8x144xf32>
    %92 = arith.maximumf %90, %91 : vector<5x8x144xf32>
    %93 = vector.extract_strided_slice %92 {offsets = [0, 0, 0], sizes = [1, 8, 144], strides = [1, 1, 1]} : vector<5x8x144xf32> to vector<1x8x144xf32>
    %94 = vector.shape_cast %93 : vector<1x8x144xf32> to vector<8x144xf32>
    %95 = arith.truncf %94 : vector<8x144xf32> to vector<8x144xbf16>
    %c0_43 = arith.constant 0 : index
    %c0_44 = arith.constant 0 : index
    %c0_45 = arith.constant 0 : index
    %96 = vector.load %arg6[%c0_43, %c0_44, %c0_45] : memref<5x144x120xbf16, #tpu.memory_space<vmem>>, vector<1x144x120xbf16>
    %97 = vector.shape_cast %96 : vector<1x144x120xbf16> to vector<144x120xbf16>
    %cst_46 = arith.constant dense<0.000000e+00> : vector<8x120xf32>
    %98 = tpu.matmul %95, %97, %cst_46 {dimension_numbers = #tpu.dot_dimension_numbers<[1], [0], [0], [1], [0, 0, 1, 1], [], []>} : vector<8x144xbf16>, vector<144x120xbf16>, vector<8x120xf32> -> vector<8x120xf32>
    %99 = vector.extract_strided_slice %92 {offsets = [1, 0, 0], sizes = [1, 8, 144], strides = [1, 1, 1]} : vector<5x8x144xf32> to vector<1x8x144xf32>
    %100 = vector.shape_cast %99 : vector<1x8x144xf32> to vector<8x144xf32>
    %101 = arith.truncf %100 : vector<8x144xf32> to vector<8x144xbf16>
    %c1_47 = arith.constant 1 : index
    %c0_48 = arith.constant 0 : index
    %c0_49 = arith.constant 0 : index
    %102 = vector.load %arg6[%c1_47, %c0_48, %c0_49] : memref<5x144x120xbf16, #tpu.memory_space<vmem>>, vector<1x144x120xbf16>
    %103 = vector.shape_cast %102 : vector<1x144x120xbf16> to vector<144x120xbf16>
    %cst_50 = arith.constant dense<0.000000e+00> : vector<8x120xf32>
    %104 = tpu.matmul %101, %103, %cst_50 {dimension_numbers = #tpu.dot_dimension_numbers<[1], [0], [0], [1], [0, 0, 1, 1], [], []>} : vector<8x144xbf16>, vector<144x120xbf16>, vector<8x120xf32> -> vector<8x120xf32>
    %105 = arith.addf %98, %104 : vector<8x120xf32>
    %106 = vector.extract_strided_slice %92 {offsets = [2, 0, 0], sizes = [1, 8, 144], strides = [1, 1, 1]} : vector<5x8x144xf32> to vector<1x8x144xf32>
    %107 = vector.shape_cast %106 : vector<1x8x144xf32> to vector<8x144xf32>
    %108 = arith.truncf %107 : vector<8x144xf32> to vector<8x144xbf16>
    %c2_51 = arith.constant 2 : index
    %c0_52 = arith.constant 0 : index
    %c0_53 = arith.constant 0 : index
    %109 = vector.load %arg6[%c2_51, %c0_52, %c0_53] : memref<5x144x120xbf16, #tpu.memory_space<vmem>>, vector<1x144x120xbf16>
    %110 = vector.shape_cast %109 : vector<1x144x120xbf16> to vector<144x120xbf16>
    %cst_54 = arith.constant dense<0.000000e+00> : vector<8x120xf32>
    %111 = tpu.matmul %108, %110, %cst_54 {dimension_numbers = #tpu.dot_dimension_numbers<[1], [0], [0], [1], [0, 0, 1, 1], [], []>} : vector<8x144xbf16>, vector<144x120xbf16>, vector<8x120xf32> -> vector<8x120xf32>
    %112 = arith.addf %105, %111 : vector<8x120xf32>
    %113 = vector.extract_strided_slice %92 {offsets = [3, 0, 0], sizes = [1, 8, 144], strides = [1, 1, 1]} : vector<5x8x144xf32> to vector<1x8x144xf32>
    %114 = vector.shape_cast %113 : vector<1x8x144xf32> to vector<8x144xf32>
    %115 = arith.truncf %114 : vector<8x144xf32> to vector<8x144xbf16>
    %c3_55 = arith.constant 3 : index
    %c0_56 = arith.constant 0 : index
    %c0_57 = arith.constant 0 : index
    %116 = vector.load %arg6[%c3_55, %c0_56, %c0_57] : memref<5x144x120xbf16, #tpu.memory_space<vmem>>, vector<1x144x120xbf16>
    %117 = vector.shape_cast %116 : vector<1x144x120xbf16> to vector<144x120xbf16>
    %cst_58 = arith.constant dense<0.000000e+00> : vector<8x120xf32>
    %118 = tpu.matmul %115, %117, %cst_58 {dimension_numbers = #tpu.dot_dimension_numbers<[1], [0], [0], [1], [0, 0, 1, 1], [], []>} : vector<8x144xbf16>, vector<144x120xbf16>, vector<8x120xf32> -> vector<8x120xf32>
    %119 = arith.addf %112, %118 : vector<8x120xf32>
    %120 = vector.extract_strided_slice %92 {offsets = [4, 0, 0], sizes = [1, 8, 144], strides = [1, 1, 1]} : vector<5x8x144xf32> to vector<1x8x144xf32>
    %121 = vector.shape_cast %120 : vector<1x8x144xf32> to vector<8x144xf32>
    %122 = arith.truncf %121 : vector<8x144xf32> to vector<8x144xbf16>
    %c4_59 = arith.constant 4 : index
    %c0_60 = arith.constant 0 : index
    %c0_61 = arith.constant 0 : index
    %123 = vector.load %arg6[%c4_59, %c0_60, %c0_61] : memref<5x144x120xbf16, #tpu.memory_space<vmem>>, vector<1x144x120xbf16>
    %124 = vector.shape_cast %123 : vector<1x144x120xbf16> to vector<144x120xbf16>
    %cst_62 = arith.constant dense<0.000000e+00> : vector<8x120xf32>
    %125 = tpu.matmul %122, %124, %cst_62 {dimension_numbers = #tpu.dot_dimension_numbers<[1], [0], [0], [1], [0, 0, 1, 1], [], []>} : vector<8x144xbf16>, vector<144x120xbf16>, vector<8x120xf32> -> vector<8x120xf32>
    %126 = arith.addf %119, %125 : vector<8x120xf32>
    %c0_63 = arith.constant 0 : index
    %c0_64 = arith.constant 0 : index
    %127 = vector.load %arg7[%c0_63, %c0_64] : memref<1x120xf32, #tpu.memory_space<vmem>>, vector<1x120xf32>
    %128 = vector.broadcast %127 : vector<1x120xf32> to vector<8x120xf32>
    %129 = arith.addf %126, %128 : vector<8x120xf32>
    %cst_65 = arith.constant 0.000000e+00 : f32
    %130 = vector.broadcast %cst_65 : f32 to vector<8x120xf32>
    %131 = arith.maximumf %129, %130 : vector<8x120xf32>
    %132 = arith.truncf %131 : vector<8x120xf32> to vector<8x120xbf16>
    %c0_66 = arith.constant 0 : index
    %c0_67 = arith.constant 0 : index
    %133 = vector.load %arg8[%c0_66, %c0_67] : memref<120x84xbf16, #tpu.memory_space<vmem>>, vector<120x84xbf16>
    %cst_68 = arith.constant dense<0.000000e+00> : vector<8x84xf32>
    %134 = tpu.matmul %132, %133, %cst_68 {dimension_numbers = #tpu.dot_dimension_numbers<[1], [0], [0], [1], [0, 0, 1, 1], [], []>} : vector<8x120xbf16>, vector<120x84xbf16>, vector<8x84xf32> -> vector<8x84xf32>
    %c0_69 = arith.constant 0 : index
    %c0_70 = arith.constant 0 : index
    %135 = vector.load %arg9[%c0_69, %c0_70] : memref<1x84xf32, #tpu.memory_space<vmem>>, vector<1x84xf32>
    %136 = vector.broadcast %135 : vector<1x84xf32> to vector<8x84xf32>
    %137 = arith.addf %134, %136 : vector<8x84xf32>
    %cst_71 = arith.constant 0.000000e+00 : f32
    %138 = vector.broadcast %cst_71 : f32 to vector<8x84xf32>
    %139 = arith.maximumf %137, %138 : vector<8x84xf32>
    %140 = arith.truncf %139 : vector<8x84xf32> to vector<8x84xbf16>
    %c0_72 = arith.constant 0 : index
    %c0_73 = arith.constant 0 : index
    %141 = vector.load %arg10[%c0_72, %c0_73] : memref<84x128xbf16, #tpu.memory_space<vmem>>, vector<84x128xbf16>
    %cst_74 = arith.constant dense<0.000000e+00> : vector<8x128xf32>
    %142 = tpu.matmul %140, %141, %cst_74 {dimension_numbers = #tpu.dot_dimension_numbers<[1], [0], [0], [1], [0, 0, 1, 1], [], []>} : vector<8x84xbf16>, vector<84x128xbf16>, vector<8x128xf32> -> vector<8x128xf32>
    %c0_75 = arith.constant 0 : index
    %c0_76 = arith.constant 0 : index
    %143 = vector.load %arg11[%c0_75, %c0_76] : memref<1x128xf32, #tpu.memory_space<vmem>>, vector<1x128xf32>
    %144 = vector.broadcast %143 : vector<1x128xf32> to vector<8x128xf32>
    %145 = arith.addf %142, %144 : vector<8x128xf32>
    %c0_77 = arith.constant 0 : index
    %c0_78 = arith.constant 0 : index
    %146 = vector.load %arg12[%c0_77, %c0_78] : memref<8x128xf32, #tpu.memory_space<vmem>>, vector<8x128xf32>
    tpu.vector_store %arg12[%c0_77, %c0_78], %145 {strides = array<i32>} : memref<8x128xf32, #tpu.memory_space<vmem>>, vector<8x128xf32>,
    return
  }
  func.func @transform_0(%arg0: i32) -> (i32, i32, i32) {
    %c0_i32 = arith.constant 0 : i32
    %c0_i32_0 = arith.constant 0 : i32
    %c0_i32_1 = arith.constant 0 : i32
    return %c0_i32, %arg0, %c0_i32_0 : i32, i32, i32
  }
  func.func @transform_1(%arg0: i32) -> (i32, i32, i32) {
    %c0_i32 = arith.constant 0 : i32
    %c0_i32_0 = arith.constant 0 : i32
    %c0_i32_1 = arith.constant 0 : i32
    %c0_i32_2 = arith.constant 0 : i32
    return %c0_i32, %c0_i32_0, %c0_i32_1 : i32, i32, i32
  }
  func.func @transform_2(%arg0: i32) -> (i32, i32) {
    %c0_i32 = arith.constant 0 : i32
    %c0_i32_0 = arith.constant 0 : i32
    %c0_i32_1 = arith.constant 0 : i32
    return %c0_i32, %c0_i32_0 : i32, i32
  }
  func.func @transform_3(%arg0: i32) -> (i32, i32, i32) {
    %c0_i32 = arith.constant 0 : i32
    %c0_i32_0 = arith.constant 0 : i32
    %c0_i32_1 = arith.constant 0 : i32
    %c0_i32_2 = arith.constant 0 : i32
    return %c0_i32, %c0_i32_0, %c0_i32_1 : i32, i32, i32
  }
  func.func @transform_4(%arg0: i32) -> (i32, i32) {
    %c0_i32 = arith.constant 0 : i32
    %c0_i32_0 = arith.constant 0 : i32
    %c0_i32_1 = arith.constant 0 : i32
    return %c0_i32, %c0_i32_0 : i32, i32
  }
  func.func @transform_5(%arg0: i32) -> (i32, i32, i32) {
    %c0_i32 = arith.constant 0 : i32
    %c0_i32_0 = arith.constant 0 : i32
    %c0_i32_1 = arith.constant 0 : i32
    %c0_i32_2 = arith.constant 0 : i32
    return %c0_i32, %c0_i32_0, %c0_i32_1 : i32, i32, i32
  }
  func.func @transform_6(%arg0: i32) -> (i32, i32) {
    %c0_i32 = arith.constant 0 : i32
    %c0_i32_0 = arith.constant 0 : i32
    %c0_i32_1 = arith.constant 0 : i32
    return %c0_i32, %c0_i32_0 : i32, i32
  }
  func.func @transform_7(%arg0: i32) -> (i32, i32) {
    %c0_i32 = arith.constant 0 : i32
    %c0_i32_0 = arith.constant 0 : i32
    %c0_i32_1 = arith.constant 0 : i32
    return %c0_i32, %c0_i32_0 : i32, i32
  }
  func.func @transform_8(%arg0: i32) -> (i32, i32) {
    %c0_i32 = arith.constant 0 : i32
    %c0_i32_0 = arith.constant 0 : i32
    %c0_i32_1 = arith.constant 0 : i32
    return %c0_i32, %c0_i32_0 : i32, i32
  }
  func.func @transform_9(%arg0: i32) -> (i32, i32) {
    %c0_i32 = arith.constant 0 : i32
    %c0_i32_0 = arith.constant 0 : i32
    %c0_i32_1 = arith.constant 0 : i32
    return %c0_i32, %c0_i32_0 : i32, i32
  }
  func.func @transform_10(%arg0: i32) -> (i32, i32) {
    %c0_i32 = arith.constant 0 : i32
    %c0_i32_0 = arith.constant 0 : i32
    %c0_i32_1 = arith.constant 0 : i32
    return %c0_i32, %c0_i32_0 : i32, i32
  }
  func.func @transform_11(%arg0: i32) -> (i32, i32) {
    %c0_i32 = arith.constant 0 : i32
    %c0_i32_0 = arith.constant 0 : i32
    return %arg0, %c0_i32 : i32, i32
  }
}

</mosaic_0001>

<bundles_post_ra>
// kernel: forward.1
= control target key start
LH: loop header
LB: loop body
LE: loop exit
PB: predicated region body
PF: predicated region fallthrough
CT: control target
= control target key end

     0   :  { %vm128_vm0 = vcmask 261120   ;;  %vm1763_vm1 = vcmask 1040384   ;;  %s5207_s17 = smov 122   ;;  %vm1508_vm2 = vcmask 998400   ;;  %vm1747_vm3 = vcmask 277504   ;;  %s7889_s1 = inlined_call_operand.vmem [shape: bf16[5,32,168], index: 1, kind: input, shape index: {}]   ;;  %s7890_s0 = inlined_call_operand.vmem [shape: f32[32,8,32], index: 0, kind: input, shape index: {}]   ;;  %s7891_s3 = inlined_call_operand.vmem [shape: bf16[5,162,160], index: 3, kind: input, shape index: {}]   ;;  %s7892_s2 = inlined_call_operand.vmem [shape: f32[1,168], index: 2, kind: input, shape index: {}]   ;;  %s7893_s4 = inlined_call_operand.vmem [shape: f32[1,160], index: 4, kind: input, shape index: {}]   ;;  %s7894_s5 = inlined_call_operand.vmem [shape: bf16[5,144,120], index: 5, kind: input, shape index: {}]   ;;  %s7895_s6 = inlined_call_operand.vmem [shape: f32[1,120], index: 6, kind: input, shape index: {}]   ;;  %s7896_s8 = inlined_call_operand.vmem [shape: f32[1,84], index: 8, kind: input, shape index: {}]   ;;  %s7897_s7 = inlined_call_operand.vmem [shape: bf16[120,84], index: 7, kind: input, shape index: {}]   ;;  %s7898_s9 = inlined_call_operand.vmem [shape: bf16[84,128], index: 9, kind: input, shape index: {}]   ;;  %s7899_s10 = inlined_call_operand.vmem [shape: f32[1,128], index: 10, kind: input, shape index: {}]   ;;  %s7900_s11 = inlined_call_operand.vmem [shape: f32[8,128], index: 11, kind: output, shape index: {}]  }
   0x1   :  { %v3867_v0 = vld [vmem:[%s7889_s1 + $0x30] sm:$0xf]  ;;  %v4937_v1 = vld [vmem:[%s7889_s1 + $0x34] sm:$0xf0]  ;;  %v4936_v2 = vld [vmem:[%s7889_s1 + $0x34] sm:$0xf] }
   0x2   :  { %v3868_v3 = vor.u32 %v4937_v1, %v3867_v0  ;;  %v3869_v4 = vld [vmem:[%s7889_s1 + $0x38] sm:$0xf0]  ;;  %v3911_v5 = vld [vmem:[%s7889_s1 + $0x10] sm:$0xf]  ;;  %v4933_v6 = vld [vmem:[%s7889_s1 + $0x14] sm:$0xf0] }
   0x3   :  { %v3872_v7 = vor.u32 %v4936_v2, %v3869_v4  ;;  %v3912_v8 = vor.u32 %v4933_v6, %v3911_v5  ;;  %v4932_v9 = vld [vmem:[%s7889_s1 + $0x14] sm:$0xf]  ;;  %v3913_v10 = vld [vmem:[%s7889_s1 + $0x18] sm:$0xf0]  ;;  %v3859_v11 = vld [vmem:[%s7889_s1 + $0x20] sm:$0xf] }
   0x4   :  { %177 = vmatpush.bf16.msra.mxu0 %v3868_v3  ;;  %v3916_v12 = vor.u32 %v4932_v9, %v3913_v10  ;;  %v4935_v13 = vld [vmem:[%s7889_s1 + $0x24] sm:$0xf0]  ;;  %v4934_v14 = vld [vmem:[%s7889_s1 + $0x24] sm:$0xf]  ;;  %v3861_v15 = vld [vmem:[%s7889_s1 + $0x28] sm:$0xf0] }
   0x5   :  { %256 = vmatpush.bf16.msra.mxu1 %v3872_v7  ;;  %397 = vmatpush.bf16.msra.mxu2 %v3912_v8  ;;  %v3860_v16 = vor.u32 %v4935_v13, %v3859_v11  ;;  %v3864_v17 = vor.u32 %v4934_v14, %v3861_v15  ;;  %v3903_v18 = vld [vmem:[%s7889_s1] sm:$0xf]  ;;  %v4931_v19 = vld [vmem:[%s7889_s1 + $0x4] sm:$0xf0]  ;;  %v4930_v20 = vld [vmem:[%s7889_s1 + $0x4] sm:$0xf] }
   0x6   :  { %476 = vmatpush.bf16.msra.mxu3 %v3916_v12  ;;  %v3904_v21 = vor.u32 %v4931_v19, %v3903_v18  ;;  %v3905_v22 = vld [vmem:[%s7889_s1 + $0x8] sm:$0xf0]  ;;  %v41_v24 = vld [vmem:[%s7890_s0 + $0x10] sm:$0xff]  ;;  %v39_v27 = vld [vmem:[%s7890_s0] sm:$0xff]  ;;  %vm3136_vm4 = vcmask 916480   ;;  %vm3257_vm5 = vcmask 130048  }
   0x7   :  { %v40_v23 = vld [vmem:[%s7890_s0 + $0x8] sm:$0xff]  ;;  %v3908_v25 = vor.u32 %v4930_v20, %v3905_v22  ;;  %v3959_v28 = vld [vmem:[%s7889_s1 + $0x50] sm:$0xf]  ;;  %v4941_v30 = vld [vmem:[%s7889_s1 + $0x54] sm:$0xf0]  ;;  %vm3760_vm6 = vcmask 1043456  }
   0x8   :  { %v89_v26 = vpack.c.bf16 %v41_v24, %v40_v23  ;;  %178 = vmatpush.bf16.msra.mxu0 %v3860_v16  ;;  %v71_v29 = vpack.c.bf16 %v40_v23, %v39_v27  ;;  %v4940_v31 = vld [vmem:[%s7889_s1 + $0x54] sm:$0xf]  ;;  %v3961_v32 = vld [vmem:[%s7889_s1 + $0x58] sm:$0xf0]  ;;  %v3960_v33 = vor.u32 %v4941_v30, %v3959_v28  ;;  %v43_v36 = vld [vmem:[%s7890_s0 + $0x20] sm:$0xff]  ;;  %vm3831_vm7 = vcmask 1041408  }
   0x9   :  { %257 = vmatpush.bf16.msra.mxu1 %v3864_v17  ;;  %398 = vmatpush.bf16.msra.mxu2 %v3904_v21  ;;  %v3964_v34 = vor.u32 %v4940_v31, %v3961_v32  ;;  %v42_v35 = vld [vmem:[%s7890_s0 + $0x18] sm:$0xff]  ;;  %v44_v39 = vld [vmem:[%s7890_s0 + $0x28] sm:$0xff]  ;;  %v45_v40 = vld [vmem:[%s7890_s0 + $0x30] sm:$0xff]  ;;  %vm3756_vm8 = vcmask 982016   ;;  %vm3827_vm9 = vcmask 687104  }
   0xa   :  { %477 = vmatpush.bf16.msra.mxu3 %v3908_v25  ;;  %v5348_v37 = vpack.c.bf16 %v43_v36, %v42_v35  ;;  %v5350_v38 = vpack.c.bf16 %v42_v35, %v41_v24  ;;  %v5366_v41 = vpack.c.bf16 %v45_v40, %v44_v39  ;;  %v5368_v42 = vpack.c.bf16 %v44_v39, %v43_v36  ;;  %v46_v43 = vld [vmem:[%s7890_s0 + $0x38] sm:$0xff]  ;;  %v47_v44 = vld [vmem:[%s7890_s0 + $0x40] sm:$0xff]  ;;  %v48_v47 = vld [vmem:[%s7890_s0 + $0x48] sm:$0xff] }
   0xb   :  { %3873 = vmatmul.msk.bf16.vlgmr.msra.gmra.mxu0 %vm128_vm0, %v89_v26  ;;  %v5384_v45 = vpack.c.bf16 %v47_v44, %v46_v43  ;;  %v5386_v46 = vpack.c.bf16 %v46_v43, %v45_v40  ;;  %v49_v48 = vld [vmem:[%s7890_s0 + $0x50] sm:$0xff]  ;;  %v5404_v50 = vpack.c.bf16 %v48_v47, %v47_v44  ;;  %v50_v51 = vld [vmem:[%s7890_s0 + $0x58] sm:$0xff]  ;;  %v51_v52 = vld [vmem:[%s7890_s0 + $0x60] sm:$0xff] }
   0xc   :  { %3887 = vmatmul.msk.bf16.vlgmr.msra.gmra.mxu1 %vm128_vm0, %v89_v26  ;;  %3917 = vmatmul.msk.bf16.vlgmr.msra.gmra.mxu2 %vm128_vm0, %v71_v29  ;;  %7916 = vst [vmem:[#allocation2_spill] sm:$0xff] %v5368_v42  ;;  %v5402_v49 = vpack.c.bf16 %v49_v48, %v48_v47  ;;  %v5420_v53 = vpack.c.bf16 %v51_v52, %v50_v51  ;;  %v3951_v55 = vld [vmem:[%s7889_s1 + $0x40] sm:$0xf]  ;;  %v4939_v56 = vld [vmem:[%s7889_s1 + $0x44] sm:$0xf0]  ;;  %v53_v62 = vld [vmem:[%s7890_s0 + $0x70] sm:$0xff] }
   0xd   :  { %663 = vmatpush.bf16.msrb.mxu1 %v3964_v34  ;;  %3931 = vmatmul.msk.bf16.vlgmr.msra.gmra.mxu3 %vm128_vm0, %v71_v29  ;;  %7917 = vst [vmem:[#allocation3_spill] sm:$0xff] %v5386_v46  ;;  %v5422_v54 = vpack.c.bf16 %v50_v51, %v49_v48  ;;  %v4938_v57 = vld [vmem:[%s7889_s1 + $0x44] sm:$0xf]  ;;  %v3952_v58 = vor.u32 %v4939_v56, %v3951_v55  ;;  %v3953_v59 = vld [vmem:[%s7889_s1 + $0x48] sm:$0xf0]  ;;  %v54_v1 = vld [vmem:[%s7890_s0 + $0x78] sm:$0xff] }
   0xe   :  { %584 = vmatpush.bf16.msrb.mxu0 %v3960_v33  ;;  %7918 = vst [vmem:[#allocation4_spill] sm:$0xff] %v5404_v50  ;;  %v3956_v60 = vor.u32 %v4938_v57, %v3953_v59  ;;  %v52_v61 = vld [vmem:[%s7890_s0 + $0x68] sm:$0xff]  ;;  %v55_v2 = vld [vmem:[%s7890_s0 + $0x80] sm:$0xff]  ;;  %v5470_v4 = vpack.c.bf16 %v54_v1, %v53_v62  ;;  %v57_v6 = vld [vmem:[%s7890_s0 + $0x90] sm:$0xff] }
   0xf   :  { %7919 = vst [vmem:[#allocation5_spill] sm:$0xff] %v5422_v54  ;;  %v5450_v63 = vpack.c.bf16 %v53_v62, %v52_v61  ;;  %v5452_v0 = vpack.c.bf16 %v52_v61, %v51_v52  ;;  %v5468_v3 = vpack.c.bf16 %v55_v2, %v54_v1  ;;  %v56_v5 = vld [vmem:[%s7890_s0 + $0x88] sm:$0xff]  ;;  %v58_v17 = vld [vmem:[%s7890_s0 + $0x98] sm:$0xff]  ;;  %v59_v18 = vld [vmem:[%s7890_s0 + $0xa0] sm:$0xff] }
  0x10   :  { %v5486_v7 = vpack.c.bf16 %v57_v6, %v56_v5  ;;  %v5488_v9 = vpack.c.bf16 %v56_v5, %v55_v2  ;;  %v5508_v20 = vpack.c.bf16 %v59_v18, %v58_v17  ;;  %v5512_v24 = vpack.c.bf16 %v58_v17, %v57_v6  ;;  %v60_v33 = vld [vmem:[%s7890_s0 + $0xa8] sm:$0xff]  ;;  %v61_v34 = vld [vmem:[%s7890_s0 + $0xb0] sm:$0xff]  ;;  %v62_v59 = vld [vmem:[%s7890_s0 + $0xb8] sm:$0xff] }
  0x11   :  { %664 = vmatpush.bf16.msrb.mxu1 %v3956_v60  ;;  %7920 = vst [vmem:[#allocation6_spill] sm:$0xff] %v5452_v0  ;;  %v5534_v36 = vpack.c.bf16 %v61_v34, %v60_v33  ;;  %v5538_v44 = vpack.c.bf16 %v60_v33, %v59_v18  ;;  %v63_v60 = vld [vmem:[%s7890_s0 + $0xc0] sm:$0xff]  ;;  %v5564_v6 = vpack.c.bf16 %v62_v59, %v61_v34 }
  0x12   :  { %585 = vmatpush.bf16.msrb.mxu0 %v3952_v58  ;;  %7921 = vst [vmem:[#allocation7_spill] sm:$0xff] %v5488_v9  ;;  %v5560_v62 = vpack.c.bf16 %v63_v60, %v62_v59  ;;  %v4001_v59 = vld [vmem:[%s7889_s1 + $0x68] sm:$0xf0] }
  0x1b   :  { %3874 = vmatmul.msk.bf16.gmra.mxu0 %vm128_vm0, %v5348_v37 }
  0x1c   :  { %3888 = vmatmul.msk.bf16.gmra.mxu1 %vm128_vm0, %v5348_v37  ;;  %3918 = vmatmul.msk.bf16.gmra.mxu2 %vm128_vm0, %v5350_v38 }
  0x1d   :  { %3932 = vmatmul.msk.bf16.gmra.mxu3 %vm128_vm0, %v5350_v38 }
  0x2b   :  { %3875 = vmatmul.msk.bf16.gmra.mxu0 %vm128_vm0, %v5366_v41 }
  0x2c   :  { %3889 = vmatmul.msk.bf16.gmra.mxu1 %vm128_vm0, %v5366_v41  ;;  %3919 = vmatmul.msk.bf16.gmra.mxu2 %vm128_vm0, %v5368_v42 }
  0x2d   :  { %3933 = vmatmul.msk.bf16.gmra.mxu3 %vm128_vm0, %v5368_v42 }
  0x3b   :  { %3876 = vmatmul.msk.bf16.gmra.mxu0 %vm128_vm0, %v5384_v45 }
  0x3c   :  { %3890 = vmatmul.msk.bf16.gmra.mxu1 %vm128_vm0, %v5384_v45  ;;  %3920 = vmatmul.msk.bf16.gmra.mxu2 %vm128_vm0, %v5386_v46 }
  0x3d   :  { %3934 = vmatmul.msk.bf16.gmra.mxu3 %vm128_vm0, %v5386_v46 }
  0x4b   :  { %3877 = vmatmul.msk.bf16.gmra.mxu0 %vm128_vm0, %v5402_v49 }
  0x4c   :  { %3891 = vmatmul.msk.bf16.gmra.mxu1 %vm128_vm0, %v5402_v49  ;;  %3921 = vmatmul.msk.bf16.gmra.mxu2 %vm128_vm0, %v5404_v50 }
  0x4d   :  { %3935 = vmatmul.msk.bf16.gmra.mxu3 %vm128_vm0, %v5404_v50 }
  0x5b   :  { %3878 = vmatmul.msk.bf16.gmra.mxu0 %vm128_vm0, %v5420_v53 }
  0x5c   :  { %3892 = vmatmul.msk.bf16.gmra.mxu1 %vm128_vm0, %v5420_v53  ;;  %3922 = vmatmul.msk.bf16.gmra.mxu2 %vm128_vm0, %v5422_v54 }
  0x5d   :  { %3936 = vmatmul.msk.bf16.gmra.mxu3 %vm128_vm0, %v5422_v54 }
  0x6b   :  { %3879 = vmatmul.msk.bf16.gmra.mxu0 %vm128_vm0, %v5450_v63 }
  0x6c   :  { %3893 = vmatmul.msk.bf16.gmra.mxu1 %vm128_vm0, %v5450_v63  ;;  %3923 = vmatmul.msk.bf16.gmra.mxu2 %vm128_vm0, %v5452_v0 }
  0x6d   :  { %3937 = vmatmul.msk.bf16.gmra.mxu3 %vm128_vm0, %v5452_v0 }
  0x7b   :  { %3880 = vmatmul.msk.bf16.gmra.mxu0 %vm128_vm0, %v5468_v3 }
  0x7c   :  { %3894 = vmatmul.msk.bf16.gmra.mxu1 %vm128_vm0, %v5468_v3  ;;  %3924 = vmatmul.msk.bf16.gmra.mxu2 %vm128_vm0, %v5470_v4 }
  0x7d   :  { %3938 = vmatmul.msk.bf16.gmra.mxu3 %vm128_vm0, %v5470_v4 }
  0x88   :  { %v180_v8 = vpop.f32.mrf.mxu0 }
  0x89   :  { %v259_v10 = vpop.f32.mrf.mxu1 }
  0x8b   :  { %3881 = vmatmul.msk.bf16.gmra.mxu0 %vm128_vm0, %v5486_v7 }
  0x8c   :  { %3895 = vmatmul.msk.bf16.gmra.mxu1 %vm128_vm0, %v5486_v7  ;;  %3925 = vmatmul.msk.bf16.gmra.mxu2 %vm128_vm0, %v5488_v9 }
  0x8d   :  { %3939 = vmatmul.msk.bf16.gmra.mxu3 %vm128_vm0, %v5488_v9 }
  0x8f   :  { %v400_v11 = vpop.f32.mrf.mxu2 }
  0x90   :  { %v5498_v12 = vadd.f32 %v400_v11, %v180_v8  ;;  %v479_v13 = vpop.f32.mrf.mxu3  ;;  %v182_v14 = vpop.f32.mrf.mxu0 }
  0x91   :  { %v5500_v15 = vadd.f32 %v479_v13, %v259_v10  ;;  %v261_v16 = vpop.f32.mrf.mxu1 }
  0x97   :  { %v402_v19 = vpop.f32.mrf.mxu2 }
  0x98   :  { %v5510_v21 = vadd.f32 %v402_v19, %v182_v14  ;;  %v481_v22 = vpop.f32.mrf.mxu3  ;;  %v185_v23 = vpop.f32.mrf.mxu0  ;;  %v4007_v19 = vld [vmem:[%s7889_s1 + $0x70] sm:$0xf] }
  0x99   :  { %v5514_v25 = vadd.f32 %v481_v22, %v261_v16  ;;  %v264_v26 = vpop.f32.mrf.mxu1  ;;  %v4945_v22 = vld [vmem:[%s7889_s1 + $0x74] sm:$0xf0] }
  0x9b   :  { %3882 = vmatmul.msk.bf16.gmra.mxu0 %vm128_vm0, %v5508_v20 }
  0x9c   :  { %3896 = vmatmul.msk.bf16.gmra.mxu1 %vm128_vm0, %v5508_v20  ;;  %3926 = vmatmul.msk.bf16.gmra.mxu2 %vm128_vm0, %v5512_v24 }
  0x9d   :  { %3940 = vmatmul.msk.bf16.gmra.mxu3 %vm128_vm0, %v5512_v24 }
  0x9f   :  { %v405_v27 = vpop.f32.mrf.mxu2 }
  0xa0   :  { %v5524_v28 = vadd.f32 %v405_v27, %v185_v23  ;;  %v484_v29 = vpop.f32.mrf.mxu3  ;;  %v187_v30 = vpop.f32.mrf.mxu0  ;;  %v4944_v23 = vld [vmem:[%s7889_s1 + $0x74] sm:$0xf]  ;;  %v4009_v27 = vld [vmem:[%s7889_s1 + $0x78] sm:$0xf0] }
  0xa1   :  { %v5526_v31 = vadd.f32 %v484_v29, %v264_v26  ;;  %v266_v32 = vpop.f32.mrf.mxu1  ;;  %v4008_v26 = vor.u32 %v4945_v22, %v4007_v19  ;;  %v4012_v29 = vor.u32 %v4944_v23, %v4009_v27 }
  0xa3   :  { %827 = vmatpush.bf16.msrb.mxu2 %v4008_v26  ;;  %906 = vmatpush.bf16.msrb.mxu3 %v4012_v29 }
  0xa7   :  { %v407_v35 = vpop.f32.mrf.mxu2 }
  0xa8   :  { %v5536_v39 = vadd.f32 %v407_v35, %v187_v30  ;;  %v486_v40 = vpop.f32.mrf.mxu3  ;;  %v190_v43 = vpop.f32.mrf.mxu0  ;;  %v64_v30 = vld [vmem:[%s7890_s0 + $0xc8] sm:$0xff]  ;;  %v3999_v35 = vld [vmem:[%s7889_s1 + $0x60] sm:$0xf] }
  0xa9   :  { %v5540_v47 = vadd.f32 %v486_v40, %v266_v32  ;;  %v269_v48 = vpop.f32.mrf.mxu1  ;;  %v65_v32 = vld [vmem:[%s7890_s0 + $0xd0] sm:$0xff]  ;;  %v4943_v40 = vld [vmem:[%s7889_s1 + $0x64] sm:$0xf0] }
  0xaa   :  { %v5598_v34 = vpack.c.bf16 %v65_v32, %v64_v30 }
  0xab   :  { %3883 = vmatmul.msk.bf16.gmra.mxu0 %vm128_vm0, %v5534_v36 }
  0xac   :  { %3897 = vmatmul.msk.bf16.gmra.mxu1 %vm128_vm0, %v5534_v36  ;;  %3927 = vmatmul.msk.bf16.gmra.mxu2 %vm128_vm0, %v5538_v44 }
  0xad   :  { %3941 = vmatmul.msk.bf16.gmra.mxu3 %vm128_vm0, %v5538_v44 }
  0xaf   :  { %v410_v51 = vpop.f32.mrf.mxu2 }
  0xb0   :  { %v5550_v52 = vadd.f32 %v410_v51, %v190_v43  ;;  %v489_v55 = vpop.f32.mrf.mxu3  ;;  %v192_v56 = vpop.f32.mrf.mxu0  ;;  %v4942_v43 = vld [vmem:[%s7889_s1 + $0x64] sm:$0xf] }
  0xb1   :  { %v5552_v57 = vadd.f32 %v489_v55, %v269_v48  ;;  %v271_v58 = vpop.f32.mrf.mxu1 }
  0xb7   :  { %v412_v61 = vpop.f32.mrf.mxu2 }
  0xb8   :  { %v5562_v1 = vadd.f32 %v412_v61, %v192_v56  ;;  %v491_v2 = vpop.f32.mrf.mxu3  ;;  %v195_v5 = vpop.f32.mrf.mxu0  ;;  %v5611_v56 = vpack.c.bf16 %v64_v30, %v63_v60  ;;  %v4055_v60 = vld [vmem:[%s7889_s1 + $0x90] sm:$0xf]  ;;  %v66_v30 = vld [vmem:[%s7890_s0 + $0xd8] sm:$0xff] }
  0xb9   :  { %v5566_v8 = vadd.f32 %v491_v2, %v271_v58  ;;  %v274_v10 = vpop.f32.mrf.mxu1  ;;  %v4000_v58 = vor.u32 %v4943_v40, %v3999_v35 }
  0xbb   :  { %3884 = vmatmul.msk.bf16.gmra.mxu0 %vm128_vm0, %v5560_v62  ;;  %828 = vmatpush.bf16.msrb.mxu2 %v4000_v58  ;;  %v5655_v58 = vpack.c.bf16 %v66_v30, %v65_v32 }
  0xbc   :  { %3898 = vmatmul.msk.bf16.gmra.mxu1 %vm128_vm0, %v5560_v62  ;;  %3928 = vmatmul.msk.bf16.gmra.mxu2 %vm128_vm0, %v5564_v6 }
  0xbd   :  { %3942 = vmatmul.msk.bf16.gmra.mxu3 %vm128_vm0, %v5564_v6 }
  0xbf   :  { %v415_v11 = vpop.f32.mrf.mxu2 }
  0xc0   :  { %v5576_v13 = vadd.f32 %v415_v11, %v195_v5  ;;  %v494_v14 = vpop.f32.mrf.mxu3  ;;  %v197_v16 = vpop.f32.mrf.mxu0  ;;  %v4004_v5 = vor.u32 %v4942_v43, %v4001_v59  ;;  %v4948_v11 = vld [vmem:[%s7889_s1 + $0x94] sm:$0xf] }
  0xc1   :  { %v5578_v17 = vadd.f32 %v494_v14, %v274_v10  ;;  %v276_v18 = vpop.f32.mrf.mxu1  ;;  %v4949_v10 = vld [vmem:[%s7889_s1 + $0x94] sm:$0xf0] }
  0xc2   :  { %907 = vmatpush.bf16.msrb.mxu3 %v4004_v5  ;;  %v4056_v14 = vor.u32 %v4949_v10, %v4055_v60 }
  0xc4   :  { %1070 = vmatpush.bf16.msra.mxu0 %v4056_v14 }
  0xc7   :  { %v417_v33 = vpop.f32.mrf.mxu2 }
  0xc8   :  { %v5609_v48 = vadd.f32 %v417_v33, %v197_v16  ;;  %v496_v51 = vpop.f32.mrf.mxu3  ;;  %v200_v55 = vpop.f32.mrf.mxu0  ;;  %v4057_v16 = vld [vmem:[%s7889_s1 + $0x98] sm:$0xf0]  ;;  %v5648_v33 = vld [vmem:[%s7890_s0 + $0xe0] sm:$0xff] }
  0xc9   :  { %v5616_v61 = vadd.f32 %v496_v51, %v276_v18  ;;  %v279_v2 = vpop.f32.mrf.mxu1  ;;  %v4060_v19 = vor.u32 %v4948_v11, %v4057_v16  ;;  %v5651_v40 = vpack.c.bf16 %v5648_v33, %v66_v30 }
  0xcb   :  { %3885 = vmatmul.msk.bf16.gmra.mxu0 %vm128_vm0, %v5598_v34  ;;  %1149 = vmatpush.bf16.msra.mxu1 %v4060_v19 }
  0xcc   :  { %3899 = vmatmul.msk.bf16.gmra.mxu1 %vm128_vm0, %v5598_v34  ;;  %3929 = vmatmul.msk.bf16.gmra.mxu2 %vm128_vm0, %v5611_v56 }
  0xcd   :  { %3943 = vmatmul.msk.bf16.gmra.mxu3 %vm128_vm0, %v5611_v56 }
  0xcf   :  { %v420_v18 = vpop.f32.mrf.mxu2 }
  0xd0   :  { %v5638_v22 = vadd.f32 %v420_v18, %v200_v55  ;;  %v499_v23 = vpop.f32.mrf.mxu3  ;;  %v202_v26 = vpop.f32.mrf.mxu0 }
  0xd1   :  { %v5640_v27 = vadd.f32 %v499_v23, %v279_v2  ;;  %v281_v29 = vpop.f32.mrf.mxu1 }
  0xd7   :  { %v422_v35 = vpop.f32.mrf.mxu2 }
  0xd8   :  { %v5653_v43 = vadd.f32 %v422_v35, %v202_v26  ;;  %v501_v51 = vpop.f32.mrf.mxu3  ;;  %v205_v55 = vpop.f32.mrf.mxu0 }
  0xd9   :  { %v5657_v59 = vadd.f32 %v501_v51, %v281_v29  ;;  %v284_v2 = vpop.f32.mrf.mxu1 }
  0xdb   :  { %3886 = vmatmul.msk.bf16.gmra.mxu0 %vm128_vm0, %v5651_v40 }
  0xdc   :  { %3900 = vmatmul.msk.bf16.gmra.mxu1 %vm128_vm0, %v5651_v40  ;;  %3930 = vmatmul.msk.bf16.gmra.mxu2 %vm128_vm0, %v5655_v58 }
  0xdd   :  { %3944 = vmatmul.msk.bf16.gmra.mxu3 %vm128_vm0, %v5655_v58 }
  0xdf   :  { %v425_v5 = vpop.f32.mrf.mxu2 }
  0xe0   :  { %v5667_v60 = vadd.f32 %v425_v5, %v205_v55  ;;  %v504_v32 = vpop.f32.mrf.mxu3  ;;  %v207_v10 = vpop.f32.mrf.mxu0 }
  0xe1   :  { %v5669_v11 = vadd.f32 %v504_v32, %v284_v2  ;;  %v286_v14 = vpop.f32.mrf.mxu1 }
  0xe7   :  { %v427_v16 = vpop.f32.mrf.mxu2 }
  0xe8   :  { %v5671_v18 = vadd.f32 %v427_v16, %v207_v10  ;;  %v506_v19 = vpop.f32.mrf.mxu3  ;;  %v210_v23 = vpop.f32.mrf.mxu0 }
  0xe9   :  { %v5673_v26 = vadd.f32 %v506_v19, %v286_v14  ;;  %v289_v29 = vpop.f32.mrf.mxu1 }
  0xeb   :  { %3965 = vmatmul.msk.bf16.vlgmr.msrb.gmra.mxu0 %vm128_vm0, %v5350_v38 }
  0xec   :  { %3979 = vmatmul.msk.bf16.vlgmr.msrb.gmra.mxu1 %vm128_vm0, %v5350_v38  ;;  %4013 = vmatmul.msk.bf16.vlgmr.msrb.gmra.mxu2 %vm128_vm0, %v5348_v37 }
  0xed   :  { %4027 = vmatmul.msk.bf16.vlgmr.msrb.gmra.mxu3 %vm128_vm0, %v5348_v37 }
  0xef   :  { %v430_v30 = vpop.f32.mrf.mxu2 }
  0xf0   :  { %v5683_v35 = vadd.f32 %v430_v30, %v210_v23  ;;  %v509_v51 = vpop.f32.mrf.mxu3  ;;  %v212_v55 = vpop.f32.mrf.mxu0 }
  0xf1   :  { %v5685_v2 = vadd.f32 %v509_v51, %v289_v29  ;;  %v291_v5 = vpop.f32.mrf.mxu1 }
  0xf7   :  { %v432_v32 = vpop.f32.mrf.mxu2 }
  0xf8   :  { %v5687_v10 = vadd.f32 %v432_v32, %v212_v55  ;;  %v511_v14 = vpop.f32.mrf.mxu3  ;;  %v215_v16 = vpop.f32.mrf.mxu0 }
  0xf9   :  { %v5689_v38 = vadd.f32 %v511_v14, %v291_v5  ;;  %v294_v19 = vpop.f32.mrf.mxu1 }
  0xfa   :  { %7922 = vst [vmem:[#allocation8_spill] sm:$0xff] %v5687_v10 }
  0xfb   :  { %7923 = vst [vmem:[#allocation9_spill] sm:$0xff] %v5689_v38  ;;  %3966 = vmatmul.msk.bf16.gmra.mxu0 %vm128_vm0, %v5368_v42 }
  0xfc   :  { %3980 = vmatmul.msk.bf16.gmra.mxu1 %vm128_vm0, %v5368_v42  ;;  %4014 = vmatmul.msk.bf16.gmra.mxu2 %vm128_vm0, %v5366_v41 }
  0xfd   :  { %4028 = vmatmul.msk.bf16.gmra.mxu3 %vm128_vm0, %v5366_v41 }
  0xff   :  { %v435_v37 = vpop.f32.mrf.mxu2 }
 0x100   :  { %v5699_v23 = vadd.f32 %v435_v37, %v215_v16  ;;  %v514_v29 = vpop.f32.mrf.mxu3  ;;  %v217_v30 = vpop.f32.mrf.mxu0 }
 0x101   :  { %v5701_v51 = vadd.f32 %v514_v29, %v294_v19  ;;  %v296_v55 = vpop.f32.mrf.mxu1 }
 0x107   :  { %v437_v5 = vpop.f32.mrf.mxu2 }
 0x108   :  { %v5703_v32 = vadd.f32 %v437_v5, %v217_v30  ;;  %v516_v14 = vpop.f32.mrf.mxu3  ;;  %v220_v38 = vpop.f32.mrf.mxu0 }
 0x109   :  { %v5705_v10 = vadd.f32 %v516_v14, %v296_v55  ;;  %v299_v42 = vpop.f32.mrf.mxu1 }
 0x10a   :  { %7924 = vst [vmem:[#allocation10_spill] sm:$0xff] %v5703_v32 }
 0x10b   :  { %7925 = vst [vmem:[#allocation11_spill] sm:$0xff] %v5705_v10  ;;  %3967 = vmatmul.msk.bf16.gmra.mxu0 %vm128_vm0, %v5386_v46 }
 0x10c   :  { %3981 = vmatmul.msk.bf16.gmra.mxu1 %vm128_vm0, %v5386_v46  ;;  %4015 = vmatmul.msk.bf16.gmra.mxu2 %vm128_vm0, %v5384_v45 }
 0x10d   :  { %4029 = vmatmul.msk.bf16.gmra.mxu3 %vm128_vm0, %v5384_v45 }
 0x10f   :  { %v440_v41 = vpop.f32.mrf.mxu2 }
 0x110   :  { %v5715_v16 = vadd.f32 %v440_v41, %v220_v38  ;;  %v519_v19 = vpop.f32.mrf.mxu3  ;;  %v222_v37 = vpop.f32.mrf.mxu0 }
 0x111   :  { %v5717_v29 = vadd.f32 %v519_v19, %v299_v42  ;;  %v301_v30 = vpop.f32.mrf.mxu1 }
 0x117   :  { %v442_v55 = vpop.f32.mrf.mxu2 }
 0x118   :  { %v5719_v5 = vadd.f32 %v442_v55, %v222_v37  ;;  %v521_v14 = vpop.f32.mrf.mxu3  ;;  %v225_v10 = vpop.f32.mrf.mxu0 }
 0x119   :  { %v5721_v32 = vadd.f32 %v521_v14, %v301_v30  ;;  %v304_v46 = vpop.f32.mrf.mxu1 }
 0x11a   :  { %7926 = vst [vmem:[#allocation12_spill] sm:$0xff] %v5719_v5 }
 0x11b   :  { %7927 = vst [vmem:[#allocation13_spill] sm:$0xff] %v5721_v32  ;;  %3968 = vmatmul.msk.bf16.gmra.mxu0 %vm128_vm0, %v5404_v50 }
 0x11c   :  { %3982 = vmatmul.msk.bf16.gmra.mxu1 %vm128_vm0, %v5404_v50  ;;  %4016 = vmatmul.msk.bf16.gmra.mxu2 %vm128_vm0, %v5402_v49 }
 0x11d   :  { %4030 = vmatmul.msk.bf16.gmra.mxu3 %vm128_vm0, %v5402_v49 }
 0x11f   :  { %v445_v42 = vpop.f32.mrf.mxu2 }
 0x120   :  { %v5731_v45 = vadd.f32 %v445_v42, %v225_v10  ;;  %v524_v38 = vpop.f32.mrf.mxu3  ;;  %v227_v41 = vpop.f32.mrf.mxu0 }
 0x121   :  { %v5733_v19 = vadd.f32 %v524_v38, %v304_v46  ;;  %v306_v37 = vpop.f32.mrf.mxu1 }
 0x123   :  { %7928 = vst [vmem:[#allocation14_spill] sm:$0xff] %v5733_v19 }
 0x127   :  { %v447_v30 = vpop.f32.mrf.mxu2 }
 0x128   :  { %v5735_v55 = vadd.f32 %v447_v30, %v227_v41  ;;  %v526_v14 = vpop.f32.mrf.mxu3  ;;  %v230_v32 = vpop.f32.mrf.mxu0 }
 0x129   :  { %v5737_v5 = vadd.f32 %v526_v14, %v306_v37  ;;  %v309_v50 = vpop.f32.mrf.mxu1 }
 0x12a   :  { %7929 = vst [vmem:[#allocation15_spill] sm:$0xff] %v5735_v55 }
 0x12b   :  { %7930 = vst [vmem:[#allocation16_spill] sm:$0xff] %v5737_v5  ;;  %3969 = vmatmul.msk.bf16.gmra.mxu0 %vm128_vm0, %v5422_v54 }
 0x12c   :  { %3983 = vmatmul.msk.bf16.gmra.mxu1 %vm128_vm0, %v5422_v54  ;;  %4017 = vmatmul.msk.bf16.gmra.mxu2 %vm128_vm0, %v5420_v53 }
 0x12d   :  { %4031 = vmatmul.msk.bf16.gmra.mxu3 %vm128_vm0, %v5420_v53  ;;  %v4947_v53 = vld [vmem:[%s7889_s1 + $0x84] sm:$0xf0] }
 0x12f   :  { %v450_v46 = vpop.f32.mrf.mxu2 }
 0x130   :  { %v5747_v49 = vadd.f32 %v450_v46, %v230_v32  ;;  %v529_v10 = vpop.f32.mrf.mxu3  ;;  %v232_v42 = vpop.f32.mrf.mxu0  ;;  %v4946_v32 = vld [vmem:[%s7889_s1 + $0x84] sm:$0xf] }
 0x131   :  { %v5749_v38 = vadd.f32 %v529_v10, %v309_v50  ;;  %v311_v41 = vpop.f32.mrf.mxu1  ;;  %v4047_v50 = vld [vmem:[%s7889_s1 + $0x80] sm:$0xf]  ;;  %v4049_v10 = vld [vmem:[%s7889_s1 + $0x88] sm:$0xf0] }
 0x132   :  { %7931 = vst [vmem:[#allocation17_spill] sm:$0xff] %v5747_v49  ;;  %v4048_v46 = vor.u32 %v4947_v53, %v4047_v50 }
 0x133   :  { %7932 = vst [vmem:[#allocation18_spill] sm:$0xff] %v5749_v38 }
 0x134   :  { %1071 = vmatpush.bf16.msra.mxu0 %v4048_v46 }
 0x137   :  { %v452_v37 = vpop.f32.mrf.mxu2 }
 0x138   :  { %v5751_v30 = vadd.f32 %v452_v37, %v232_v42  ;;  %v531_v14 = vpop.f32.mrf.mxu3  ;;  %v235_v5 = vpop.f32.mrf.mxu0 }
 0x139   :  { %v5753_v55 = vadd.f32 %v531_v14, %v311_v41  ;;  %v314_v54 = vpop.f32.mrf.mxu1  ;;  %v4052_v41 = vor.u32 %v4946_v32, %v4049_v10 }
 0x13a   :  { %7933 = vst [vmem:[#allocation19_spill] sm:$0xff] %v5751_v30 }
 0x13b   :  { %7934 = vst [vmem:[#allocation20_spill] sm:$0xff] %v5753_v55  ;;  %3970 = vmatmul.msk.bf16.gmra.mxu0 %vm128_vm0, %v5452_v0  ;;  %1150 = vmatpush.bf16.msra.mxu1 %v4052_v41 }
 0x13c   :  { %3984 = vmatmul.msk.bf16.gmra.mxu1 %vm128_vm0, %v5452_v0  ;;  %4018 = vmatmul.msk.bf16.gmra.mxu2 %vm128_vm0, %v5450_v63 }
 0x13d   :  { %4032 = vmatmul.msk.bf16.gmra.mxu3 %vm128_vm0, %v5450_v63 }
 0x13f   :  { %v455_v42 = vpop.f32.mrf.mxu2 }
 0x140   :  { %v5775_v63 = vadd.f32 %v455_v42, %v235_v5  ;;  %v534_v37 = vpop.f32.mrf.mxu3  ;;  %v237_v14 = vpop.f32.mrf.mxu0 }
 0x141   :  { %v5777_v55 = vadd.f32 %v534_v37, %v314_v54  ;;  %v316_v30 = vpop.f32.mrf.mxu1 }
 0x147   :  { %v457_v0 = vpop.f32.mrf.mxu2 }
 0x148   :  { %v5779_v38 = vadd.f32 %v457_v0, %v237_v14  ;;  %v536_v49 = vpop.f32.mrf.mxu3  ;;  %v240_v50 = vpop.f32.mrf.mxu0 }
 0x149   :  { %v5781_v53 = vadd.f32 %v536_v49, %v316_v30  ;;  %v319_v19 = vpop.f32.mrf.mxu1 }
 0x14b   :  { %3971 = vmatmul.msk.bf16.gmra.mxu0 %vm128_vm0, %v5470_v4 }
 0x14c   :  { %3985 = vmatmul.msk.bf16.gmra.mxu1 %vm128_vm0, %v5470_v4  ;;  %4019 = vmatmul.msk.bf16.gmra.mxu2 %vm128_vm0, %v5468_v3 }
 0x14d   :  { %4033 = vmatmul.msk.bf16.gmra.mxu3 %vm128_vm0, %v5468_v3 }
 0x14f   :  { %v460_v54 = vpop.f32.mrf.mxu2 }
 0x150   :  { %v5791_v0 = vadd.f32 %v460_v54, %v240_v50  ;;  %v539_v5 = vpop.f32.mrf.mxu3  ;;  %v242_v32 = vpop.f32.mrf.mxu0 }
 0x151   :  { %v5793_v49 = vadd.f32 %v539_v5, %v319_v19  ;;  %v321_v30 = vpop.f32.mrf.mxu1 }
 0x153   :  { %7935 = vst [vmem:[#allocation21_spill] sm:$0xff] %v5793_v49 }
 0x157   :  { %v462_v46 = vpop.f32.mrf.mxu2 }
 0x158   :  { %v5795_v10 = vadd.f32 %v462_v46, %v242_v32  ;;  %v541_v42 = vpop.f32.mrf.mxu3  ;;  %v245_v41 = vpop.f32.mrf.mxu0 }
 0x159   :  { %v5797_v37 = vadd.f32 %v541_v42, %v321_v30  ;;  %v324_v14 = vpop.f32.mrf.mxu1 }
 0x15a   :  { %7936 = vst [vmem:[#allocation22_spill] sm:$0xff] %v5795_v10 }
 0x15b   :  { %7937 = vst [vmem:[#allocation23_spill] sm:$0xff] %v5797_v37  ;;  %3972 = vmatmul.msk.bf16.gmra.mxu0 %vm128_vm0, %v5488_v9 }
 0x15c   :  { %3986 = vmatmul.msk.bf16.gmra.mxu1 %vm128_vm0, %v5488_v9  ;;  %4020 = vmatmul.msk.bf16.gmra.mxu2 %vm128_vm0, %v5486_v7 }
 0x15d   :  { %4034 = vmatmul.msk.bf16.gmra.mxu3 %vm128_vm0, %v5486_v7 }
 0x15f   :  { %v465_v3 = vpop.f32.mrf.mxu2 }
 0x160   :  { %v5807_v19 = vadd.f32 %v465_v3, %v245_v41  ;;  %v544_v50 = vpop.f32.mrf.mxu3  ;;  %v247_v54 = vpop.f32.mrf.mxu0 }
 0x161   :  { %v5809_v5 = vadd.f32 %v544_v50, %v324_v14  ;;  %v326_v32 = vpop.f32.mrf.mxu1 }
 0x167   :  { %v467_v30 = vpop.f32.mrf.mxu2 }
 0x168   :  { %v5811_v46 = vadd.f32 %v467_v30, %v247_v54  ;;  %v546_v42 = vpop.f32.mrf.mxu3  ;;  %v587_v37 = vpop.f32.mrf.mxu0 }
 0x169   :  { %v5813_v10 = vadd.f32 %v546_v42, %v326_v32  ;;  %v736_v9 = vadd.f32 %v587_v37, %v5498_v12  ;;  %v666_v49 = vpop.f32.mrf.mxu1 }
 0x16a   :  { %v737_v7 = vadd.f32 %v666_v49, %v5500_v15 }
 0x16b   :  { %7938 = vst [vmem:[#allocation24_spill] sm:$0xff] %v5813_v10  ;;  %3973 = vmatmul.msk.bf16.gmra.mxu0 %vm128_vm0, %v5512_v24 }
 0x16c   :  { %3987 = vmatmul.msk.bf16.gmra.mxu1 %vm128_vm0, %v5512_v24  ;;  %4021 = vmatmul.msk.bf16.gmra.mxu2 %vm128_vm0, %v5508_v20 }
 0x16d   :  { %4035 = vmatmul.msk.bf16.gmra.mxu3 %vm128_vm0, %v5508_v20 }
 0x16f   :  { %v830_v41 = vpop.f32.mrf.mxu2 }
 0x170   :  { %v5825_v14 = vadd.f32 %v830_v41, %v736_v9  ;;  %v909_v3 = vpop.f32.mrf.mxu3  ;;  %v589_v12 = vpop.f32.mrf.mxu0 }
 0x171   :  { %v5827_v37 = vadd.f32 %v909_v3, %v737_v7  ;;  %v738_v15 = vadd.f32 %v589_v12, %v5510_v21  ;;  %v668_v49 = vpop.f32.mrf.mxu1 }
 0x172   :  { %v739_v50 = vadd.f32 %v668_v49, %v5514_v25 }
 0x177   :  { %v832_v54 = vpop.f32.mrf.mxu2 }
 0x178   :  { %v5831_v32 = vadd.f32 %v832_v54, %v738_v15  ;;  %v911_v30 = vpop.f32.mrf.mxu3  ;;  %v592_v42 = vpop.f32.mrf.mxu0 }
 0x179   :  { %v5833_v10 = vadd.f32 %v911_v30, %v739_v50  ;;  %v740_v20 = vadd.f32 %v592_v42, %v5524_v28  ;;  %v671_v9 = vpop.f32.mrf.mxu1 }
 0x17a   :  { %v741_v41 = vadd.f32 %v671_v9, %v5526_v31 }
 0x17b   :  { %3974 = vmatmul.msk.bf16.gmra.mxu0 %vm128_vm0, %v5538_v44 }
 0x17c   :  { %3988 = vmatmul.msk.bf16.gmra.mxu1 %vm128_vm0, %v5538_v44  ;;  %4022 = vmatmul.msk.bf16.gmra.mxu2 %vm128_vm0, %v5534_v36 }
 0x17d   :  { %4036 = vmatmul.msk.bf16.gmra.mxu3 %vm128_vm0, %v5534_v36 }
 0x17f   :  { %v835_v21 = vpop.f32.mrf.mxu2 }
 0x180   :  { %v5845_v25 = vadd.f32 %v835_v21, %v740_v20  ;;  %v914_v7 = vpop.f32.mrf.mxu3  ;;  %v594_v28 = vpop.f32.mrf.mxu0 }
 0x181   :  { %v5847_v3 = vadd.f32 %v914_v7, %v741_v41  ;;  %v742_v31 = vadd.f32 %v594_v28, %v5536_v39  ;;  %v673_v12 = vpop.f32.mrf.mxu1 }
 0x182   :  { %v743_v15 = vadd.f32 %v673_v12, %v5540_v47 }
 0x187   :  { %v837_v49 = vpop.f32.mrf.mxu2 }
 0x188   :  { %v5851_v50 = vadd.f32 %v837_v49, %v742_v31  ;;  %v916_v54 = vpop.f32.mrf.mxu3  ;;  %v597_v30 = vpop.f32.mrf.mxu0  ;;  %v5921_v49 = vld [vmem:[%s7890_s0 + $0xf0] sm:$0xff] }
 0x189   :  { %v5853_v42 = vadd.f32 %v916_v54, %v743_v15  ;;  %v5856_v36 = vadd.f32 %v597_v30, %v5550_v52  ;;  %v676_v20 = vpop.f32.mrf.mxu1 }
 0x18a   :  { %v5859_v9 = vadd.f32 %v676_v20, %v5552_v57 }
 0x18b   :  { %3975 = vmatmul.msk.bf16.gmra.mxu0 %vm128_vm0, %v5564_v6 }
 0x18c   :  { %3989 = vmatmul.msk.bf16.gmra.mxu1 %vm128_vm0, %v5564_v6  ;;  %4023 = vmatmul.msk.bf16.gmra.mxu2 %vm128_vm0, %v5560_v62 }
 0x18d   :  { %4037 = vmatmul.msk.bf16.gmra.mxu3 %vm128_vm0, %v5560_v62 }
 0x190   :  { %v599_v39 = vpop.f32.mrf.mxu0 }
 0x191   :  { %v5870_v47 = vadd.f32 %v599_v39, %v5562_v1  ;;  %v678_v52 = vpop.f32.mrf.mxu1 }
 0x192   :  { %v5873_v57 = vadd.f32 %v678_v52, %v5566_v8 }
 0x198   :  { %v602_v41 = vpop.f32.mrf.mxu0 }
 0x199   :  { %v5876_v21 = vadd.f32 %v602_v41, %v5576_v13  ;;  %v681_v7 = vpop.f32.mrf.mxu1 }
 0x19a   :  { %v5879_v28 = vadd.f32 %v681_v7, %v5578_v17 }
 0x19b   :  { %3976 = vmatmul.msk.bf16.gmra.mxu0 %vm128_vm0, %v5611_v56 }
 0x19c   :  { %3990 = vmatmul.msk.bf16.gmra.mxu1 %vm128_vm0, %v5611_v56  ;;  %4024 = vmatmul.msk.bf16.gmra.mxu2 %vm128_vm0, %v5598_v34 }
 0x19d   :  { %4038 = vmatmul.msk.bf16.gmra.mxu3 %vm128_vm0, %v5598_v34 }
 0x1a0   :  { %v604_v62 = vpop.f32.mrf.mxu0 }
 0x1a1   :  { %v5890_v1 = vadd.f32 %v604_v62, %v5609_v48  ;;  %v683_v8 = vpop.f32.mrf.mxu1 }
 0x1a2   :  { %v5893_v13 = vadd.f32 %v683_v8, %v5616_v61  ;;  %v7939_v8 = vld [vmem:[#allocation2_spill] sm:$0xff] }
 0x1a8   :  { %v607_v17 = vpop.f32.mrf.mxu0 }
 0x1a9   :  { %v5896_v31 = vadd.f32 %v607_v17, %v5638_v22  ;;  %v686_v12 = vpop.f32.mrf.mxu1  ;;  %v7940_v17 = vld [vmem:[#allocation8_spill] sm:$0xff] }
 0x1aa   :  { %v5899_v15 = vadd.f32 %v686_v12, %v5640_v27  ;;  %v68_v27 = vld [vmem:[%s7890_s0 + $0xe8] sm:$0xff] }
 0x1ab   :  { %3977 = vmatmul.msk.bf16.gmra.mxu0 %vm128_vm0, %v5655_v58  ;;  %v5924_v54 = vpack.c.bf16 %v68_v27, %v5648_v33 }
 0x1ac   :  { %3991 = vmatmul.msk.bf16.gmra.mxu1 %vm128_vm0, %v5655_v58  ;;  %4025 = vmatmul.msk.bf16.gmra.mxu2 %vm128_vm0, %v5651_v40 }
 0x1ad   :  { %4039 = vmatmul.msk.bf16.gmra.mxu3 %vm128_vm0, %v5651_v40 }
 0x1b0   :  { %v609_v34 = vpop.f32.mrf.mxu0 }
 0x1b1   :  { %v5910_v48 = vadd.f32 %v609_v34, %v5653_v43  ;;  %v688_v61 = vpop.f32.mrf.mxu1  ;;  %v792_v43 = vpack.c.bf16 %v5921_v49, %v68_v27  ;;  %v7941_v34 = vld [vmem:[#allocation9_spill] sm:$0xff] }
 0x1b2   :  { %v5913_v22 = vadd.f32 %v688_v61, %v5657_v59 }
 0x1b8   :  { %v612_v40 = vpop.f32.mrf.mxu0 }
 0x1b9   :  { %v5928_v30 = vadd.f32 %v612_v40, %v5667_v60  ;;  %v691_v59 = vpop.f32.mrf.mxu1 }
 0x1ba   :  { %v5931_v20 = vadd.f32 %v691_v59, %v5669_v11 }
 0x1bb   :  { %3978 = vmatmul.msk.bf16.gmra.mxu0 %vm128_vm0, %v5924_v54 }
 0x1bc   :  { %3992 = vmatmul.msk.bf16.gmra.mxu1 %vm128_vm0, %v5924_v54  ;;  %4026 = vmatmul.msk.bf16.gmra.mxu2 %vm128_vm0, %v792_v43 }
 0x1bd   :  { %4040 = vmatmul.msk.bf16.gmra.mxu3 %vm128_vm0, %v792_v43  ;;  %v7942_v43 = vld [vmem:[#allocation3_spill] sm:$0xff] }
 0x1c0   :  { %v614_v33 = vpop.f32.mrf.mxu0 }
 0x1c1   :  { %v5940_v39 = vadd.f32 %v614_v33, %v5671_v18  ;;  %v693_v60 = vpop.f32.mrf.mxu1  ;;  %v7943_v33 = vld [vmem:[#allocation10_spill] sm:$0xff] }
 0x1c2   :  { %v5943_v52 = vadd.f32 %v693_v60, %v5673_v26 }
 0x1c8   :  { %v617_v11 = vpop.f32.mrf.mxu0 }
 0x1c9   :  { %v5946_v41 = vadd.f32 %v617_v11, %v5683_v35  ;;  %v696_v7 = vpop.f32.mrf.mxu1 }
 0x1ca   :  { %v5949_v62 = vadd.f32 %v696_v7, %v5685_v2  ;;  %v7944_v7 = vld [vmem:[#allocation11_spill] sm:$0xff] }
 0x1cb   :  { %4061 = vmatmul.msk.bf16.vlgmr.msra.gmra.mxu0 %vm128_vm0, %v7939_v8 }
 0x1cc   :  { %4075 = vmatmul.msk.bf16.vlgmr.msra.gmra.mxu1 %vm128_vm0, %v7939_v8 }
 0x1d0   :  { %v619_v18 = vpop.f32.mrf.mxu0 }
 0x1d1   :  { %v5956_v12 = vadd.f32 %v619_v18, %v7940_v17  ;;  %v698_v26 = vpop.f32.mrf.mxu1 }
 0x1d2   :  { %v5959_v61 = vadd.f32 %v698_v26, %v7941_v34  ;;  %v7945_v26 = vld [vmem:[#allocation4_spill] sm:$0xff] }
 0x1d8   :  { %v622_v35 = vpop.f32.mrf.mxu0 }
 0x1d9   :  { %v5962_v27 = vadd.f32 %v622_v35, %v5699_v23  ;;  %v701_v2 = vpop.f32.mrf.mxu1  ;;  %v7946_v35 = vld [vmem:[#allocation12_spill] sm:$0xff] }
 0x1da   :  { %v5965_v40 = vadd.f32 %v701_v2, %v5701_v51 }
 0x1db   :  { %4062 = vmatmul.msk.bf16.gmra.mxu0 %vm128_vm0, %v7942_v43 }
 0x1dc   :  { %4076 = vmatmul.msk.bf16.gmra.mxu1 %vm128_vm0, %v7942_v43 }
 0x1e0   :  { %v624_v59 = vpop.f32.mrf.mxu0 }
 0x1e1   :  { %v5972_v60 = vadd.f32 %v624_v59, %v7943_v33  ;;  %v703_v11 = vpop.f32.mrf.mxu1  ;;  %v7948_v59 = vld [vmem:[#allocation13_spill] sm:$0xff] }
 0x1e2   :  { %v5975_v8 = vadd.f32 %v703_v11, %v7944_v7  ;;  %v7951_v7 = vld [vmem:[#allocation14_spill] sm:$0xff] }
 0x1e8   :  { %v627_v23 = vpop.f32.mrf.mxu0 }
 0x1e9   :  { %v5978_v18 = vadd.f32 %v627_v23, %v5715_v16  ;;  %v706_v51 = vpop.f32.mrf.mxu1 }
 0x1ea   :  { %v5981_v17 = vadd.f32 %v706_v51, %v5717_v29  ;;  %v7953_v51 = vld [vmem:[#allocation5_spill] sm:$0xff] }
 0x1eb   :  { %4063 = vmatmul.msk.bf16.gmra.mxu0 %vm128_vm0, %v7945_v26 }
 0x1ec   :  { %4077 = vmatmul.msk.bf16.gmra.mxu1 %vm128_vm0, %v7945_v26 }
 0x1f0   :  { %v629_v34 = vpop.f32.mrf.mxu0 }
 0x1f1   :  { %v5988_v2 = vadd.f32 %v629_v34, %v7946_v35  ;;  %v708_v43 = vpop.f32.mrf.mxu1  ;;  %v7954_v34 = vld [vmem:[#allocation15_spill] sm:$0xff] }
 0x1f2   :  { %v5991_v33 = vadd.f32 %v708_v43, %v7948_v59  ;;  %v7955_v59 = vld [vmem:[#allocation16_spill] sm:$0xff] }
 0x1f3   :  { %7947 = vst [vmem:[#allocation2_spill] sm:$0xff] %v5988_v2  ;;  %v7961_v2 = vld [vmem:[#allocation6_spill] sm:$0xff] }
 0x1f4   :  { %7949 = vst [vmem:[#allocation8_spill] sm:$0xff] %v5991_v33 }
 0x1f8   :  { %v632_v16 = vpop.f32.mrf.mxu0 }
 0x1f9   :  { %v5994_v11 = vadd.f32 %v632_v16, %v5731_v45  ;;  %v711_v29 = vpop.f32.mrf.mxu1  ;;  %v7957_v16 = vld [vmem:[#allocation17_spill] sm:$0xff] }
 0x1fa   :  { %v5997_v23 = vadd.f32 %v711_v29, %v7951_v7  ;;  %v7959_v7 = vld [vmem:[#allocation18_spill] sm:$0xff] }
 0x1fb   :  { %7950 = vst [vmem:[#allocation9_spill] sm:$0xff] %v5994_v11  ;;  %4064 = vmatmul.msk.bf16.gmra.mxu0 %vm128_vm0, %v7953_v51 }
 0x1fc   :  { %7952 = vst [vmem:[#allocation3_spill] sm:$0xff] %v5997_v23  ;;  %4078 = vmatmul.msk.bf16.gmra.mxu1 %vm128_vm0, %v7953_v51 }
 0x200   :  { %v634_v26 = vpop.f32.mrf.mxu0 }
 0x201   :  { %v6004_v35 = vadd.f32 %v634_v26, %v7954_v34  ;;  %v713_v43 = vpop.f32.mrf.mxu1  ;;  %v7962_v26 = vld [vmem:[#allocation19_spill] sm:$0xff] }
 0x202   :  { %v6007_v33 = vadd.f32 %v713_v43, %v7955_v59  ;;  %v7964_v59 = vld [vmem:[#allocation20_spill] sm:$0xff] }
 0x204   :  { %7956 = vst [vmem:[#allocation10_spill] sm:$0xff] %v6007_v33 }
 0x208   :  { %v637_v45 = vpop.f32.mrf.mxu0 }
 0x209   :  { %v6010_v11 = vadd.f32 %v637_v45, %v7957_v16  ;;  %v716_v29 = vpop.f32.mrf.mxu1 }
 0x20a   :  { %v6013_v23 = vadd.f32 %v716_v29, %v7959_v7 }
 0x20b   :  { %7958 = vst [vmem:[#allocation11_spill] sm:$0xff] %v6010_v11  ;;  %4065 = vmatmul.msk.bf16.gmra.mxu0 %vm128_vm0, %v7961_v2 }
 0x20c   :  { %7960 = vst [vmem:[#allocation4_spill] sm:$0xff] %v6013_v23  ;;  %4079 = vmatmul.msk.bf16.gmra.mxu1 %vm128_vm0, %v7961_v2 }
 0x210   :  { %v639_v51 = vpop.f32.mrf.mxu0 }
 0x211   :  { %v6020_v34 = vadd.f32 %v639_v51, %v7962_v26  ;;  %v718_v43 = vpop.f32.mrf.mxu1 }
 0x212   :  { %v6023_v33 = vadd.f32 %v718_v43, %v7964_v59 }
 0x213   :  { %7963 = vst [vmem:[#allocation12_spill] sm:$0xff] %v6020_v34 }
 0x214   :  { %7965 = vst [vmem:[#allocation13_spill] sm:$0xff] %v6023_v33 }
 0x218   :  { %v642_v45 = vpop.f32.mrf.mxu0 }
 0x219   :  { %v6026_v16 = vadd.f32 %v642_v45, %v5775_v63  ;;  %v721_v29 = vpop.f32.mrf.mxu1  ;;  %v7971_v45 = vld [vmem:[#allocation21_spill] sm:$0xff] }
 0x21a   :  { %v6029_v7 = vadd.f32 %v721_v29, %v5777_v55 }
 0x21b   :  { %7966 = vst [vmem:[#allocation14_spill] sm:$0xff] %v6026_v16  ;;  %4066 = vmatmul.msk.bf16.gmra.mxu0 %vm128_vm0, %v5470_v4 }
 0x21c   :  { %7967 = vst [vmem:[#allocation5_spill] sm:$0xff] %v6029_v7  ;;  %4080 = vmatmul.msk.bf16.gmra.mxu1 %vm128_vm0, %v5470_v4  ;;  %v7973_v7 = vld [vmem:[#allocation7_spill] sm:$0xff] }
 0x220   :  { %v644_v2 = vpop.f32.mrf.mxu0 }
 0x221   :  { %v6036_v51 = vadd.f32 %v644_v2, %v5779_v38  ;;  %v723_v26 = vpop.f32.mrf.mxu1  ;;  %v7974_v38 = vld [vmem:[#allocation22_spill] sm:$0xff] }
 0x222   :  { %v6039_v43 = vadd.f32 %v723_v26, %v5781_v53  ;;  %v7976_v26 = vld [vmem:[#allocation23_spill] sm:$0xff] }
 0x223   :  { %7968 = vst [vmem:[#allocation15_spill] sm:$0xff] %v6036_v51 }
 0x224   :  { %7969 = vst [vmem:[#allocation16_spill] sm:$0xff] %v6039_v43 }
 0x228   :  { %v647_v63 = vpop.f32.mrf.mxu0 }
 0x229   :  { %v6042_v59 = vadd.f32 %v647_v63, %v5791_v0  ;;  %v726_v55 = vpop.f32.mrf.mxu1  ;;  %v6057_v0 = vpop.f32.mrf.mxu2  ;;  %v4168_v63 = vld [vmem:[%s7891_s3 + $0x118] sm:$0xf] }
 0x22a   :  { %v6045_v29 = vadd.f32 %v726_v55, %v7971_v45  ;;  %v4985_v55 = vld [vmem:[%s7891_s3 + $0x11c] sm:$0xf0]  ;;  %v6070_v45 = vpop.f32.mrf.mxu3 }
 0x22b   :  { %7970 = vst [vmem:[#allocation17_spill] sm:$0xff] %v6042_v59  ;;  %4067 = vmatmul.msk.bf16.gmra.mxu0 %vm128_vm0, %v7973_v7 }
 0x22c   :  { %7972 = vst [vmem:[#allocation18_spill] sm:$0xff] %v6045_v29  ;;  %4081 = vmatmul.msk.bf16.gmra.mxu1 %vm128_vm0, %v7973_v7  ;;  %v6068_v7 = vld [vmem:[%s7891_s3 + $0x148] sm:$0x11] }
 0x22d   :  { %7978 = vst [vmem:[#allocation20_spill] sm:$0xff] %v6068_v7 }
 0x230   :  { %v649_v4 = vpop.f32.mrf.mxu0 }
 0x231   :  { %v6052_v2 = vadd.f32 %v649_v4, %v7974_v38  ;;  %v728_v53 = vpop.f32.mrf.mxu1  ;;  %v4169_v4 = vor.u32 %v4985_v55, %v4168_v63  ;;  %v1703_v38 = vunpack.c.l.b16 %v6068_v7  ;;  %v6084_v63 = vpop.f32.mrf.mxu2 }
 0x232   :  { %v6055_v43 = vadd.f32 %v728_v53, %v7976_v26 }
 0x233   :  { %7975 = vst [vmem:[#allocation6_spill] sm:$0xff] %v6052_v2  ;;  %1770 = vmatpush.bf16.msra.mxu2 %v4169_v4  ;;  %v1725_v2 = vpack.c.b16 %v1703_v38, %v1703_v38 }
 0x234   :  { %7977 = vst [vmem:[#allocation19_spill] sm:$0xff] %v6055_v43 }
 0x235   :  { %v1765_v59 = vsel %vm1763_vm1, %v1725_v2, 0 }
 0x236   :  { %1809 = vmatpush.bf16.msra.mxu3 %v1765_v59 }
 0x238   :  { %v652_v53 = vpop.f32.mrf.mxu0 }
 0x239   :  { %v6074_v26 = vadd.f32 %v652_v53, %v5807_v19  ;;  %v731_v43 = vpop.f32.mrf.mxu1  ;;  %v6086_v19 = vpop.f32.mrf.mxu3 }
 0x23a   :  { %v6077_v29 = vadd.f32 %v731_v43, %v5809_v5  ;;  %v7982_v5 = vld [vmem:[#allocation24_spill] sm:$0xff] }
 0x23b   :  { %7979 = vst [vmem:[#allocation21_spill] sm:$0xff] %v6074_v26  ;;  %4068 = vmatmul.msk.bf16.gmra.mxu0 %vm128_vm0, %v5512_v24 }
 0x23c   :  { %7980 = vst [vmem:[#allocation7_spill] sm:$0xff] %v6077_v29  ;;  %4082 = vmatmul.msk.bf16.gmra.mxu1 %vm128_vm0, %v5512_v24  ;;  %v6094_v29 = vpop.f32.mrf.mxu2  ;;  %v1278_v24 = vld [vmem:[%s7892_s2] sm:$0x3] }
 0x240   :  { %v654_v55 = vpop.f32.mrf.mxu0 }
 0x241   :  { %v6089_v4 = vadd.f32 %v654_v55, %v5811_v46  ;;  %v733_v38 = vpop.f32.mrf.mxu1  ;;  %v6101_v7 = vpop.f32.mrf.mxu3  ;;  %v6107_v46 = vperm.slane %v1278_v24, 0  ;;  %v6109_v55 = vperm.slane %v1278_v24, 1 }
 0x242   :  { %v6092_v43 = vadd.f32 %v733_v38, %v7982_v5 }
 0x243   :  { %7981 = vst [vmem:[#allocation22_spill] sm:$0xff] %v6089_v4 }
 0x244   :  { %7983 = vst [vmem:[#allocation23_spill] sm:$0xff] %v6092_v43  ;;  %v6115_v43 = vpop.f32.mrf.mxu2 }
 0x248   :  { %v1073_v53 = vpop.f32.mrf.mxu0 }
 0x249   :  { %v1222_v2 = vadd.f32 %v1073_v53, %v5825_v14  ;;  %v1152_v26 = vpop.f32.mrf.mxu1  ;;  %v6119_v51 = vpop.f32.mrf.mxu3 }
 0x24a   :  { %v1223_v59 = vadd.f32 %v1152_v26, %v5827_v37 }
 0x24b   :  { %4069 = vmatmul.msk.bf16.gmra.mxu0 %vm128_vm0, %v5538_v44  ;;  %v1284_v38 = vadd.f32 %v6107_v46, %v1222_v2 }
 0x24c   :  { %4083 = vmatmul.msk.bf16.gmra.mxu1 %vm128_vm0, %v5538_v44  ;;  %v1285_v37 = vadd.f32 %v6109_v55, %v1223_v59 }
 0x24d   :  { %v1340_v24 = vmax.f32 %v1284_v38, 0.0 }
 0x24e   :  { %v1341_v33 = vmax.f32 %v1285_v37, 0.0 }
 0x250   :  { %v1075_v14 = vpop.f32.mrf.mxu0 }
 0x251   :  { %v1224_v5 = vadd.f32 %v1075_v14, %v5831_v32  ;;  %v1154_v53 = vpop.f32.mrf.mxu1  ;;  %v4160_v32 = vld [vmem:[%s7891_s3 + $0x108] sm:$0xf] }
 0x252   :  { %v1225_v26 = vadd.f32 %v1154_v53, %v5833_v10  ;;  %v4983_v10 = vld [vmem:[%s7891_s3 + $0x10c] sm:$0xf0] }
 0x253   :  { %v1286_v4 = vadd.f32 %v6107_v46, %v1224_v5  ;;  %v4161_v2 = vor.u32 %v4983_v10, %v4160_v32 }
 0x254   :  { %v1287_v44 = vadd.f32 %v6109_v55, %v1225_v26  ;;  %v6139_v26 = vpop.f32.mrf.mxu3 }
 0x255   :  { %v1342_v16 = vmax.f32 %v1286_v4, 0.0  ;;  %1771 = vmatpush.bf16.msra.mxu2 %v4161_v2  ;;  %v6135_v4 = vpop.f32.mrf.mxu2 }
 0x256   :  { %v1343_v34 = vmax.f32 %v1287_v44, 0.0 }
 0x257   :  { %v6127_v59 = vmax.f32 %v1340_v24, %v1342_v16 }
 0x258   :  { %v1078_v14 = vpop.f32.mrf.mxu0  ;;  %v6129_v5 = vmax.f32 %v1341_v33, %v1343_v34 }
 0x259   :  { %v1157_v53 = vpop.f32.mrf.mxu1  ;;  %v1226_v38 = vadd.f32 %v1078_v14, %v5845_v25 }
 0x25a   :  { %v1227_v37 = vadd.f32 %v1157_v53, %v5847_v3 }
 0x25b   :  { %4070 = vmatmul.msk.bf16.gmra.mxu0 %vm128_vm0, %v5564_v6  ;;  %v1288_v33 = vadd.f32 %v6107_v46, %v1226_v38 }
 0x25c   :  { %4084 = vmatmul.msk.bf16.gmra.mxu1 %vm128_vm0, %v5564_v6  ;;  %v1289_v24 = vadd.f32 %v6109_v55, %v1227_v37 }
 0x25d   :  { %v1344_v2 = vmax.f32 %v1288_v33, 0.0  ;;  %v6147_v53 = vpop.f32.mrf.mxu2  ;;  %v988_v33 = vadd.f32 %v6070_v45, %v5859_v9 }
 0x25e   :  { %v1345_v14 = vmax.f32 %v1289_v24, 0.0  ;;  %v4152_v24 = vld [vmem:[%s7891_s3 + $0xf8] sm:$0xf] }
 0x260   :  { %v1080_v16 = vpop.f32.mrf.mxu0 }
 0x261   :  { %v1228_v34 = vadd.f32 %v1080_v16, %v5851_v50  ;;  %v1159_v44 = vpop.f32.mrf.mxu1  ;;  %v6153_v50 = vpop.f32.mrf.mxu3  ;;  %v987_v16 = vadd.f32 %v6057_v0, %v5856_v36  ;;  %v4981_v36 = vld [vmem:[%s7891_s3 + $0xfc] sm:$0xf0]  ;;  %v989_v0 = vadd.f32 %v6084_v63, %v5870_v47 }
 0x262   :  { %v1229_v32 = vadd.f32 %v1159_v44, %v5853_v42  ;;  %v4153_v9 = vor.u32 %v4981_v36, %v4152_v24  ;;  %v991_v24 = vadd.f32 %v6094_v29, %v5876_v21  ;;  %v993_v21 = vadd.f32 %v6115_v43, %v5890_v1 }
 0x263   :  { %v1290_v6 = vadd.f32 %v6107_v46, %v1228_v34  ;;  %v994_v29 = vadd.f32 %v6119_v51, %v5893_v13  ;;  %v4184_v13 = vld [vmem:[%s7891_s3 + $0x138] sm:$0xf]  ;;  %v4989_v51 = vld [vmem:[%s7891_s3 + $0x13c] sm:$0xf0] }
 0x264   :  { %v1291_v10 = vadd.f32 %v6109_v55, %v1229_v32  ;;  %1772 = vmatpush.bf16.msra.mxu2 %v4153_v9 }
 0x265   :  { %v1346_v25 = vmax.f32 %v1290_v6, 0.0  ;;  %v6176_v32 = vpop.f32.mrf.mxu2 }
 0x266   :  { %v1347_v3 = vmax.f32 %v1291_v10, 0.0 }
 0x267   :  { %v6149_v23 = vmax.f32 %v1344_v2, %v1346_v25 }
 0x268   :  { %v1083_v38 = vpop.f32.mrf.mxu0  ;;  %v6151_v11 = vmax.f32 %v1345_v14, %v1347_v3 }
 0x269   :  { %v1162_v37 = vpop.f32.mrf.mxu1  ;;  %v1230_v34 = vadd.f32 %v1083_v38, %v987_v16  ;;  %v6180_v3 = vpop.f32.mrf.mxu3 }
 0x26a   :  { %v5109_v42 = vpack.i.bf16 %v6151_v11, %v6149_v23  ;;  %v1231_v44 = vadd.f32 %v1162_v37, %v988_v33 }
 0x26b   :  { %4071 = vmatmul.msk.bf16.gmra.mxu0 %vm128_vm0, %v5611_v56  ;;  %v1292_v6 = vadd.f32 %v6107_v46, %v1230_v34 }
 0x26c   :  { %4085 = vmatmul.msk.bf16.gmra.mxu1 %vm128_vm0, %v5611_v56  ;;  %5110 = vrot.lane.b32.xlu0 %v5109_v42, %s5207_s17  ;;  %v990_v56 = vadd.f32 %v6086_v19, %v5873_v57  ;;  %v1293_v25 = vadd.f32 %v6109_v55, %v1231_v44 }
 0x26d   :  { %v1348_v63 = vmax.f32 %v1292_v6, 0.0  ;;  %v6192_v36 = vpop.f32.mrf.mxu2 }
 0x26e   :  { %v1349_v57 = vmax.f32 %v1293_v25, 0.0 }
 0x270   :  { %v1085_v45 = vpop.f32.mrf.mxu0 }
 0x271   :  { %v1232_v10 = vadd.f32 %v1085_v45, %v989_v0  ;;  %v1164_v2 = vpop.f32.mrf.mxu1  ;;  %v992_v0 = vadd.f32 %v6101_v7, %v5879_v28  ;;  %v6201_v9 = vpop.f32.mrf.mxu3 }
 0x272   :  { %v1233_v14 = vadd.f32 %v1164_v2, %v990_v56 }
 0x273   :  { %v1294_v38 = vadd.f32 %v6107_v46, %v1232_v10 }
 0x274   :  { %v1295_v47 = vadd.f32 %v6109_v55, %v1233_v14 }
 0x275   :  { %v1350_v37 = vmax.f32 %v1294_v38, 0.0  ;;  %v6211_v38 = vpop.f32.mrf.mxu2 }
 0x276   :  { %v1351_v19 = vmax.f32 %v1295_v47, 0.0 }
 0x277   :  { %v6184_v42 = vmax.f32 %v1348_v63, %v1350_v37 }
 0x278   :  { %v1088_v16 = vpop.f32.mrf.mxu0  ;;  %v6186_v33 = vmax.f32 %v1349_v57, %v1351_v19  ;;  %v4185_v19 = vor.u32 %v4989_v51, %v4184_v13 }
 0x279   :  { %v1167_v34 = vpop.f32.mrf.mxu1  ;;  %v1234_v56 = vadd.f32 %v1088_v16, %v991_v24  ;;  %v6219_v37 = vpop.f32.mrf.mxu3 }
 0x27a   :  { %v5114_v44 = vpack.i.bf16 %v6186_v33, %v6184_v42  ;;  %v1235_v45 = vadd.f32 %v1167_v34, %v992_v0  ;;  %1810 = vmatpush.bf16.msra.mxu3 %v4185_v19  ;;  %v995_v0 = vadd.f32 %v6135_v4, %v5896_v31  ;;  %v4979_v31 = vld [vmem:[%s7891_s3 + $0xec] sm:$0xf0]  ;;  %v997_v4 = vadd.f32 %v6147_v53, %v5910_v48  ;;  %v70_v53 = vld [vmem:[%s7890_s0 + $0xf8] sm:$0xff] }
 0x27b   :  { %4072 = vmatmul.msk.bf16.gmra.mxu0 %vm128_vm0, %v5655_v58  ;;  %v1296_v10 = vadd.f32 %v6107_v46, %v1234_v56  ;;  %v996_v56 = vadd.f32 %v6139_v26, %v5899_v15 }
 0x27c   :  { %4086 = vmatmul.msk.bf16.gmra.mxu1 %vm128_vm0, %v5655_v58  ;;  %5115 = vrot.lane.b32.xlu0 %v5114_v44, %s5207_s17  ;;  %v1297_v7 = vadd.f32 %v6109_v55, %v1235_v45 }
 0x27d   :  { %v1352_v47 = vmax.f32 %v1296_v10, 0.0 }
 0x27e   :  { %v1353_v1 = vmax.f32 %v1297_v7, 0.0 }
 0x280   :  { %v1090_v6 = vpop.f32.mrf.mxu0 }
 0x281   :  { %v1236_v2 = vadd.f32 %v1090_v6, %v993_v21  ;;  %v1169_v28 = vpop.f32.mrf.mxu1  ;;  %v6244_v6 = vpop.f32.mrf.mxu2 }
 0x282   :  { %v1237_v58 = vadd.f32 %v1169_v28, %v994_v29  ;;  %v4144_v29 = vld [vmem:[%s7891_s3 + $0xe8] sm:$0xf]  ;;  %v941_v10 = vpop.f32.mrf.mxu3 }
 0x283   :  { %v1298_v25 = vadd.f32 %v6107_v46, %v1236_v2  ;;  %v4145_v15 = vor.u32 %v4979_v31, %v4144_v29  ;;  %v1002_v29 = vadd.f32 %v6201_v9, %v5943_v52  ;;  %v4136_v52 = vld [vmem:[%s7891_s3 + $0xd8] sm:$0xf]  ;;  %v4977_v9 = vld [vmem:[%s7891_s3 + $0xdc] sm:$0xf0] }
 0x284   :  { %v1299_v14 = vadd.f32 %v6109_v55, %v1237_v58 }
 0x285   :  { %v1354_v63 = vmax.f32 %v1298_v25, 0.0  ;;  %1773 = vmatpush.bf16.msra.mxu2 %v4145_v15 }
 0x286   :  { %v1355_v43 = vmax.f32 %v1299_v14, 0.0 }
 0x287   :  { %v6221_v57 = vmax.f32 %v1352_v47, %v1354_v63 }
 0x288   :  { %v1093_v16 = vpop.f32.mrf.mxu0  ;;  %v6223_v34 = vmax.f32 %v1353_v1, %v1355_v43  ;;  %v1035_v1 = vpack.c.bf16 %v70_v53, %v5921_v49  ;;  %v1000_v49 = vadd.f32 %v6180_v3, %v5931_v20 }
 0x289   :  { %v1172_v44 = vpop.f32.mrf.mxu1  ;;  %v1238_v45 = vadd.f32 %v1093_v16, %v995_v0  ;;  %v6260_v19 = vpop.f32.mrf.mxu2 }
 0x28a   :  { %v5119_v24 = vpack.i.bf16 %v6223_v34, %v6221_v57  ;;  %v1239_v21 = vadd.f32 %v1172_v44, %v996_v56  ;;  %v944_v0 = vpop.f32.mrf.mxu3 }
 0x28b   :  { %4073 = vmatmul.msk.bf16.gmra.mxu0 %vm128_vm0, %v5924_v54  ;;  %v1300_v2 = vadd.f32 %v6107_v46, %v1238_v45 }
 0x28c   :  { %4087 = vmatmul.msk.bf16.gmra.mxu1 %vm128_vm0, %v5924_v54  ;;  %5120 = vrot.lane.b32.xlu1 %v5119_v24, %s5207_s17  ;;  %v998_v54 = vadd.f32 %v6153_v50, %v5913_v22  ;;  %v1301_v58 = vadd.f32 %v6109_v55, %v1239_v21  ;;  %v999_v24 = vadd.f32 %v6176_v32, %v5928_v30 }
 0x28d   :  { %v1356_v47 = vmax.f32 %v1300_v2, 0.0  ;;  %v1001_v21 = vadd.f32 %v6192_v36, %v5940_v39 }
 0x28e   :  { %v1357_v50 = vmax.f32 %v1301_v58, 0.0 }
 0x290   :  { %v1095_v26 = vpop.f32.mrf.mxu0 }
 0x291   :  { %v1240_v28 = vadd.f32 %v1095_v26, %v997_v4  ;;  %v1174_v7 = vpop.f32.mrf.mxu1  ;;  %v867_v3 = vpop.f32.mrf.mxu2 }
 0x292   :  { %v1241_v25 = vadd.f32 %v1174_v7, %v998_v54  ;;  %v946_v2 = vpop.f32.mrf.mxu3 }
 0x293   :  { %v1302_v14 = vadd.f32 %v6107_v46, %v1240_v28 }
 0x294   :  { %v1303_v48 = vadd.f32 %v6109_v55, %v1241_v25  ;;  %v4137_v25 = vor.u32 %v4977_v9, %v4136_v52 }
 0x295   :  { %v1358_v22 = vmax.f32 %v1302_v14, 0.0 }
 0x296   :  { %v1359_v63 = vmax.f32 %v1303_v48, 0.0  ;;  %1774 = vmatpush.bf16.msra.mxu2 %v4137_v25 }
 0x297   :  { %v6256_v43 = vmax.f32 %v1356_v47, %v1358_v22  ;;  %v1003_v22 = vadd.f32 %v6211_v38, %v5946_v41 }
 0x298   :  { %v1098_v13 = vpop.f32.mrf.mxu0  ;;  %v6258_v51 = vmax.f32 %v1357_v50, %v1359_v63  ;;  %v1004_v50 = vadd.f32 %v6219_v37, %v5949_v62 }
 0x299   :  { %v1177_v16 = vpop.f32.mrf.mxu1  ;;  %v1242_v56 = vadd.f32 %v1098_v13, %v999_v24  ;;  %v870_v63 = vpop.f32.mrf.mxu2  ;;  %v1006_v24 = vadd.f32 %v941_v10, %v5959_v61 }
 0x29a   :  { %v5124_v44 = vpack.i.bf16 %v6258_v51, %v6256_v43  ;;  %v1243_v45 = vadd.f32 %v1177_v16, %v1000_v49  ;;  %v1005_v16 = vadd.f32 %v6244_v6, %v5956_v12 }
 0x29b   :  { %4074 = vmatmul.msk.bf16.gmra.mxu0 %vm128_vm0, %v1035_v1  ;;  %v1304_v30 = vadd.f32 %v6107_v46, %v1242_v56 }
 0x29c   :  { %4088 = vmatmul.msk.bf16.gmra.mxu1 %vm128_vm0, %v1035_v1  ;;  %5125 = vrot.lane.b32.xlu1 %v5124_v44, %s5207_s17  ;;  %v1305_v15 = vadd.f32 %v6109_v55, %v1243_v45  ;;  %v949_v44 = vpop.f32.mrf.mxu3 }
 0x29d   :  { %v1360_v28 = vmax.f32 %v1304_v30, 0.0 }
 0x29e   :  { %v1361_v39 = vmax.f32 %v1305_v15, 0.0 }
 0x2a0   :  { %v1100_v31 = vpop.f32.mrf.mxu0 }
 0x2a1   :  { %v1244_v32 = vadd.f32 %v1100_v31, %v1001_v21  ;;  %v1179_v4 = vpop.f32.mrf.mxu1  ;;  %v872_v12 = vpop.f32.mrf.mxu2 }
 0x2a2   :  { %v1245_v20 = vadd.f32 %v1179_v4, %v1002_v29 }
 0x2a3   :  { %v1306_v54 = vadd.f32 %v6107_v46, %v1244_v32 }
 0x2a4   :  { %v1307_v26 = vadd.f32 %v6109_v55, %v1245_v20  ;;  %v951_v4 = vpop.f32.mrf.mxu3 }
 0x2a5   :  { %v1362_v7 = vmax.f32 %v1306_v54, 0.0  ;;  %v1007_v54 = vadd.f32 %v6260_v19, %v5962_v27 }
 0x2a6   :  { %v1363_v36 = vmax.f32 %v1307_v26, 0.0  ;;  %v1008_v26 = vadd.f32 %v944_v0, %v5965_v40 }
 0x2a7   :  { %v6285_v58 = vmax.f32 %v1360_v28, %v1362_v7 }
 0x2a8   :  { %v1103_v14 = vpop.f32.mrf.mxu0  ;;  %v6287_v48 = vmax.f32 %v1361_v39, %v1363_v36  ;;  %v1009_v39 = vadd.f32 %v867_v3, %v5972_v60  ;;  %v1010_v36 = vadd.f32 %v946_v2, %v5975_v8  ;;  %v4128_v8 = vld [vmem:[%s7891_s3 + $0xc8] sm:$0xf]  ;;  %v4975_v3 = vld [vmem:[%s7891_s3 + $0xcc] sm:$0xf0] }
 0x2a9   :  { %v1182_v53 = vpop.f32.mrf.mxu1  ;;  %v1246_v1 = vadd.f32 %v1103_v14, %v1003_v22  ;;  %v875_v9 = vpop.f32.mrf.mxu2 }
 0x2aa   :  { %v5129_v47 = vpack.i.bf16 %v6287_v48, %v6285_v58  ;;  %v1247_v13 = vadd.f32 %v1182_v53, %v1004_v50 }
 0x2ab   :  { %v1308_v56 = vadd.f32 %v6107_v46, %v1246_v1 }
 0x2ac   :  { %5130 = vrot.lane.b32.xlu2 %v5129_v47, %s5207_s17  ;;  %v1309_v41 = vadd.f32 %v6109_v55, %v1247_v13  ;;  %v954_v27 = vpop.f32.mrf.mxu3  ;;  %v4129_v13 = vor.u32 %v4975_v3, %v4128_v8  ;;  %v7986_v3 = vld [vmem:[#allocation9_spill] sm:$0xff] }
 0x2ad   :  { %v1364_v29 = vmax.f32 %v1308_v56, 0.0 }
 0x2ae   :  { %v1365_v30 = vmax.f32 %v1309_v41, 0.0  ;;  %1775 = vmatpush.bf16.msra.mxu2 %v4129_v13  ;;  %v1012_v41 = vadd.f32 %v949_v44, %v5981_v17  ;;  %v4987_v17 = vld [vmem:[%s7891_s3 + $0x12c] sm:$0xf0]  ;;  %v7984_v44 = vld [vmem:[#allocation2_spill] sm:$0xff]  ;;  %v1015_v13 = vadd.f32 %v875_v9, %v7986_v3 }
 0x2af   :  { %v6377_v9 = vld [vmem:[%s7891_s3 + $0xa0] sm:$0x11] }
 0x2b0   :  { %v1105_v49 = vpop.f32.mrf.mxu0 }
 0x2b1   :  { %v1248_v45 = vadd.f32 %v1105_v49, %v1005_v16  ;;  %v1184_v21 = vpop.f32.mrf.mxu1 }
 0x2b2   :  { %v1249_v38 = vadd.f32 %v1184_v21, %v1006_v24  ;;  %v877_v21 = vpop.f32.mrf.mxu2 }
 0x2b3   :  { %v1310_v62 = vadd.f32 %v6107_v46, %v1248_v45  ;;  %v1011_v45 = vadd.f32 %v870_v63, %v5978_v18  ;;  %v4176_v18 = vld [vmem:[%s7891_s3 + $0x128] sm:$0xf] }
 0x2b4   :  { %v1311_v37 = vadd.f32 %v6109_v55, %v1249_v38  ;;  %v956_v38 = vpop.f32.mrf.mxu3 }
 0x2b5   :  { %v1366_v31 = vmax.f32 %v1310_v62, 0.0 }
 0x2b6   :  { %v1367_v32 = vmax.f32 %v1311_v37, 0.0  ;;  %v4120_v37 = vld [vmem:[%s7891_s3 + $0xb8] sm:$0xf] }
 0x2b7   :  { %v6303_v6 = vmax.f32 %v1364_v29, %v1366_v31  ;;  %v4973_v29 = vld [vmem:[%s7891_s3 + $0xbc] sm:$0xf0] }
 0x2b8   :  { %v1108_v61 = vpop.f32.mrf.mxu0  ;;  %v6305_v10 = vmax.f32 %v1365_v30, %v1367_v32  ;;  %v4121_v63 = vor.u32 %v4973_v29, %v4120_v37  ;;  %v1013_v30 = vadd.f32 %v872_v12, %v7984_v44  ;;  %v4177_v32 = vor.u32 %v4987_v17, %v4176_v18 }
 0x2b9   :  { %v1187_v15 = vpop.f32.mrf.mxu1  ;;  %v1250_v28 = vadd.f32 %v1108_v61, %v1007_v54  ;;  %v7985_v61 = vld [vmem:[#allocation8_spill] sm:$0xff]  ;;  %v1017_v37 = vadd.f32 %v877_v21, %v6004_v35 }
 0x2ba   :  { %v5134_v20 = vpack.i.bf16 %v6305_v10, %v6303_v6  ;;  %v1251_v7 = vadd.f32 %v1187_v15, %v1008_v26  ;;  %v1014_v15 = vadd.f32 %v951_v4, %v7985_v61  ;;  %1776 = vmatpush.bf16.msra.mxu2 %v4121_v63  ;;  %1811 = vmatpush.bf16.msra.mxu3 %v4177_v32  ;;  %v1968_v63 = vunpack.c.h.b16 %v6377_v9 }
 0x2bb   :  { %v1312_v25 = vadd.f32 %v6107_v46, %v1250_v28 }
 0x2bc   :  { %5135 = vrot.lane.b32.xlu2 %v5134_v20, %s5207_s17  ;;  %v1313_v47 = vadd.f32 %v6109_v55, %v1251_v7  ;;  %v4112_v7 = vld [vmem:[%s7891_s3 + $0xa8] sm:$0xf] }
 0x2bd   :  { %v1368_v0 = vmax.f32 %v1312_v25, 0.0 }
 0x2be   :  { %v1369_v1 = vmax.f32 %v1313_v47, 0.0 }
 0x2c0   :  { %v1110_v52 = vpop.f32.mrf.mxu0 }
 0x2c1   :  { %v1252_v14 = vadd.f32 %v1110_v52, %v1009_v39  ;;  %v1189_v53 = vpop.f32.mrf.mxu1  ;;  %v4971_v39 = vld [vmem:[%s7891_s3 + $0xac] sm:$0xf0] }
 0x2c2   :  { %v1253_v22 = vadd.f32 %v1189_v53, %v1010_v36  ;;  %v4113_v52 = vor.u32 %v4971_v39, %v4112_v7 }
 0x2c3   :  { %v1314_v40 = vadd.f32 %v6107_v46, %v1252_v14  ;;  %v880_v14 = vpop.f32.mrf.mxu2 }
 0x2c4   :  { %v1315_v19 = vadd.f32 %v6109_v55, %v1253_v22  ;;  %1777 = vmatpush.bf16.msra.mxu2 %v4113_v52 }
 0x2c5   :  { %v1370_v50 = vmax.f32 %v1314_v40, 0.0 }
 0x2c6   :  { %v1371_v60 = vmax.f32 %v1315_v19, 0.0  ;;  %v959_v19 = vpop.f32.mrf.mxu3 }
 0x2c7   :  { %v6325_v2 = vmax.f32 %v1368_v0, %v1370_v50 }
 0x2c8   :  { %v1113_v16 = vpop.f32.mrf.mxu0  ;;  %v6327_v24 = vmax.f32 %v1369_v1, %v1371_v60 }
 0x2c9   :  { %v1192_v49 = vpop.f32.mrf.mxu1  ;;  %v1254_v62 = vadd.f32 %v1113_v16, %v1011_v45  ;;  %v7987_v16 = vld [vmem:[#allocation3_spill] sm:$0xff] }
 0x2ca   :  { %v5139_v56 = vpack.i.bf16 %v6327_v24, %v6325_v2  ;;  %v1255_v31 = vadd.f32 %v1192_v49, %v1012_v41  ;;  %v1016_v49 = vadd.f32 %v954_v27, %v7987_v16  ;;  %v4964_v41 = vld [vmem:[%s7891_s3 + $0x74] sm:$0xf]  ;;  %v7988_v27 = vld [vmem:[#allocation10_spill] sm:$0xff] }
 0x2cb   :  { %v1316_v54 = vadd.f32 %v6107_v46, %v1254_v62  ;;  %v4260_v62 = vld [vmem:[%s7891_s3 + $0x78] sm:$0xf0]  ;;  %v882_v29 = vpop.f32.mrf.mxu2  ;;  %v1018_v18 = vadd.f32 %v956_v38, %v7988_v27 }
 0x2cc   :  { %5140 = vrot.lane.b32.xlu0 %v5139_v56, %s5207_s17  ;;  %v1317_v12 = vadd.f32 %v6109_v55, %v1255_v31  ;;  %v4263_v31 = vor.u32 %v4964_v41, %v4260_v62  ;;  %v7991_v41 = vld [vmem:[#allocation12_spill] sm:$0xff] }
 0x2cd   :  { %v1372_v53 = vmax.f32 %v1316_v54, 0.0  ;;  %v1021_v62 = vadd.f32 %v882_v29, %v7991_v41 }
 0x2ce   :  { %v1373_v22 = vmax.f32 %v1317_v12, 0.0  ;;  %v961_v44 = vpop.f32.mrf.mxu3  ;;  %2100 = vmatpush.bf16.msrb.mxu0 %v4263_v31 }
 0x2d0   :  { %v1115_v20 = vpop.f32.mrf.mxu0 }
 0x2d1   :  { %v1256_v26 = vadd.f32 %v1115_v20, %v1013_v30  ;;  %v1194_v28 = vpop.f32.mrf.mxu1  ;;  %v1990_v20 = vpack.c.b16 %v1968_v63, %v1968_v63 }
 0x2d2   :  { %v1257_v36 = vadd.f32 %v1194_v28, %v1014_v15  ;;  %v5159_v15 = vpack.i.bf16 %v6129_v5, %v6127_v59 }
 0x2d3   :  { %v1318_v4 = vadd.f32 %v6107_v46, %v1256_v26  ;;  %v2030_v26 = vsel %vm1763_vm1, %v1990_v20, 0 }
 0x2d4   :  { %v1319_v25 = vadd.f32 %v6109_v55, %v1257_v36  ;;  %2139 = vmatpush.bf16.msrb.mxu1 %v2030_v26 }
 0x2d5   :  { %v1374_v47 = vmax.f32 %v1318_v4, 0.0 }
 0x2d6   :  { %v1375_v40 = vmax.f32 %v1319_v25, 0.0 }
 0x2d7   :  { %v6358_v0 = vmax.f32 %v1372_v53, %v1374_v47  ;;  %v885_v53 = vpop.f32.mrf.mxu2 }
 0x2d8   :  { %v1118_v50 = vpop.f32.mrf.mxu0  ;;  %v6360_v1 = vmax.f32 %v1373_v22, %v1375_v40  ;;  %v7989_v40 = vld [vmem:[#allocation11_spill] sm:$0xff] }
 0x2d9   :  { %v1197_v60 = vpop.f32.mrf.mxu1  ;;  %v1258_v56 = vadd.f32 %v1118_v50, %v1015_v13  ;;  %v1019_v50 = vadd.f32 %v880_v14, %v7989_v40  ;;  %v7990_v13 = vld [vmem:[#allocation4_spill] sm:$0xff] }
 0x2da   :  { %v5144_v8 = vpack.i.bf16 %v6360_v1, %v6358_v0  ;;  %v1259_v45 = vadd.f32 %v1197_v60, %v1016_v49  ;;  %v964_v60 = vpop.f32.mrf.mxu3  ;;  %v1020_v16 = vadd.f32 %v959_v19, %v7990_v13 }
 0x2db   :  { %v1320_v30 = vadd.f32 %v6107_v46, %v1258_v56 }
 0x2dc   :  { %5145 = vrot.lane.b32.xlu1 %v5144_v8, %s5207_s17  ;;  %v1321_v35 = vadd.f32 %v6109_v55, %v1259_v45 }
 0x2dd   :  { %v1376_v28 = vmax.f32 %v1320_v30, 0.0 }
 0x2de   :  { %v1377_v39 = vmax.f32 %v1321_v35, 0.0  ;;  %v5111_v12 = vpop.permute.xlu0 %5110 }
 0x2df   :  { %v5113_v8 = vunpack.i.h.bf16 %v5111_v12  ;;  %v5112_v3 = vunpack.i.l.bf16 %v5111_v12 }
 0x2e0   :  { %v1120_v17 = vpop.f32.mrf.mxu0 }
 0x2e1   :  { %v1260_v32 = vadd.f32 %v1120_v17, %v1017_v37  ;;  %v1199_v61 = vpop.f32.mrf.mxu1  ;;  %v1510_v37 = vsel %vm1508_vm2, %v5112_v3, %v5113_v8  ;;  %v6402_v14 = vmax.f32 %v6151_v11, %v5113_v8  ;;  %v887_v11 = vpop.f32.mrf.mxu2  ;;  %v4252_v8 = vld [vmem:[%s7891_s3 + $0x68] sm:$0xf0]  ;;  %v7994_v3 = vld [vmem:[#allocation5_spill] sm:$0xff] }
 0x2e2   :  { %v1261_v21 = vadd.f32 %v1199_v61, %v1018_v18  ;;  %v7992_v18 = vld [vmem:[#allocation13_spill] sm:$0xff]  ;;  %v6408_v29 = vmax.f32 %v6149_v23, %v1510_v37  ;;  %v966_v26 = vpop.f32.mrf.mxu3  ;;  %v1024_v13 = vadd.f32 %v964_v60, %v7994_v3 }
 0x2e3   :  { %v1322_v54 = vadd.f32 %v6107_v46, %v1260_v32  ;;  %v1022_v17 = vadd.f32 %v961_v44, %v7992_v18  ;;  %v7996_v18 = vld [vmem:[#allocation16_spill] sm:$0xff] }
 0x2e4   :  { %v1323_v38 = vadd.f32 %v6109_v55, %v1261_v21  ;;  %5160 = vrot.lane.b32.xlu1 %v5159_v15, %s5207_s17 }
 0x2e5   :  { %v1378_v7 = vmax.f32 %v1322_v54, 0.0 }
 0x2e6   :  { %v1379_v36 = vmax.f32 %v1323_v38, 0.0 }
 0x2e7   :  { %v6389_v52 = vmax.f32 %v1376_v28, %v1378_v7 }
 0x2e8   :  { %v1123_v4 = vpop.f32.mrf.mxu0  ;;  %v6391_v25 = vmax.f32 %v1377_v39, %v1379_v36 }
 0x2e9   :  { %v1202_v47 = vpop.f32.mrf.mxu1  ;;  %v1262_v49 = vadd.f32 %v1123_v4, %v1019_v50  ;;  %v4962_v50 = vld [vmem:[%s7891_s3 + $0x64] sm:$0xf] }
 0x2ea   :  { %v5149_v22 = vpack.i.bf16 %v6391_v25, %v6389_v52  ;;  %v1263_v56 = vadd.f32 %v1202_v47, %v1020_v16  ;;  %v4255_v16 = vor.u32 %v4962_v50, %v4252_v8  ;;  %v969_v37 = vpop.f32.mrf.mxu3  ;;  %v7997_v8 = vld [vmem:[#allocation17_spill] sm:$0xff] }
 0x2eb   :  { %v1324_v19 = vadd.f32 %v6107_v46, %v1262_v49  ;;  %v890_v49 = vpop.f32.mrf.mxu2 }
 0x2ec   :  { %5150 = vrot.lane.b32.xlu2 %v5149_v22, %s5207_s17  ;;  %v1325_v21 = vadd.f32 %v6109_v55, %v1263_v56  ;;  %v7993_v22 = vld [vmem:[#allocation14_spill] sm:$0xff]  ;;  %2101 = vmatpush.bf16.msrb.mxu0 %v4255_v16  ;;  %v1027_v3 = vadd.f32 %v890_v49, %v7997_v8 }
 0x2ed   :  { %v1380_v28 = vmax.f32 %v1324_v19, 0.0  ;;  %v1023_v40 = vadd.f32 %v885_v53, %v7993_v22  ;;  %v7998_v16 = vld [vmem:[#allocation18_spill] sm:$0xff] }
 0x2ee   :  { %v5116_v45 = vpop.permute.xlu0 %5115  ;;  %v1381_v7 = vmax.f32 %v1325_v21, 0.0 }
 0x2ef   :  { %v5118_v31 = vunpack.i.h.bf16 %v5116_v45  ;;  %v5117_v27 = vunpack.i.l.bf16 %v5116_v45 }
 0x2f0   :  { %v1125_v63 = vpop.f32.mrf.mxu0 }
 0x2f1   :  { %v1556_v30 = vmax.f32 %v6186_v33, %v5118_v31  ;;  %v1511_v32 = vsel %vm1508_vm2, %v5117_v27, %v5118_v31  ;;  %v1264_v61 = vadd.f32 %v1125_v63, %v1021_v62  ;;  %v1204_v35 = vpop.f32.mrf.mxu1  ;;  %v7995_v62 = vld [vmem:[#allocation15_spill] sm:$0xff] }
 0x2f2   :  { %v1555_v44 = vmax.f32 %v6184_v42, %v1511_v32  ;;  %v1265_v15 = vadd.f32 %v1204_v35, %v1022_v17  ;;  %v1025_v53 = vadd.f32 %v887_v11, %v7995_v62  ;;  %v1026_v17 = vadd.f32 %v966_v26, %v7996_v18  ;;  %v4984_v62 = vld [vmem:[%s7891_s3 + $0x11c] sm:$0xf] }
 0x2f3   :  { %v6413_v20 = vpack.c.bf16 %v1556_v30, %v6402_v14  ;;  %v1326_v54 = vadd.f32 %v6107_v46, %v1264_v61 }
 0x2f4   :  { %v6417_v33 = vpack.c.bf16 %v1555_v44, %v6408_v29  ;;  %v1327_v38 = vadd.f32 %v6109_v55, %v1265_v15 }
 0x2f5   :  { %v1382_v23 = vmax.f32 %v1326_v54, 0.0  ;;  %4190 = vmatmul.msk.bf16.vlgmr.msra.gmra.mxu3 %vm1747_vm3, %v6413_v20 }
 0x2f6   :  { %v1383_v42 = vmax.f32 %v1327_v38, 0.0  ;;  %1778 = vmatmul.bf16.vlgmr.msra.gmra.mxu2 %v6417_v33 }
 0x2f7   :  { %v6423_v39 = vmax.f32 %v1380_v28, %v1382_v23 }
 0x2f8   :  { %v1128_v12 = vpop.f32.mrf.mxu0  ;;  %v6425_v36 = vmax.f32 %v1381_v7, %v1383_v42 }
 0x2f9   :  { %v1207_v4 = vpop.f32.mrf.mxu1  ;;  %v1266_v56 = vadd.f32 %v1128_v12, %v1023_v40  ;;  %v892_v12 = vpop.f32.mrf.mxu2 }
 0x2fa   :  { %v5154_v47 = vpack.i.bf16 %v6425_v36, %v6423_v39  ;;  %v1267_v45 = vadd.f32 %v1207_v4, %v1024_v13 }
 0x2fb   :  { %v1328_v19 = vadd.f32 %v6107_v46, %v1266_v56  ;;  %v1028_v56 = vadd.f32 %v969_v37, %v7998_v16  ;;  %v4170_v37 = vld [vmem:[%s7891_s3 + $0x120] sm:$0xf0] }
 0x2fc   :  { %5155 = vrot.lane.b32.xlu0 %v5154_v47, %s5207_s17  ;;  %v1329_v21 = vadd.f32 %v6109_v55, %v1267_v45  ;;  %v4960_v45 = vld [vmem:[%s7891_s3 + $0x54] sm:$0xf] }
 0x2fd   :  { %v1384_v23 = vmax.f32 %v1328_v19, 0.0 }
 0x2fe   :  { %v5121_v41 = vpop.permute.xlu1 %5120 }
 0x2ff   :  { %v5123_v31 = vunpack.i.h.bf16 %v5121_v41  ;;  %v5122_v27 = vunpack.i.l.bf16 %v5121_v41  ;;  %v4244_v41 = vld [vmem:[%s7891_s3 + $0x58] sm:$0xf0] }
 0x300   :  { %v1130_v63 = vpop.f32.mrf.mxu0 }
 0x301   :  { %v1558_v60 = vmax.f32 %v6223_v34, %v5123_v31  ;;  %v1512_v32 = vsel %vm1508_vm2, %v5122_v27, %v5123_v31  ;;  %v1268_v61 = vadd.f32 %v1130_v63, %v1025_v53  ;;  %v1209_v35 = vpop.f32.mrf.mxu1  ;;  %v1385_v34 = vmax.f32 %v1329_v21, 0.0  ;;  %v7999_v53 = vld [vmem:[#allocation20_spill] sm:$0xff] }
 0x302   :  { %v1557_v15 = vmax.f32 %v6221_v57, %v1512_v32  ;;  %v1269_v54 = vadd.f32 %v1209_v35, %v1026_v17  ;;  %v971_v57 = vpop.f32.mrf.mxu3  ;;  %v1704_v49 = vunpack.c.h.b16 %v7999_v53  ;;  %v4247_v27 = vor.u32 %v4960_v45, %v4244_v41  ;;  %v8000_v32 = vld [vmem:[#allocation6_spill] sm:$0xff] }
 0x303   :  { %v6445_v11 = vpack.c.bf16 %v1558_v60, %v1556_v30  ;;  %v1330_v38 = vadd.f32 %v6107_v46, %v1268_v61  ;;  %v4173_v63 = vor.u32 %v4984_v62, %v4170_v37  ;;  %v1029_v61 = vadd.f32 %v892_v12, %v8000_v32  ;;  %v8003_v32 = vld [vmem:[#allocation7_spill] sm:$0xff] }
 0x304   :  { %v1331_v26 = vadd.f32 %v6109_v55, %v1269_v54  ;;  %v6449_v28 = vpack.c.bf16 %v1557_v15, %v1555_v44  ;;  %v1726_v19 = vpack.c.b16 %v1704_v49, %v1704_v49  ;;  %2102 = vmatpush.bf16.msrb.mxu0 %v4247_v27 }
 0x305   :  { %v1386_v7 = vmax.f32 %v1330_v38, 0.0  ;;  %v8001_v38 = vld [vmem:[#allocation19_spill] sm:$0xff]  ;;  %1838 = vmatpush.bf16.msrb.mxu2 %v4173_v63  ;;  %v8002_v63 = vld [vmem:[#allocation21_spill] sm:$0xff] }
 0x306   :  { %v1387_v42 = vmax.f32 %v1331_v26, 0.0  ;;  %v5131_v47 = vpop.permute.xlu2 %5130  ;;  %v1030_v26 = vadd.f32 %v971_v57, %v8001_v38 }
 0x307   :  { %v6451_v4 = vmax.f32 %v1384_v23, %v1386_v7  ;;  %v5133_v44 = vunpack.i.h.bf16 %v5131_v47  ;;  %v5132_v13 = vunpack.i.l.bf16 %v5131_v47 }
 0x308   :  { %v1133_v22 = vpop.f32.mrf.mxu0  ;;  %v6453_v40 = vmax.f32 %v1385_v34, %v1387_v42  ;;  %v1768_v34 = vsel %vm1763_vm1, %v1726_v19, 0 }
 0x309   :  { %v1212_v30 = vpop.f32.mrf.mxu1  ;;  %v1270_v31 = vadd.f32 %v1133_v22, %v1027_v3  ;;  %v1514_v35 = vsel %vm1508_vm2, %v5132_v13, %v5133_v44  ;;  %v1562_v23 = vmax.f32 %v6287_v48, %v5133_v44  ;;  %1877 = vmatpush.bf16.msrb.mxu3 %v1768_v34 }
 0x30a   :  { %v5164_v50 = vpack.i.bf16 %v6453_v40, %v6451_v4  ;;  %v1271_v18 = vadd.f32 %v1212_v30, %v1028_v56  ;;  %v1561_v8 = vmax.f32 %v6285_v58, %v1514_v35  ;;  %v974_v44 = vpop.f32.mrf.mxu3 }
 0x30b   :  { %v1332_v42 = vadd.f32 %v6107_v46, %v1270_v31 }
 0x30c   :  { %5165 = vrot.lane.b32.xlu2 %v5164_v50, %s5207_s17  ;;  %v895_v50 = vpop.f32.mrf.mxu2  ;;  %v1333_v57 = vadd.f32 %v6109_v55, %v1271_v18 }
 0x30d   :  { %v1388_v62 = vmax.f32 %v1332_v42, 0.0  ;;  %v1031_v19 = vadd.f32 %v895_v50, %v8002_v63  ;;  %v4980_v63 = vld [vmem:[%s7891_s3 + $0xfc] sm:$0xf] }
 0x30e   :  { %v5126_v17 = vpop.permute.xlu1 %5125 }
 0x30f   :  { %v5128_v21 = vunpack.i.h.bf16 %v5126_v17  ;;  %v5127_v54 = vunpack.i.l.bf16 %v5126_v17 }
 0x310   :  { %v1135_v7 = vpop.f32.mrf.mxu0 }
 0x311   :  { %v1560_v47 = vmax.f32 %v6258_v51, %v5128_v21  ;;  %v1513_v22 = vsel %vm1508_vm2, %v5127_v54, %v5128_v21  ;;  %v1272_v12 = vadd.f32 %v1135_v7, %v1029_v61  ;;  %v1214_v30 = vpop.f32.mrf.mxu1  ;;  %v1032_v61 = vadd.f32 %v974_v44, %v8003_v32  ;;  %v8004_v7 = vld [vmem:[#allocation22_spill] sm:$0xff] }
 0x312   :  { %v1559_v48 = vmax.f32 %v6256_v43, %v1513_v22  ;;  %v1273_v3 = vadd.f32 %v1214_v30, %v1030_v26  ;;  %v1389_v43 = vmax.f32 %v1333_v57, 0.0  ;;  %v976_v21 = vpop.f32.mrf.mxu3 }
 0x313   :  { %v6484_v13 = vpack.c.bf16 %v1562_v23, %v1560_v47  ;;  %v6486_v16 = vpack.c.bf16 %v1560_v47, %v1558_v60  ;;  %v1334_v51 = vadd.f32 %v6107_v46, %v1272_v12  ;;  %v8005_v47 = vld [vmem:[#allocation23_spill] sm:$0xff] }
 0x314   :  { %v6489_v56 = vpack.c.bf16 %v1561_v8, %v1559_v48  ;;  %v1335_v45 = vadd.f32 %v6109_v55, %v1273_v3  ;;  %v6492_v41 = vpack.c.bf16 %v1559_v48, %v1557_v15  ;;  %v897_v35 = vpop.f32.mrf.mxu2  ;;  %v1034_v22 = vadd.f32 %v976_v21, %v8005_v47  ;;  %v4956_v21 = vld [vmem:[%s7891_s3 + $0x34] sm:$0xf]  ;;  %v4988_v47 = vld [vmem:[%s7891_s3 + $0x13c] sm:$0xf] }
 0x315   :  { %v1390_v58 = vmax.f32 %v1334_v51, 0.0  ;;  %4191 = vmatmul.msk.bf16.gmra.mxu3 %vm1747_vm3, %v6486_v16  ;;  %v1033_v34 = vadd.f32 %v897_v35, %v8004_v7  ;;  %v4220_v7 = vld [vmem:[%s7891_s3 + $0x28] sm:$0xf0] }
 0x316   :  { %v1391_v53 = vmax.f32 %v1335_v45, 0.0  ;;  %v5136_v49 = vpop.permute.xlu2 %5135  ;;  %1783 = vmatmul.bf16.gmra.mxu2 %v6492_v41 }
 0x317   :  { %v6497_v60 = vmax.f32 %v1388_v62, %v1390_v58  ;;  %v5138_v37 = vunpack.i.h.bf16 %v5136_v49  ;;  %v5137_v18 = vunpack.i.l.bf16 %v5136_v49  ;;  %v4162_v58 = vld [vmem:[%s7891_s3 + $0x110] sm:$0xf0] }
 0x318   :  { %v1138_v31 = vpop.f32.mrf.mxu0  ;;  %v6499_v27 = vmax.f32 %v1389_v43, %v1391_v53 }
 0x319   :  { %v1217_v17 = vpop.f32.mrf.mxu1  ;;  %v1515_v54 = vsel %vm1508_vm2, %v5137_v18, %v5138_v37  ;;  %v1274_v38 = vadd.f32 %v1138_v31, %v1031_v19  ;;  %v6509_v42 = vmax.f32 %v6305_v10, %v5138_v37  ;;  %v4958_v31 = vld [vmem:[%s7891_s3 + $0x44] sm:$0xf]  ;;  %v4236_v37 = vld [vmem:[%s7891_s3 + $0x48] sm:$0xf0] }
 0x31a   :  { %v5169_v15 = vpack.i.bf16 %v6499_v27, %v6497_v60  ;;  %v1275_v26 = vadd.f32 %v1217_v17, %v1032_v61  ;;  %v6513_v12 = vmax.f32 %v6303_v6, %v1515_v54  ;;  %v4982_v6 = vld [vmem:[%s7891_s3 + $0x10c] sm:$0xf]  ;;  %v4968_v17 = vld [vmem:[%s7891_s3 + $0x94] sm:$0xf]  ;;  %v4239_v19 = vor.u32 %v4958_v31, %v4236_v37  ;;  %v4154_v61 = vld [vmem:[%s7891_s3 + $0x100] sm:$0xf0] }
 0x31b   :  { %v1336_v50 = vadd.f32 %v6107_v46, %v1274_v38  ;;  %v6518_v51 = vpack.c.bf16 %v6509_v42, %v1562_v23  ;;  %v4165_v23 = vor.u32 %v4982_v6, %v4162_v58  ;;  %v4157_v35 = vor.u32 %v4980_v63, %v4154_v61  ;;  %v4228_v54 = vld [vmem:[%s7891_s3 + $0x38] sm:$0xf0]  ;;  %v4268_v6 = vld [vmem:[%s7891_s3 + $0x88] sm:$0xf0]  ;;  %v4178_v61 = vld [vmem:[%s7891_s3 + $0x130] sm:$0xf0] }
 0x31c   :  { %5170 = vrot.lane.b32.xlu0 %v5169_v15, %s5207_s17  ;;  %v1337_v3 = vadd.f32 %v6109_v55, %v1275_v26  ;;  %v6523_v62 = vpack.c.bf16 %v6513_v12, %v1561_v8  ;;  %v4276_v15 = vld [vmem:[%s7891_s3 + $0x98] sm:$0xf0]  ;;  %2103 = vmatpush.bf16.msrb.mxu0 %v4239_v19  ;;  %v4231_v38 = vor.u32 %v4956_v21, %v4228_v54  ;;  %v4954_v26 = vld [vmem:[%s7891_s3 + $0x24] sm:$0xf] }
 0x31d   :  { %v1392_v43 = vmax.f32 %v1336_v50, 0.0  ;;  %1839 = vmatpush.bf16.msrb.mxu2 %v4165_v23  ;;  %v4279_v32 = vor.u32 %v4968_v17, %v4276_v15  ;;  %v4130_v17 = vld [vmem:[%s7891_s3 + $0xd0] sm:$0xf0]  ;;  %v4986_v15 = vld [vmem:[%s7891_s3 + $0x12c] sm:$0xf] }
 0x31f   :  { %2140 = vmatpush.bf16.msrb.mxu1 %v4279_v32 }
 0x320   :  { %v1140_v30 = vpop.f32.mrf.mxu0  ;;  %2104 = vmatpush.bf16.msrb.mxu0 %v4231_v38 }
 0x321   :  { %v1276_v57 = vadd.f32 %v1140_v30, %v1033_v34  ;;  %v1219_v48 = vpop.f32.mrf.mxu1  ;;  %1840 = vmatpush.bf16.msrb.mxu2 %v4157_v35  ;;  %v4223_v34 = vor.u32 %v4954_v26, %v4220_v7  ;;  %v4978_v30 = vld [vmem:[%s7891_s3 + $0xec] sm:$0xf]  ;;  %v4181_v35 = vor.u32 %v4986_v15, %v4178_v61 }
 0x322   :  { %v1277_v44 = vadd.f32 %v1219_v48, %v1034_v22  ;;  %v4186_v22 = vld [vmem:[%s7891_s3 + $0x140] sm:$0xf0]  ;;  %v4952_v48 = vld [vmem:[%s7891_s3 + $0x14] sm:$0xf] }
 0x323   :  { %v1338_v45 = vadd.f32 %v6107_v46, %v1276_v57  ;;  %v1393_v46 = vmax.f32 %v1337_v3, 0.0  ;;  %v4189_v50 = vor.u32 %v4988_v47, %v4186_v22  ;;  %v4146_v57 = vld [vmem:[%s7891_s3 + $0xf0] sm:$0xf0]  ;;  %v4212_v3 = vld [vmem:[%s7891_s3 + $0x18] sm:$0xf0] }
 0x324   :  { %v1339_v10 = vadd.f32 %v6109_v55, %v1277_v44  ;;  %2105 = vmatpush.bf16.msrb.mxu0 %v4223_v34  ;;  %v4149_v44 = vor.u32 %v4978_v30, %v4146_v57 }
 0x325   :  { %v1394_v53 = vmax.f32 %v1338_v45, 0.0  ;;  %4192 = vmatmul.msk.bf16.gmra.mxu3 %vm1747_vm3, %v6518_v51  ;;  %v4215_v45 = vor.u32 %v4952_v48, %v4212_v3 }
 0x326   :  { %v1395_v49 = vmax.f32 %v1339_v10, 0.0  ;;  %1788 = vmatmul.bf16.gmra.mxu2 %v6523_v62  ;;  %1878 = vmatpush.bf16.msrb.mxu3 %v4189_v50  ;;  %v4966_v10 = vld [vmem:[%s7891_s3 + $0x84] sm:$0xf] }
 0x327   :  { %v6534_v55 = vmax.f32 %v1392_v43, %v1394_v53  ;;  %1841 = vmatpush.bf16.msrb.mxu2 %v4149_v44  ;;  %v4271_v58 = vor.u32 %v4966_v10, %v4268_v6  ;;  %v4950_v43 = vld [vmem:[%s7891_s3 + $0x4] sm:$0xf]  ;;  %v4204_v53 = vld [vmem:[%s7891_s3 + $0x8] sm:$0xf0] }
 0x328   :  { %v6536_v8 = vmax.f32 %v1393_v46, %v1395_v49  ;;  %2106 = vmatpush.bf16.msrb.mxu0 %v4215_v45  ;;  %v4207_v23 = vor.u32 %v4950_v43, %v4204_v53  ;;  %v4976_v46 = vld [vmem:[%s7891_s3 + $0xdc] sm:$0xf]  ;;  %v4138_v49 = vld [vmem:[%s7891_s3 + $0xe0] sm:$0xf0]  ;;  %v4970_v6 = vld [vmem:[%s7891_s3 + $0xac] sm:$0xf] }
 0x329   :  { %2141 = vmatpush.bf16.msrb.mxu1 %v4271_v58  ;;  %v4141_v31 = vor.u32 %v4976_v46, %v4138_v49  ;;  %v4114_v58 = vld [vmem:[%s7891_s3 + $0xb0] sm:$0xf0] }
 0x32a   :  { %v5174_v18 = vpack.i.bf16 %v6536_v8, %v6534_v55  ;;  %1879 = vmatpush.bf16.msrb.mxu3 %v4181_v35  ;;  %v4117_v53 = vor.u32 %v4970_v6, %v4114_v58  ;;  %v4347_v6 = vld [vmem:[%s7891_s3 + $0x198] sm:$0xf0] }
 0x32b   :  { %1842 = vmatpush.bf16.msrb.mxu2 %v4141_v31 }
 0x32c   :  { %5175 = vrot.lane.b32.xlu1 %v5174_v18, %s5207_s17  ;;  %2107 = vmatpush.bf16.msrb.mxu0 %v4207_v23  ;;  %v4974_v18 = vld [vmem:[%s7891_s3 + $0xcc] sm:$0xf] }
 0x32d   :  { %v4133_v32 = vor.u32 %v4974_v18, %v4130_v17  ;;  %v5004_v17 = vld [vmem:[%s7891_s3 + $0x1c4] sm:$0xf] }
 0x32f   :  { %1843 = vmatpush.bf16.msrb.mxu2 %v4133_v32 }
 0x33e   :  { %v5141_v37 = vpop.permute.xlu0 %5140 }
 0x33f   :  { %v5143_v63 = vunpack.i.h.bf16 %v5141_v37  ;;  %v5142_v19 = vunpack.i.l.bf16 %v5141_v37 }
 0x341   :  { %v1516_v54 = vsel %vm1508_vm2, %v5142_v19, %v5143_v63  ;;  %v6621_v7 = vmax.f32 %v6327_v24, %v5143_v63  ;;  %v4972_v24 = vld [vmem:[%s7891_s3 + $0xbc] sm:$0xf] }
 0x342   :  { %v6628_v22 = vmax.f32 %v6325_v2, %v1516_v54 }
 0x346   :  { %v5151_v49 = vpop.permute.xlu2 %5150 }
 0x347   :  { %v5153_v37 = vunpack.i.h.bf16 %v5151_v49  ;;  %v5152_v18 = vunpack.i.l.bf16 %v5151_v49  ;;  %v4339_v49 = vld [vmem:[%s7891_s3 + $0x188] sm:$0xf0] }
 0x349   :  { %v1518_v19 = vsel %vm1508_vm2, %v5152_v18, %v5153_v37  ;;  %v6687_v35 = vmax.f32 %v6391_v25, %v5153_v37 }
 0x34e   :  { %v5146_v21 = vpop.permute.xlu1 %5145 }
 0x34f   :  { %v5148_v38 = vunpack.i.h.bf16 %v5146_v21  ;;  %v5147_v26 = vunpack.i.l.bf16 %v5146_v21 }
 0x351   :  { %v6624_v34 = vmax.f32 %v6360_v1, %v5148_v38  ;;  %v1517_v47 = vsel %vm1508_vm2, %v5147_v26, %v5148_v38  ;;  %v4122_v1 = vld [vmem:[%s7891_s3 + $0xc0] sm:$0xf0]  ;;  %v5002_v38 = vld [vmem:[%s7891_s3 + $0x1b4] sm:$0xf]  ;;  %v4363_v26 = vld [vmem:[%s7891_s3 + $0x1b8] sm:$0xf0] }
 0x352   :  { %v6631_v30 = vmax.f32 %v6358_v0, %v1517_v47  ;;  %v4125_v2 = vor.u32 %v4972_v24, %v4122_v1  ;;  %v6700_v47 = vmax.f32 %v6389_v52, %v1518_v19  ;;  %v4366_v25 = vor.u32 %v5002_v38, %v4363_v26  ;;  %v4250_v1 = vld [vmem:[%s7891_s3 + $0x60] sm:$0xf]  ;;  %v4274_v19 = vld [vmem:[%s7891_s3 + $0x90] sm:$0xf]  ;;  %v4959_v38 = vld [vmem:[%s7891_s3 + $0x44] sm:$0xf0] }
 0x353   :  { %v6635_v50 = vpack.c.bf16 %v6624_v34, %v6621_v7  ;;  %v5008_v26 = vld [vmem:[%s7891_s3 + $0x1e4] sm:$0xf] }
 0x354   :  { %v6645_v57 = vpack.c.bf16 %v6631_v30, %v6628_v22  ;;  %1844 = vmatpush.bf16.msrb.mxu2 %v4125_v2  ;;  %v4963_v2 = vld [vmem:[%s7891_s3 + $0x64] sm:$0xf0] }
 0x355   :  { %8006 = vst [vmem:[#allocation24_spill] sm:$0xff] %v6635_v50  ;;  %4193 = vmatmul.msk.bf16.gmra.mxu3 %vm1747_vm3, %v6635_v50 }
 0x356   :  { %8007 = vst [vmem:[#allocation2_spill] sm:$0xff] %v6645_v57  ;;  %1793 = vmatmul.bf16.gmra.mxu2 %v6645_v57  ;;  %v5161_v0 = vpop.permute.xlu1 %5160 }
 0x357   :  { %v5163_v48 = vunpack.i.h.bf16 %v5161_v0  ;;  %v5162_v3 = vunpack.i.l.bf16 %v5161_v0  ;;  %v4251_v0 = vor.u32 %v4963_v2, %v4250_v1 }
 0x358   :  { %1845 = vmatpush.bf16.msrb.mxu2 %v4117_v53  ;;  %v4242_v53 = vld [vmem:[%s7891_s3 + $0x50] sm:$0xf] }
 0x359   :  { %v1552_v44 = vmax.f32 %v6129_v5, %v5163_v48  ;;  %v1509_v45 = vsel %vm1508_vm2, %v5162_v3, %v5163_v48  ;;  %v4965_v5 = vld [vmem:[%s7891_s3 + $0x74] sm:$0xf0]  ;;  %v4355_v48 = vld [vmem:[%s7891_s3 + $0x1a8] sm:$0xf0] }
 0x35a   :  { %v1551_v10 = vmax.f32 %v6127_v59, %v1509_v45  ;;  %v4258_v59 = vld [vmem:[%s7891_s3 + $0x70] sm:$0xf] }
 0x35b   :  { %v6660_v43 = vpack.c.bf16 %v6402_v14, %v1552_v44  ;;  %v1967_v14 = vunpack.c.l.b16 %v6377_v9  ;;  %v4259_v46 = vor.u32 %v4965_v5, %v4258_v59  ;;  %v4371_v9 = vld [vmem:[%s7891_s3 + $0x1c8] sm:$0xf0]  ;;  %v4961_v59 = vld [vmem:[%s7891_s3 + $0x54] sm:$0xf0] }
 0x35c   :  { %v6663_v23 = vpack.c.bf16 %v6408_v29, %v1551_v10  ;;  %v4374_v63 = vor.u32 %v5004_v17, %v4371_v9  ;;  %v4998_v10 = vld [vmem:[%s7891_s3 + $0x194] sm:$0xf]  ;;  %v4331_v9 = vld [vmem:[%s7891_s3 + $0x178] sm:$0xf0] }
 0x35d   :  { %4285 = vmatmul.msk.bf16.vlgmr.msrb.gmra.mxu1 %vm1747_vm3, %v6660_v43  ;;  %v1989_v29 = vpack.c.b16 %v1967_v14, %v1967_v14  ;;  %2032 = vmatpush.bf16.msra.mxu2 %v4259_v46  ;;  %v4350_v5 = vor.u32 %v4998_v10, %v4347_v6  ;;  %v4243_v14 = vor.u32 %v4961_v59, %v4242_v53  ;;  %v4996_v46 = vld [vmem:[%s7891_s3 + $0x184] sm:$0xf]  ;;  %v4994_v17 = vld [vmem:[%s7891_s3 + $0x174] sm:$0xf]  ;;  %v4226_v59 = vld [vmem:[%s7891_s3 + $0x30] sm:$0xf] }
 0x35e   :  { %2108 = vmatmul.bf16.vlgmr.msrb.gmra.mxu0 %v6663_v23  ;;  %v6805_v6 = vpack.c.bf16 %v6621_v7, %v6509_v42  ;;  %v6809_v53 = vpack.c.bf16 %v6628_v22, %v6513_v12  ;;  %v4218_v22 = vld [vmem:[%s7891_s3 + $0x20] sm:$0xf] }
 0x35f   :  { %v2027_v31 = vsel %vm1763_vm1, %v1989_v29, 0  ;;  %2374 = vmatpush.bf16.msra.mxu0 %v4374_v63  ;;  %v6753_v29 = vld [vmem:[%s7891_s3 + $0x1f0] sm:$0x11]  ;;  %v4334_v63 = vor.u32 %v4994_v17, %v4331_v9 }
 0x360   :  { %2071 = vmatpush.bf16.msra.mxu3 %v2027_v31  ;;  %v4342_v31 = vor.u32 %v4996_v46, %v4339_v49  ;;  %v2254_v37 = vunpack.c.h.b16 %v6753_v29  ;;  %v4266_v46 = vld [vmem:[%s7891_s3 + $0x80] sm:$0xf] }
 0x361   :  { %2033 = vmatpush.bf16.msra.mxu2 %v4251_v0  ;;  %v4992_v0 = vld [vmem:[%s7891_s3 + $0x164] sm:$0xf] }
 0x362   :  { %v2276_v18 = vpack.c.b16 %v2254_v37, %v2254_v37 }
 0x363   :  { %2375 = vmatpush.bf16.msra.mxu0 %v4366_v25  ;;  %v4387_v25 = vld [vmem:[%s7891_s3 + $0x1e8] sm:$0xf0] }
 0x364   :  { %v4390_v2 = vor.u32 %v5008_v26, %v4387_v25 }
 0x365   :  { %2034 = vmatpush.bf16.msra.mxu2 %v4243_v14  ;;  %v4955_v14 = vld [vmem:[%s7891_s3 + $0x24] sm:$0xf0] }
 0x366   :  { %v4219_v49 = vor.u32 %v4955_v14, %v4218_v22  ;;  %v5020_v22 = vld [vmem:[%s7891_s3 + $0x24c] sm:$0xf]  ;;  %v4466_v14 = vld [vmem:[%s7891_s3 + $0x250] sm:$0xf0] }
 0x36d   :  { %4286 = vmatmul.msk.bf16.gmra.mxu1 %vm1747_vm3, %v6445_v11 }
 0x36e   :  { %v5156_v15 = vpop.permute.xlu0 %5155  ;;  %2113 = vmatmul.bf16.gmra.mxu0 %v6449_v28 }
 0x36f   :  { %v5158_v32 = vunpack.i.h.bf16 %v5156_v15  ;;  %v5157_v61 = vunpack.i.l.bf16 %v5156_v15  ;;  %v2304_v15 = vsel %vm1763_vm1, %v2276_v18, 0 }
 0x370   :  { %2413 = vmatpush.bf16.msra.mxu1 %v2304_v15  ;;  %v6843_v15 = vpack.c.bf16 %v6687_v35, %v6624_v34 }
 0x371   :  { %v6690_v21 = vmax.f32 %v6425_v36, %v5158_v32  ;;  %v1519_v54 = vsel %vm1508_vm2, %v5157_v61, %v5158_v32  ;;  %v4969_v32 = vld [vmem:[%s7891_s3 + $0x94] sm:$0xf0]  ;;  %v4234_v61 = vld [vmem:[%s7891_s3 + $0x40] sm:$0xf] }
 0x372   :  { %v6703_v24 = vmax.f32 %v6423_v39, %v1519_v54  ;;  %v5000_v39 = vld [vmem:[%s7891_s3 + $0x1a4] sm:$0xf]  ;;  %v4275_v54 = vor.u32 %v4969_v32, %v4274_v19  ;;  %v4235_v1 = vor.u32 %v4959_v38, %v4234_v61  ;;  %v4210_v19 = vld [vmem:[%s7891_s3 + $0x10] sm:$0xf]  ;;  %v4953_v32 = vld [vmem:[%s7891_s3 + $0x14] sm:$0xf0] }
 0x373   :  { %v6707_v36 = vpack.c.bf16 %v6690_v21, %v6687_v35  ;;  %v4358_v3 = vor.u32 %v5000_v39, %v4355_v48  ;;  %v4323_v39 = vld [vmem:[%s7891_s3 + $0x168] sm:$0xf0]  ;;  %v4211_v61 = vor.u32 %v4953_v32, %v4210_v19 }
 0x374   :  { %v6717_v52 = vpack.c.bf16 %v6703_v24, %v6700_v47  ;;  %2072 = vmatpush.bf16.msra.mxu3 %v4275_v54  ;;  %v4326_v48 = vor.u32 %v4992_v0, %v4323_v39  ;;  %2035 = vmatpush.bf16.msra.mxu2 %v4235_v1  ;;  %v4369_v1 = vld [vmem:[%s7891_s3 + $0x1c0] sm:$0xf]  ;;  %v2253_v0 = vunpack.c.l.b16 %v6753_v29  ;;  %v5016_v32 = vld [vmem:[%s7891_s3 + $0x22c] sm:$0xf] }
 0x375   :  { %4194 = vmatmul.msk.bf16.gmra.mxu3 %vm1747_vm3, %v6707_v36  ;;  %2376 = vmatpush.bf16.msra.mxu0 %v4358_v3  ;;  %v4379_v3 = vld [vmem:[%s7891_s3 + $0x1d8] sm:$0xf0] }
 0x376   :  { %1798 = vmatmul.bf16.gmra.mxu2 %v6717_v52  ;;  %2414 = vmatpush.bf16.msra.mxu1 %v4390_v2  ;;  %v5005_v2 = vld [vmem:[%s7891_s3 + $0x1c4] sm:$0xf0] }
 0x377   :  { %v4370_v39 = vor.u32 %v5005_v2, %v4369_v1 }
 0x378   :  { %v1813_v44 = vpop.f32.mrf.mxu3 }
 0x379   :  { %v1779_v45 = vpop.f32.mrf.mxu2  ;;  %2377 = vmatpush.bf16.msra.mxu0 %v4350_v5  ;;  %v4957_v5 = vld [vmem:[%s7891_s3 + $0x34] sm:$0xf0] }
 0x37a   :  { %v6734_v58 = vadd.f32 %v1813_v44, %v1779_v45  ;;  %v4990_v45 = vld [vmem:[%s7891_s3 + $0x154] sm:$0xf]  ;;  %v4227_v42 = vor.u32 %v4957_v5, %v4226_v59  ;;  %v5022_v59 = vld [vmem:[%s7891_s3 + $0x25c] sm:$0xf]  ;;  %v4474_v5 = vld [vmem:[%s7891_s3 + $0x260] sm:$0xf0] }
 0x37c   :  { %2036 = vmatpush.bf16.msra.mxu2 %v4227_v42  ;;  %v4477_v42 = vor.u32 %v5022_v59, %v4474_v5  ;;  %v4498_v59 = vld [vmem:[%s7891_s3 + $0x290] sm:$0xf0] }
 0x37d   :  { %4287 = vmatmul.msk.bf16.gmra.mxu1 %vm1747_vm3, %v6484_v13  ;;  %2378 = vmatpush.bf16.msra.mxu0 %v4342_v31  ;;  %v4967_v31 = vld [vmem:[%s7891_s3 + $0x84] sm:$0xf0] }
 0x37e   :  { %2118 = vmatmul.bf16.gmra.mxu0 %v6489_v56  ;;  %v4267_v18 = vor.u32 %v4967_v31, %v4266_v46  ;;  %v4469_v46 = vor.u32 %v5020_v22, %v4466_v14  ;;  %v4458_v31 = vld [vmem:[%s7891_s3 + $0x240] sm:$0xf0]  ;;  %v4434_v22 = vld [vmem:[%s7891_s3 + $0x210] sm:$0xf0] }
 0x380   :  { %v6820_v7 = vpop.f32.mrf.mxu3  ;;  %2037 = vmatpush.bf16.msra.mxu2 %v4219_v49  ;;  %2073 = vmatpush.bf16.msra.mxu3 %v4267_v18  ;;  %v5018_v49 = vld [vmem:[%s7891_s3 + $0x23c] sm:$0xf]  ;;  %v5001_v18 = vld [vmem:[%s7891_s3 + $0x1a4] sm:$0xf0] }
 0x381   :  { %2379 = vmatpush.bf16.msra.mxu0 %v4334_v63  ;;  %v6822_v12 = vpop.f32.mrf.mxu2  ;;  %v6847_v63 = vpack.c.bf16 %v6700_v47, %v6631_v30  ;;  %v4202_v30 = vld [vmem:[%s7891_s3] sm:$0xf]  ;;  %v4951_v47 = vld [vmem:[%s7891_s3 + $0x4] sm:$0xf0] }
 0x382   :  { %v4203_v54 = vor.u32 %v4951_v47, %v4202_v30  ;;  %v6940_v30 = vld [vmem:[%s7891_s3 + $0x298] sm:$0x11] }
 0x384   :  { %2038 = vmatpush.bf16.msra.mxu2 %v4211_v61  ;;  %v4450_v61 = vld [vmem:[%s7891_s3 + $0x230] sm:$0xf0] }
 0x385   :  { %4195 = vmatmul.msk.bf16.vlgmr.msrb.gmra.mxu3 %vm1747_vm3, %v6413_v20  ;;  %2380 = vmatpush.bf16.msra.mxu0 %v4326_v48  ;;  %v5006_v20 = vld [vmem:[%s7891_s3 + $0x1d4] sm:$0xf]  ;;  %v2275_v48 = vpack.c.b16 %v2253_v0, %v2253_v0  ;;  %v4453_v47 = vor.u32 %v5016_v32, %v4450_v61 }
 0x386   :  { %1846 = vmatmul.bf16.vlgmr.msrb.gmra.mxu2 %v6417_v33  ;;  %v4382_v44 = vor.u32 %v5006_v20, %v4379_v3  ;;  %v4315_v33 = vld [vmem:[%s7891_s3 + $0x158] sm:$0xf0]  ;;  %v5024_v3 = vld [vmem:[%s7891_s3 + $0x26c] sm:$0xf] }
 0x387   :  { %v4318_v10 = vor.u32 %v4990_v45, %v4315_v33  ;;  %v2301_v20 = vsel %vm1763_vm1, %v2275_v48, 0  ;;  %v4361_v45 = vld [vmem:[%s7891_s3 + $0x1b0] sm:$0xf]  ;;  %v5003_v33 = vld [vmem:[%s7891_s3 + $0x1b4] sm:$0xf0] }
 0x388   :  { %2415 = vmatpush.bf16.msra.mxu1 %v4382_v44  ;;  %2039 = vmatpush.bf16.msra.mxu2 %v4203_v54  ;;  %v4482_v44 = vld [vmem:[%s7891_s3 + $0x270] sm:$0xf0]  ;;  %v4385_v54 = vld [vmem:[%s7891_s3 + $0x1e0] sm:$0xf]  ;;  %v5014_v48 = vld [vmem:[%s7891_s3 + $0x21c] sm:$0xf] }
 0x389   :  { %2381 = vmatpush.bf16.msra.mxu0 %v4318_v10  ;;  %2345 = vmatpush.bf16.msrb.mxu3 %v2301_v20  ;;  %v4485_v29 = vor.u32 %v5024_v3, %v4482_v44  ;;  %v4362_v10 = vor.u32 %v5003_v33, %v4361_v45  ;;  %v4442_v20 = vld [vmem:[%s7891_s3 + $0x220] sm:$0xf0]  ;;  %v4999_v45 = vld [vmem:[%s7891_s3 + $0x194] sm:$0xf0] }
 0x38a   :  { %v4445_v44 = vor.u32 %v5014_v48, %v4442_v20 }
 0x38c   :  { %2306 = vmatpush.bf16.msrb.mxu2 %v4370_v39 }
 0x38d   :  { %4288 = vmatmul.msk.bf16.gmra.mxu1 %vm1747_vm3, %v6805_v6  ;;  %2668 = vmatpush.bf16.msrb.mxu0 %v4485_v29  ;;  %v4345_v29 = vld [vmem:[%s7891_s3 + $0x190] sm:$0xf] }
 0x38e   :  { %2123 = vmatmul.bf16.gmra.mxu0 %v6809_v53  ;;  %v4346_v33 = vor.u32 %v4999_v45, %v4345_v29  ;;  %v4995_v29 = vld [vmem:[%s7891_s3 + $0x174] sm:$0xf0] }
 0x390   :  { %2307 = vmatpush.bf16.msrb.mxu2 %v4362_v10  ;;  %v5028_v10 = vld [vmem:[%s7891_s3 + $0x28c] sm:$0xf] }
 0x391   :  { %2669 = vmatpush.bf16.msrb.mxu0 %v4477_v42  ;;  %v4501_v5 = vor.u32 %v5028_v10, %v4498_v59  ;;  %v5012_v42 = vld [vmem:[%s7891_s3 + $0x20c] sm:$0xf] }
 0x392   :  { %v4437_v14 = vor.u32 %v5012_v42, %v4434_v22 }
 0x395   :  { %4196 = vmatmul.msk.bf16.gmra.mxu3 %vm1747_vm3, %v6486_v16  ;;  %2670 = vmatpush.bf16.msrb.mxu0 %v4469_v46 }
 0x396   :  { %1851 = vmatmul.bf16.gmra.mxu2 %v6492_v41 }
 0x398   :  { %v1818_v37 = vpop.f32.mrf.mxu3 }
 0x399   :  { %v1784_v17 = vpop.f32.mrf.mxu2 }
 0x39a   :  { %v6839_v9 = vadd.f32 %v1818_v37, %v1784_v17  ;;  %v4353_v37 = vld [vmem:[%s7891_s3 + $0x1a0] sm:$0xf]  ;;  %v4461_v17 = vor.u32 %v5018_v49, %v4458_v31  ;;  %v4490_v49 = vld [vmem:[%s7891_s3 + $0x280] sm:$0xf0] }
 0x39b   :  { %v4354_v19 = vor.u32 %v5001_v18, %v4353_v37  ;;  %v5010_v18 = vld [vmem:[%s7891_s3 + $0x1fc] sm:$0xf] }
 0x39c   :  { %2671 = vmatpush.bf16.msrb.mxu0 %v4461_v17 }
 0x39d   :  { %4289 = vmatmul.msk.bf16.gmra.mxu1 %vm1747_vm3, %v6843_v15  ;;  %2308 = vmatpush.bf16.msrb.mxu2 %v4354_v19 }
 0x39e   :  { %2128 = vmatmul.bf16.gmra.mxu0 %v6847_v63 }
 0x3a0   :  { %v6858_v34 = vpop.f32.mrf.mxu3  ;;  %2672 = vmatpush.bf16.msrb.mxu0 %v4453_v47  ;;  %v4337_v47 = vld [vmem:[%s7891_s3 + $0x180] sm:$0xf] }
 0x3a1   :  { %v6860_v35 = vpop.f32.mrf.mxu2  ;;  %2309 = vmatpush.bf16.msrb.mxu2 %v4346_v33 }
 0x3a4   :  { %2673 = vmatpush.bf16.msrb.mxu0 %v4445_v44  ;;  %v4329_v44 = vld [vmem:[%s7891_s3 + $0x170] sm:$0xf] }
 0x3a5   :  { %4197 = vmatmul.msk.bf16.gmra.mxu3 %vm1747_vm3, %v6518_v51  ;;  %v4330_v33 = vor.u32 %v4995_v29, %v4329_v44 }
 0x3a6   :  { %1856 = vmatmul.bf16.gmra.mxu2 %v6523_v62 }
 0x3a8   :  { %v1823_v38 = vpop.f32.mrf.mxu3  ;;  %2674 = vmatpush.bf16.msrb.mxu0 %v4437_v14 }
 0x3a9   :  { %v1789_v26 = vpop.f32.mrf.mxu2 }
 0x3aa   :  { %v6871_v25 = vadd.f32 %v1823_v38, %v1789_v26  ;;  %v5009_v38 = vld [vmem:[%s7891_s3 + $0x1e4] sm:$0xf0]  ;;  %v2548_v26 = vunpack.c.h.b16 %v6940_v30 }
 0x3ab   :  { %v4386_v1 = vor.u32 %v5009_v38, %v4385_v54  ;;  %v4997_v54 = vld [vmem:[%s7891_s3 + $0x184] sm:$0xf0] }
 0x3ac   :  { %v2570_v0 = vpack.c.b16 %v2548_v26, %v2548_v26  ;;  %v4338_v38 = vor.u32 %v4997_v54, %v4337_v47  ;;  %v5166_v26 = vpop.permute.xlu2 %5165 }
 0x3ad   :  { %4396 = vmatmul.msk.bf16.vlgmr.msra.gmra.mxu1 %vm1747_vm3, %v6445_v11  ;;  %2346 = vmatpush.bf16.msrb.mxu3 %v4386_v1  ;;  %v5167_v48 = vunpack.i.l.bf16 %v5166_v26 }
 0x3ae   :  { %2382 = vmatmul.bf16.vlgmr.msra.gmra.mxu0 %v6449_v28  ;;  %v2598_v3 = vsel %vm1763_vm1, %v2570_v0, 0  ;;  %2310 = vmatpush.bf16.msrb.mxu2 %v4338_v38  ;;  %v5168_v0 = vunpack.i.h.bf16 %v5166_v26  ;;  %v4313_v38 = vld [vmem:[%s7891_s3 + $0x150] sm:$0xf]  ;;  %v4991_v26 = vld [vmem:[%s7891_s3 + $0x154] sm:$0xf0] }
 0x3af   :  { %2707 = vmatpush.bf16.msrb.mxu1 %v2598_v3 }
 0x3b0   :  { %v6950_v2 = vpop.f32.mrf.mxu3  ;;  %v1520_v3 = vsel %vm1508_vm2, %v5167_v48, %v5168_v0  ;;  %v7024_v45 = vmax.f32 %v6453_v40, %v5168_v0  ;;  %v4377_v40 = vld [vmem:[%s7891_s3 + $0x1d0] sm:$0xf]  ;;  %v4314_v0 = vor.u32 %v4991_v26, %v4313_v38 }
 0x3b1   :  { %v6952_v39 = vpop.f32.mrf.mxu2  ;;  %v7027_v10 = vmax.f32 %v6451_v4, %v1520_v3  ;;  %v5007_v4 = vld [vmem:[%s7891_s3 + $0x1d4] sm:$0xf0] }
 0x3b2   :  { %2311 = vmatpush.bf16.msrb.mxu2 %v4330_v33 }
 0x3b3   :  { %2708 = vmatpush.bf16.msrb.mxu1 %v4501_v5  ;;  %v7033_v5 = vpack.c.bf16 %v7024_v45, %v6690_v21  ;;  %v7039_v22 = vpack.c.bf16 %v7027_v10, %v6703_v24  ;;  %v4378_v21 = vor.u32 %v5007_v4, %v4377_v40  ;;  %v4480_v40 = vld [vmem:[%s7891_s3 + $0x268] sm:$0xf]  ;;  %v5025_v4 = vld [vmem:[%s7891_s3 + $0x26c] sm:$0xf0] }
 0x3b5   :  { %4198 = vmatmul.msk.bf16.gmra.mxu3 %vm1747_vm3, %v6635_v50 }
 0x3b6   :  { %1861 = vmatmul.bf16.gmra.mxu2 %v6645_v57  ;;  %2347 = vmatpush.bf16.msrb.mxu3 %v4378_v21  ;;  %v2547_v21 = vunpack.c.l.b16 %v6940_v30  ;;  %v5044_v30 = vld [vmem:[%s7891_s3 + $0x314] sm:$0xf] }
 0x3bd   :  { %4397 = vmatmul.msk.bf16.gmra.mxu1 %vm1747_vm3, %v6484_v13 }
 0x3be   :  { %2387 = vmatmul.bf16.gmra.mxu0 %v6489_v56 }
 0x3c5   :  { %4199 = vmatmul.msk.bf16.gmra.mxu3 %vm1747_vm3, %v6707_v36 }
 0x3c6   :  { %1866 = vmatmul.bf16.gmra.mxu2 %v6717_v52 }
 0x3cd   :  { %4398 = vmatmul.msk.bf16.gmra.mxu1 %vm1747_vm3, %v6805_v6 }
 0x3ce   :  { %2392 = vmatmul.bf16.gmra.mxu0 %v6809_v53 }
 0x3d5   :  { %4280 = vmatmul.msk.bf16.vlgmr.msra.gmra.mxu3 %vm1747_vm3, %v6660_v43  ;;  %v5026_v43 = vld [vmem:[%s7891_s3 + $0x27c] sm:$0xf] }
 0x3d6   :  { %2040 = vmatmul.bf16.vlgmr.msra.gmra.mxu2 %v6663_v23  ;;  %v4493_v37 = vor.u32 %v5026_v43, %v4490_v49  ;;  %v4426_v23 = vld [vmem:[%s7891_s3 + $0x200] sm:$0xf0]  ;;  %v4321_v49 = vld [vmem:[%s7891_s3 + $0x160] sm:$0xf] }
 0x3d7   :  { %v4429_v32 = vor.u32 %v5010_v18, %v4426_v23 }
 0x3d8   :  { %v1828_v46 = vpop.f32.mrf.mxu3  ;;  %2709 = vmatpush.bf16.msrb.mxu1 %v4493_v37 }
 0x3d9   :  { %v1794_v31 = vpop.f32.mrf.mxu2  ;;  %2675 = vmatpush.bf16.msrb.mxu0 %v4429_v32 }
 0x3da   :  { %v6994_v17 = vadd.f32 %v1828_v46, %v1794_v31  ;;  %v6996_v19 = vpop.f32.mrf.mxu1  ;;  %v4993_v31 = vld [vmem:[%s7891_s3 + $0x164] sm:$0xf0] }
 0x3db   :  { %v6998_v61 = vpop.f32.mrf.mxu0  ;;  %v4322_v37 = vor.u32 %v4993_v31, %v4321_v49  ;;  %v4481_v49 = vor.u32 %v5025_v4, %v4480_v40 }
 0x3dd   :  { %4399 = vmatmul.msk.bf16.gmra.mxu1 %vm1747_vm3, %v6843_v15  ;;  %2312 = vmatpush.bf16.msrb.mxu2 %v4322_v37  ;;  %v2569_v37 = vpack.c.b16 %v2547_v21, %v2547_v21 }
 0x3de   :  { %2397 = vmatmul.bf16.gmra.mxu0 %v6847_v63 }
 0x3df   :  { %v2595_v26 = vsel %vm1763_vm1, %v2569_v37, 0 }
 0x3e0   :  { %v7050_v14 = vpop.f32.mrf.mxu3  ;;  %2639 = vmatpush.bf16.msra.mxu3 %v2595_v26 }
 0x3e1   :  { %v7052_v46 = vpop.f32.mrf.mxu2  ;;  %2313 = vmatpush.bf16.msrb.mxu2 %v4314_v0 }
 0x3e2   :  { %v7009_v1 = vpop.f32.mrf.mxu1 }
 0x3e3   :  { %v7011_v20 = vpop.f32.mrf.mxu0 }
 0x3e5   :  { %4281 = vmatmul.msk.bf16.gmra.mxu3 %vm1747_vm3, %v6445_v11  ;;  %2600 = vmatpush.bf16.msra.mxu2 %v4481_v49  ;;  %v5023_v49 = vld [vmem:[%s7891_s3 + $0x25c] sm:$0xf0] }
 0x3e6   :  { %2045 = vmatmul.bf16.gmra.mxu2 %v6449_v28 }
 0x3ea   :  { %v7029_v59 = vpop.f32.mrf.mxu1 }
 0x3eb   :  { %v7035_v42 = vpop.f32.mrf.mxu0 }
 0x3ed   :  { %4400 = vmatmul.msk.bf16.gmra.mxu1 %vm1747_vm3, %v7033_v5 }
 0x3ee   :  { %2402 = vmatmul.bf16.gmra.mxu0 %v7039_v22 }
 0x3f2   :  { %v7054_v24 = vpop.f32.mrf.mxu1 }
 0x3f3   :  { %v7056_v43 = vpop.f32.mrf.mxu0 }
 0x3f5   :  { %4282 = vmatmul.msk.bf16.gmra.mxu3 %vm1747_vm3, %v6484_v13 }
 0x3f6   :  { %2050 = vmatmul.bf16.gmra.mxu2 %v6489_v56 }
 0x3f8   :  { %v1833_v18 = vpop.f32.mrf.mxu3 }
 0x3f9   :  { %v1799_v23 = vpop.f32.mrf.mxu2 }
 0x3fa   :  { %v7067_v32 = vadd.f32 %v1833_v18, %v1799_v23  ;;  %v7069_v47 = vpop.f32.mrf.mxu1 }
 0x3fb   :  { %v7071_v54 = vpop.f32.mrf.mxu0 }
 0x3fc   :  { %8008 = vst [vmem:[#allocation8_spill] sm:$0xff] %v7067_v32  ;;  %v4553_v32 = vld [vmem:[%s7891_s3 + $0x2c8] sm:$0xf0] }
 0x3fd   :  { %4507 = vmatmul.msk.bf16.vlgmr.msrb.gmra.mxu1 %vm1747_vm3, %v6486_v16 }
 0x3fe   :  { %2676 = vmatmul.bf16.vlgmr.msrb.gmra.mxu0 %v6492_v41 }
 0x400   :  { %v1835_v48 = vpop.f32.mrf.mxu3 }
 0x401   :  { %v1801_v3 = vpop.f32.mrf.mxu2 }
 0x402   :  { %v7082_v44 = vadd.f32 %v1835_v48, %v1801_v3  ;;  %v7084_v29 = vpop.f32.mrf.mxu1  ;;  %v4593_v3 = vld [vmem:[%s7891_s3 + $0x318] sm:$0xf0] }
 0x403   :  { %v7086_v33 = vpop.f32.mrf.mxu0  ;;  %v4596_v4 = vor.u32 %v5044_v30, %v4593_v3 }
 0x404   :  { %8009 = vst [vmem:[#allocation9_spill] sm:$0xff] %v7082_v44 }
 0x405   :  { %4283 = vmatmul.msk.bf16.gmra.mxu3 %vm1747_vm3, %v6805_v6  ;;  %2962 = vmatpush.bf16.msra.mxu0 %v4596_v4  ;;  %v5040_v4 = vld [vmem:[%s7891_s3 + $0x2f4] sm:$0xf] }
 0x406   :  { %2055 = vmatmul.bf16.gmra.mxu2 %v6809_v53 }
 0x408   :  { %v1881_v31 = vpop.f32.mrf.mxu3 }
 0x409   :  { %v1847_v18 = vpop.f32.mrf.mxu2 }
 0x40a   :  { %v1882_v23 = vadd.f32 %v1881_v31, %v1847_v18  ;;  %v7098_v38 = vpop.f32.mrf.mxu1  ;;  %v5042_v18 = vld [vmem:[%s7891_s3 + $0x304] sm:$0xf] }
 0x40b   :  { %v7101_v0 = vpop.f32.mrf.mxu0 }
 0x40c   :  { %v2110_v48 = vadd.f32 %v6998_v61, %v1882_v23  ;;  %v4472_v61 = vld [vmem:[%s7891_s3 + $0x258] sm:$0xf] }
 0x40d   :  { %4508 = vmatmul.msk.bf16.gmra.mxu1 %vm1747_vm3, %v6518_v51  ;;  %v4473_v37 = vor.u32 %v5023_v49, %v4472_v61 }
 0x40e   :  { %2681 = vmatmul.bf16.gmra.mxu0 %v6523_v62  ;;  %v7114_v40 = vadd.f32 %v6996_v19, %v2110_v48  ;;  %v4585_v19 = vld [vmem:[%s7891_s3 + $0x308] sm:$0xf0] }
 0x40f   :  { %v4588_v48 = vor.u32 %v5042_v18, %v4585_v19  ;;  %2601 = vmatpush.bf16.msra.mxu2 %v4473_v37  ;;  %v5038_v37 = vld [vmem:[%s7891_s3 + $0x2e4] sm:$0xf]  ;;  %v4569_v18 = vld [vmem:[%s7891_s3 + $0x2e8] sm:$0xf0] }
 0x410   :  { %v1883_v21 = vpop.f32.mrf.mxu3 }
 0x411   :  { %v1849_v31 = vpop.f32.mrf.mxu2  ;;  %2963 = vmatpush.bf16.msra.mxu0 %v4588_v48  ;;  %v4572_v48 = vor.u32 %v5038_v37, %v4569_v18 }
 0x412   :  { %v1884_v23 = vadd.f32 %v1883_v21, %v1849_v31  ;;  %v7128_v26 = vpop.f32.mrf.mxu1  ;;  %v4577_v21 = vld [vmem:[%s7891_s3 + $0x2f8] sm:$0xf0] }
 0x413   :  { %v7130_v30 = vpop.f32.mrf.mxu0  ;;  %v4580_v49 = vor.u32 %v5040_v4, %v4577_v21  ;;  %v5021_v4 = vld [vmem:[%s7891_s3 + $0x24c] sm:$0xf0] }
 0x414   :  { %v2112_v3 = vadd.f32 %v7011_v20, %v1884_v23 }
 0x415   :  { %4284 = vmatmul.msk.bf16.gmra.mxu3 %vm1747_vm3, %v6843_v15  ;;  %2964 = vmatpush.bf16.msra.mxu0 %v4580_v49  ;;  %v5036_v49 = vld [vmem:[%s7891_s3 + $0x2d4] sm:$0xf] }
 0x416   :  { %2060 = vmatmul.bf16.gmra.mxu2 %v6847_v63  ;;  %v7143_v61 = vadd.f32 %v7009_v1, %v2112_v3  ;;  %v4464_v3 = vld [vmem:[%s7891_s3 + $0x248] sm:$0xf] }
 0x417   :  { %v4465_v21 = vor.u32 %v5021_v4, %v4464_v3  ;;  %v5034_v4 = vld [vmem:[%s7891_s3 + $0x2c4] sm:$0xf] }
 0x418   :  { %v1886_v31 = vpop.f32.mrf.mxu3 }
 0x419   :  { %v1852_v20 = vpop.f32.mrf.mxu2  ;;  %2965 = vmatpush.bf16.msra.mxu0 %v4572_v48  ;;  %2602 = vmatpush.bf16.msra.mxu2 %v4465_v21 }
 0x41a   :  { %v1887_v19 = vadd.f32 %v1886_v31, %v1852_v20  ;;  %v7151_v23 = vpop.f32.mrf.mxu1  ;;  %v7173_v31 = vld [vmem:[%s7891_s3 + $0x340] sm:$0x11] }
 0x41b   :  { %v7153_v44 = vpop.f32.mrf.mxu0  ;;  %v2842_v18 = vunpack.c.h.b16 %v7173_v31 }
 0x41c   :  { %v2115_v1 = vadd.f32 %v7035_v42, %v1887_v19  ;;  %v4561_v42 = vld [vmem:[%s7891_s3 + $0x2d8] sm:$0xf0] }
 0x41d   :  { %4509 = vmatmul.msk.bf16.gmra.mxu1 %vm1747_vm3, %v6635_v50  ;;  %v4564_v37 = vor.u32 %v5036_v49, %v4561_v42  ;;  %v2864_v48 = vpack.c.b16 %v2842_v18, %v2842_v18  ;;  %v4496_v42 = vld [vmem:[%s7891_s3 + $0x288] sm:$0xf]  ;;  %v5048_v18 = vld [vmem:[%s7891_s3 + $0x334] sm:$0xf] }
 0x41e   :  { %2686 = vmatmul.bf16.gmra.mxu0 %v6645_v57  ;;  %v7177_v20 = vadd.f32 %v7029_v59, %v2115_v1  ;;  %v4556_v1 = vor.u32 %v5034_v4, %v4553_v32 }
 0x41f   :  { %2966 = vmatpush.bf16.msra.mxu0 %v4564_v37  ;;  %v2892_v59 = vsel %vm1763_vm1, %v2864_v48, 0  ;;  %v5029_v37 = vld [vmem:[%s7891_s3 + $0x28c] sm:$0xf0] }
 0x420   :  { %v1888_v19 = vpop.f32.mrf.mxu3  ;;  %3001 = vmatpush.bf16.msra.mxu1 %v2892_v59  ;;  %v4497_v32 = vor.u32 %v5029_v37, %v4496_v42 }
 0x421   :  { %v1854_v3 = vpop.f32.mrf.mxu2 }
 0x422   :  { %v1889_v57 = vadd.f32 %v1888_v19, %v1854_v3  ;;  %v7186_v50 = vpop.f32.mrf.mxu1  ;;  %v4545_v19 = vld [vmem:[%s7891_s3 + $0x2b8] sm:$0xf0]  ;;  %v5019_v3 = vld [vmem:[%s7891_s3 + $0x23c] sm:$0xf0]  ;;  %2640 = vmatpush.bf16.msra.mxu3 %v4497_v32  ;;  %v4537_v32 = vld [vmem:[%s7891_s3 + $0x2a8] sm:$0xf0] }
 0x423   :  { %v7189_v49 = vpop.f32.mrf.mxu0  ;;  %2967 = vmatpush.bf16.msra.mxu0 %v4556_v1 }
 0x424   :  { %v2117_v21 = vadd.f32 %v7056_v43, %v1889_v57  ;;  %v4609_v57 = vld [vmem:[%s7891_s3 + $0x338] sm:$0xf0]  ;;  %v5032_v43 = vld [vmem:[%s7891_s3 + $0x2b4] sm:$0xf] }
 0x425   :  { %4391 = vmatmul.msk.bf16.vlgmr.msrb.gmra.mxu3 %vm1747_vm3, %v6445_v11  ;;  %v4456_v11 = vld [vmem:[%s7891_s3 + $0x238] sm:$0xf]  ;;  %v4612_v4 = vor.u32 %v5048_v18, %v4609_v57  ;;  %v4548_v59 = vor.u32 %v5032_v43, %v4545_v19  ;;  %v5030_v18 = vld [vmem:[%s7891_s3 + $0x2a4] sm:$0xf] }
 0x426   :  { %2314 = vmatmul.bf16.vlgmr.msrb.gmra.mxu2 %v6449_v28  ;;  %v7214_v48 = vadd.f32 %v7054_v24, %v2117_v21  ;;  %v4457_v1 = vor.u32 %v5019_v3, %v4456_v11  ;;  %v5046_v28 = vld [vmem:[%s7891_s3 + $0x324] sm:$0xf]  ;;  %v4601_v24 = vld [vmem:[%s7891_s3 + $0x328] sm:$0xf0]  ;;  %v4540_v19 = vor.u32 %v5030_v18, %v4537_v32 }
 0x427   :  { %3002 = vmatpush.bf16.msra.mxu1 %v4612_v4  ;;  %2968 = vmatpush.bf16.msra.mxu0 %v4548_v59  ;;  %v4604_v37 = vor.u32 %v5046_v28, %v4601_v24  ;;  %v5171_v59 = vpop.permute.xlu0 %5170 }
 0x428   :  { %v1891_v42 = vpop.f32.mrf.mxu3  ;;  %2603 = vmatpush.bf16.msra.mxu2 %v4457_v1  ;;  %v5172_v18 = vunpack.i.l.bf16 %v5171_v59 }
 0x429   :  { %v1857_v21 = vpop.f32.mrf.mxu2 }
 0x42a   :  { %v1892_v57 = vadd.f32 %v1891_v42, %v1857_v21  ;;  %v2417_v43 = vpop.f32.mrf.mxu1  ;;  %v4448_v42 = vld [vmem:[%s7891_s3 + $0x228] sm:$0xf] }
 0x42b   :  { %v2383_v11 = vpop.f32.mrf.mxu0  ;;  %3003 = vmatpush.bf16.msra.mxu1 %v4604_v37  ;;  %2969 = vmatpush.bf16.msra.mxu0 %v4540_v19  ;;  %v5173_v37 = vunpack.i.h.bf16 %v5171_v59 }
 0x42c   :  { %v2120_v3 = vadd.f32 %v7071_v54, %v1892_v57  ;;  %v2418_v4 = vadd.f32 %v2417_v43, %v2383_v11  ;;  %v5017_v54 = vld [vmem:[%s7891_s3 + $0x22c] sm:$0xf0] }
 0x42d   :  { %4510 = vmatmul.msk.bf16.gmra.mxu1 %vm1747_vm3, %v6707_v36  ;;  %v4449_v24 = vor.u32 %v5017_v54, %v4448_v42  ;;  %v1521_v11 = vsel %vm1508_vm2, %v5172_v18, %v5173_v37  ;;  %v7260_v59 = vmax.f32 %v6499_v27, %v5173_v37 }
 0x42e   :  { %v7238_v1 = vadd.f32 %v2418_v4, %v7114_v40  ;;  %2691 = vmatmul.bf16.gmra.mxu0 %v6717_v52  ;;  %v7242_v28 = vadd.f32 %v7069_v47, %v2120_v3  ;;  %v7263_v54 = vmax.f32 %v6497_v60, %v1521_v11 }
 0x42f   :  { %2604 = vmatpush.bf16.msra.mxu2 %v4449_v24  ;;  %v7273_v27 = vpack.c.bf16 %v7260_v59, %v7024_v45 }
 0x430   :  { %v1893_v21 = vpop.f32.mrf.mxu3 }
 0x431   :  { %v1859_v32 = vpop.f32.mrf.mxu2 }
 0x432   :  { %v1894_v40 = vadd.f32 %v1893_v21, %v1859_v32  ;;  %v2419_v57 = vpop.f32.mrf.mxu1 }
 0x433   :  { %v2385_v43 = vpop.f32.mrf.mxu0 }
 0x434   :  { %v2122_v47 = vadd.f32 %v7086_v33, %v1894_v40  ;;  %v2420_v19 = vadd.f32 %v2419_v57, %v2385_v43  ;;  %v4440_v33 = vld [vmem:[%s7891_s3 + $0x218] sm:$0xf]  ;;  %v7278_v40 = vpack.c.bf16 %v7263_v54, %v7027_v10 }
 0x435   :  { %4392 = vmatmul.msk.bf16.gmra.mxu3 %vm1747_vm3, %v6484_v13  ;;  %v4488_v43 = vld [vmem:[%s7891_s3 + $0x278] sm:$0xf] }
 0x436   :  { %v7255_v3 = vadd.f32 %v2420_v19, %v7143_v61  ;;  %2319 = vmatmul.bf16.gmra.mxu2 %v6489_v56  ;;  %v2156_v4 = vadd.f32 %v7084_v29, %v2122_v47  ;;  %v5015_v61 = vld [vmem:[%s7891_s3 + $0x21c] sm:$0xf0] }
 0x437   :  { %v4441_v21 = vor.u32 %v5015_v61, %v4440_v33 }
 0x438   :  { %v1896_v42 = vpop.f32.mrf.mxu3 }
 0x439   :  { %v1862_v24 = vpop.f32.mrf.mxu2  ;;  %2605 = vmatpush.bf16.msra.mxu2 %v4441_v21 }
 0x43a   :  { %v1897_v18 = vadd.f32 %v1896_v42, %v1862_v24  ;;  %v2422_v32 = vpop.f32.mrf.mxu1  ;;  %v5013_v24 = vld [vmem:[%s7891_s3 + $0x20c] sm:$0xf0] }
 0x43b   :  { %v2388_v29 = vpop.f32.mrf.mxu0 }
 0x43c   :  { %v2125_v60 = vadd.f32 %v7101_v0, %v1897_v18  ;;  %v2423_v37 = vadd.f32 %v2422_v32, %v2388_v29  ;;  %v5027_v0 = vld [vmem:[%s7891_s3 + $0x27c] sm:$0xf0] }
 0x43d   :  { %4511 = vmatmul.msk.bf16.gmra.mxu1 %vm1747_vm3, %v7273_v27  ;;  %v4489_v10 = vor.u32 %v5027_v0, %v4488_v43 }
 0x43e   :  { %v7283_v57 = vadd.f32 %v2423_v37, %v7177_v20  ;;  %2696 = vmatmul.bf16.gmra.mxu0 %v7278_v40  ;;  %v2159_v45 = vadd.f32 %v7098_v38, %v2125_v60  ;;  %v4432_v38 = vld [vmem:[%s7891_s3 + $0x208] sm:$0xf] }
 0x43f   :  { %2641 = vmatpush.bf16.msra.mxu3 %v4489_v10  ;;  %v4433_v21 = vor.u32 %v5013_v24, %v4432_v38 }
 0x440   :  { %v1898_v47 = vpop.f32.mrf.mxu3 }
 0x441   :  { %v1864_v19 = vpop.f32.mrf.mxu2  ;;  %2606 = vmatpush.bf16.msra.mxu2 %v4433_v21  ;;  %v4591_v21 = vld [vmem:[%s7891_s3 + $0x310] sm:$0xf] }
 0x442   :  { %v1899_v11 = vadd.f32 %v1898_v47, %v1864_v19  ;;  %v2424_v42 = vpop.f32.mrf.mxu1  ;;  %v4424_v47 = vld [vmem:[%s7891_s3 + $0x1f8] sm:$0xf]  ;;  %v5011_v19 = vld [vmem:[%s7891_s3 + $0x1fc] sm:$0xf0] }
 0x443   :  { %v2390_v20 = vpop.f32.mrf.mxu0 }
 0x444   :  { %v2127_v33 = vadd.f32 %v7130_v30, %v1899_v11  ;;  %v2425_v61 = vadd.f32 %v2424_v42, %v2390_v20 }
 0x445   :  { %4393 = vmatmul.msk.bf16.gmra.mxu3 %vm1747_vm3, %v6805_v6 }
 0x446   :  { %v7303_v18 = vadd.f32 %v2425_v61, %v7214_v48  ;;  %2324 = vmatmul.bf16.gmra.mxu2 %v6809_v53  ;;  %v7307_v30 = vadd.f32 %v7128_v26, %v2127_v33 }
 0x448   :  { %v1901_v32 = vpop.f32.mrf.mxu3 }
 0x449   :  { %v1867_v29 = vpop.f32.mrf.mxu2 }
 0x44a   :  { %v1902_v60 = vadd.f32 %v1901_v32, %v1867_v29  ;;  %v2427_v37 = vpop.f32.mrf.mxu1  ;;  %v5045_v32 = vld [vmem:[%s7891_s3 + $0x314] sm:$0xf0] }
 0x44b   :  { %v2393_v43 = vpop.f32.mrf.mxu0  ;;  %v4592_v29 = vor.u32 %v5045_v32, %v4591_v21 }
 0x44c   :  { %v2130_v0 = vadd.f32 %v7153_v44, %v1902_v60  ;;  %v2428_v10 = vadd.f32 %v2427_v37, %v2393_v43  ;;  %v4425_v44 = vor.u32 %v5011_v19, %v4424_v47 }
 0x44d   :  { %4618 = vmatmul.msk.bf16.vlgmr.msra.gmra.mxu1 %vm1747_vm3, %v6484_v13 }
 0x44e   :  { %v7313_v48 = vadd.f32 %v2428_v10, %v7242_v28  ;;  %2970 = vmatmul.bf16.vlgmr.msra.gmra.mxu0 %v6489_v56  ;;  %v2164_v26 = vadd.f32 %v7151_v23, %v2130_v0  ;;  %2607 = vmatpush.bf16.msra.mxu2 %v4425_v44 }
 0x450   :  { %v1903_v11 = vpop.f32.mrf.mxu3 }
 0x451   :  { %v1869_v42 = vpop.f32.mrf.mxu2 }
 0x452   :  { %v1904_v20 = vadd.f32 %v1903_v11, %v1869_v42  ;;  %v2429_v33 = vpop.f32.mrf.mxu1  ;;  %2894 = vmatpush.bf16.msrb.mxu2 %v4592_v29  ;;  %v5043_v42 = vld [vmem:[%s7891_s3 + $0x304] sm:$0xf0] }
 0x453   :  { %v2395_v28 = vpop.f32.mrf.mxu0 }
 0x454   :  { %v2132_v61 = vadd.f32 %v7189_v49, %v1904_v20  ;;  %v2430_v38 = vadd.f32 %v2429_v33, %v2395_v28  ;;  %v2841_v49 = vunpack.c.l.b16 %v7173_v31  ;;  %v1816_v31 = vadd.f32 %v6820_v7, %v6822_v12 }
 0x455   :  { %4394 = vmatmul.msk.bf16.gmra.mxu3 %vm1747_vm3, %v6843_v15 }
 0x456   :  { %v7326_v23 = vadd.f32 %v2430_v38, %v2156_v4  ;;  %2329 = vmatmul.bf16.gmra.mxu2 %v6847_v63  ;;  %v7330_v24 = vadd.f32 %v7186_v50, %v2132_v61  ;;  %v2863_v37 = vpack.c.b16 %v2841_v49, %v2841_v49 }
 0x458   :  { %v2075_v60 = vpop.f32.mrf.mxu3  ;;  %v2889_v50 = vsel %vm1763_vm1, %v2863_v37, 0  ;;  %v4575_v37 = vld [vmem:[%s7891_s3 + $0x2f0] sm:$0xf] }
 0x459   :  { %v2041_v4 = vpop.f32.mrf.mxu2  ;;  %2933 = vmatpush.bf16.msrb.mxu3 %v2889_v50 }
 0x45a   :  { %v2042_v43 = vadd.f32 %v2041_v4, %v6734_v58  ;;  %v2432_v0 = vpop.f32.mrf.mxu1  ;;  %v4583_v58 = vld [vmem:[%s7891_s3 + $0x300] sm:$0xf]  ;;  %v5041_v4 = vld [vmem:[%s7891_s3 + $0x2f4] sm:$0xf0] }
 0x45b   :  { %v2398_v10 = vpop.f32.mrf.mxu0  ;;  %v4584_v33 = vor.u32 %v5043_v42, %v4583_v58  ;;  %v5049_v42 = vld [vmem:[%s7891_s3 + $0x334] sm:$0xf0] }
 0x45c   :  { %v7341_v47 = vadd.f32 %v2075_v60, %v2042_v43  ;;  %v2433_v19 = vadd.f32 %v2432_v0, %v2398_v10  ;;  %v4576_v43 = vor.u32 %v5041_v4, %v4575_v37  ;;  %v4559_v37 = vld [vmem:[%s7891_s3 + $0x2d0] sm:$0xf] }
 0x45d   :  { %4619 = vmatmul.msk.bf16.gmra.mxu1 %vm1747_vm3, %v6805_v6  ;;  %2895 = vmatpush.bf16.msrb.mxu2 %v4584_v33 }
 0x45e   :  { %v7345_v44 = vadd.f32 %v2433_v19, %v2159_v45  ;;  %2975 = vmatmul.bf16.gmra.mxu0 %v6809_v53 }
 0x460   :  { %v2077_v11 = vpop.f32.mrf.mxu3 }
 0x461   :  { %v2043_v20 = vpop.f32.mrf.mxu2  ;;  %2896 = vmatpush.bf16.msrb.mxu2 %v4576_v43  ;;  %v1826_v43 = vadd.f32 %v6950_v2, %v6952_v39 }
 0x462   :  { %v2044_v28 = vadd.f32 %v2043_v20, %v1816_v31  ;;  %v7356_v61 = vpop.f32.mrf.mxu1  ;;  %v5039_v20 = vld [vmem:[%s7891_s3 + $0x2e4] sm:$0xf0] }
 0x463   :  { %v7358_v45 = vpop.f32.mrf.mxu0 }
 0x464   :  { %v7360_v38 = vadd.f32 %v2077_v11, %v2044_v28 }
 0x465   :  { %4395 = vmatmul.msk.bf16.gmra.mxu3 %vm1747_vm3, %v7033_v5 }
 0x466   :  { %2334 = vmatmul.bf16.gmra.mxu2 %v7039_v22 }
 0x468   :  { %v2080_v7 = vpop.f32.mrf.mxu3 }
 0x469   :  { %v2046_v12 = vpop.f32.mrf.mxu2 }
 0x46a   :  { %v2047_v21 = vadd.f32 %v2046_v12, %v6839_v9  ;;  %v2437_v32 = vpop.f32.mrf.mxu1  ;;  %v1821_v9 = vadd.f32 %v6858_v34, %v6860_v35  ;;  %v4567_v35 = vld [vmem:[%s7891_s3 + $0x2e0] sm:$0xf] }
 0x46b   :  { %v2403_v49 = vpop.f32.mrf.mxu0  ;;  %v4568_v33 = vor.u32 %v5039_v20, %v4567_v35 }
 0x46c   :  { %v7366_v29 = vadd.f32 %v2080_v7, %v2047_v21  ;;  %v2438_v60 = vadd.f32 %v2437_v32, %v2403_v49  ;;  %v5176_v49 = vpop.permute.xlu1 %5175 }
 0x46d   :  { %4620 = vmatmul.msk.bf16.gmra.mxu1 %vm1747_vm3, %v6843_v15  ;;  %2897 = vmatpush.bf16.msrb.mxu2 %v4568_v33 }
 0x46e   :  { %v7376_v0 = vadd.f32 %v2438_v60, %v2164_v26  ;;  %2980 = vmatmul.bf16.gmra.mxu0 %v6847_v63  ;;  %v4607_v26 = vld [vmem:[%s7891_s3 + $0x330] sm:$0xf] }
 0x46f   :  { %v4608_v34 = vor.u32 %v5049_v42, %v4607_v26 }
 0x470   :  { %v2082_v50 = vpop.f32.mrf.mxu3 }
 0x471   :  { %v2048_v10 = vpop.f32.mrf.mxu2  ;;  %2934 = vmatpush.bf16.msrb.mxu3 %v4608_v34 }
 0x472   :  { %v2049_v19 = vadd.f32 %v2048_v10, %v1821_v9  ;;  %v7381_v31 = vpop.f32.mrf.mxu1  ;;  %v5177_v10 = vunpack.i.l.bf16 %v5176_v49 }
 0x473   :  { %v7383_v11 = vpop.f32.mrf.mxu0 }
 0x474   :  { %v7385_v58 = vadd.f32 %v2082_v50, %v2049_v19  ;;  %v5178_v50 = vunpack.i.h.bf16 %v5176_v49 }
 0x475   :  { %4502 = vmatmul.msk.bf16.vlgmr.msra.gmra.mxu3 %vm1747_vm3, %v6486_v16 }
 0x476   :  { %2608 = vmatmul.bf16.vlgmr.msra.gmra.mxu2 %v6492_v41  ;;  %v1522_v20 = vsel %vm1508_vm2, %v5177_v10, %v5178_v50  ;;  %v1578_v2 = vmax.f32 %v6536_v8, %v5178_v50 }
 0x478   :  { %v2085_v28 = vpop.f32.mrf.mxu3 }
 0x479   :  { %v2051_v7 = vpop.f32.mrf.mxu2 }
 0x47a   :  { %v2052_v12 = vadd.f32 %v2051_v7, %v6871_v25  ;;  %v2711_v21 = vpop.f32.mrf.mxu1  ;;  %v5037_v25 = vld [vmem:[%s7891_s3 + $0x2d4] sm:$0xf0]  ;;  %v4551_v7 = vld [vmem:[%s7891_s3 + $0x2c0] sm:$0xf] }
 0x47b   :  { %v2677_v16 = vpop.f32.mrf.mxu0  ;;  %v4560_v4 = vor.u32 %v5037_v25, %v4559_v37 }
 0x47c   :  { %v7403_v32 = vadd.f32 %v2085_v28, %v2052_v12  ;;  %v2712_v41 = vadd.f32 %v2711_v21, %v2677_v16  ;;  %v1577_v28 = vmax.f32 %v6534_v55, %v1522_v20  ;;  %v5035_v12 = vld [vmem:[%s7891_s3 + $0x2c4] sm:$0xf0] }
 0x47d   :  { %4621 = vmatmul.msk.bf16.gmra.mxu1 %vm1747_vm3, %v7033_v5  ;;  %2898 = vmatpush.bf16.msrb.mxu2 %v4560_v4 }
 0x47e   :  { %v7408_v60 = vadd.f32 %v2712_v41, %v7238_v1  ;;  %2985 = vmatmul.bf16.gmra.mxu0 %v7039_v22  ;;  %v7443_v49 = vpack.c.bf16 %v1577_v28, %v7263_v54  ;;  %v1831_v54 = vadd.f32 %v7050_v14, %v7052_v46 }
 0x480   :  { %v2087_v9 = vpop.f32.mrf.mxu3 }
 0x481   :  { %v2053_v19 = vpop.f32.mrf.mxu2 }
 0x482   :  { %v2054_v1 = vadd.f32 %v2053_v19, %v1826_v43  ;;  %v2713_v26 = vpop.f32.mrf.mxu1 }
 0x483   :  { %v2679_v42 = vpop.f32.mrf.mxu0 }
 0x484   :  { %v7419_v34 = vadd.f32 %v2087_v9, %v2054_v1  ;;  %v2714_v35 = vadd.f32 %v2713_v26, %v2679_v42  ;;  %v4543_v1 = vld [vmem:[%s7891_s3 + $0x2b0] sm:$0xf]  ;;  %v5033_v26 = vld [vmem:[%s7891_s3 + $0x2b4] sm:$0xf0] }
 0x485   :  { %4503 = vmatmul.msk.bf16.gmra.mxu3 %vm1747_vm3, %v6518_v51  ;;  %v4552_v51 = vor.u32 %v5035_v12, %v4551_v7  ;;  %v8010_v42 = vld [vmem:[#allocation24_spill] sm:$0xff]  ;;  %v4544_v14 = vor.u32 %v5033_v26, %v4543_v1 }
 0x486   :  { %v7425_v33 = vadd.f32 %v2714_v35, %v7255_v3  ;;  %2613 = vmatmul.bf16.gmra.mxu2 %v6523_v62  ;;  %v7438_v62 = vpack.c.bf16 %v1578_v2, %v7260_v59  ;;  %v5047_v59 = vld [vmem:[%s7891_s3 + $0x324] sm:$0xf0]  ;;  %v8011_v35 = vld [vmem:[#allocation2_spill] sm:$0xff] }
 0x487   :  { %2899 = vmatpush.bf16.msrb.mxu2 %v4552_v51 }
 0x488   :  { %v2090_v39 = vpop.f32.mrf.mxu3 }
 0x489   :  { %v2056_v21 = vpop.f32.mrf.mxu2 }
 0x48a   :  { %v2057_v3 = vadd.f32 %v2056_v21, %v6994_v17  ;;  %v2716_v16 = vpop.f32.mrf.mxu1  ;;  %v4599_v17 = vld [vmem:[%s7891_s3 + $0x320] sm:$0xf] }
 0x48b   :  { %v2682_v8 = vpop.f32.mrf.mxu0  ;;  %v4600_v25 = vor.u32 %v5047_v59, %v4599_v17  ;;  %2900 = vmatpush.bf16.msrb.mxu2 %v4544_v14  ;;  %v8013_v59 = vld [vmem:[#allocation9_spill] sm:$0xff] }
 0x48c   :  { %v7440_v41 = vadd.f32 %v2090_v39, %v2057_v3  ;;  %v2717_v55 = vadd.f32 %v2716_v16, %v2682_v8  ;;  %v8012_v39 = vld [vmem:[#allocation8_spill] sm:$0xff]  ;;  %v5031_v16 = vld [vmem:[%s7891_s3 + $0x2a4] sm:$0xf0] }
 0x48d   :  { %4622 = vmatmul.msk.bf16.gmra.mxu1 %vm1747_vm3, %v7438_v62  ;;  %2935 = vmatpush.bf16.msrb.mxu3 %v4600_v25 }
 0x48e   :  { %v7448_v37 = vadd.f32 %v2717_v55, %v7283_v57  ;;  %2990 = vmatmul.bf16.gmra.mxu0 %v7443_v49 }
 0x490   :  { %v2092_v4 = vpop.f32.mrf.mxu3 }
 0x491   :  { %v2058_v43 = vpop.f32.mrf.mxu2 }
 0x492   :  { %v2059_v9 = vadd.f32 %v2058_v43, %v1831_v54  ;;  %v2718_v57 = vpop.f32.mrf.mxu1 }
 0x493   :  { %v2684_v50 = vpop.f32.mrf.mxu0 }
 0x494   :  { %v7459_v10 = vadd.f32 %v2092_v4, %v2059_v9  ;;  %v2719_v19 = vadd.f32 %v2718_v57, %v2684_v50 }
 0x495   :  { %4504 = vmatmul.msk.bf16.gmra.mxu3 %vm1747_vm3, %v8010_v42 }
 0x496   :  { %v7470_v46 = vadd.f32 %v2719_v19, %v7303_v18  ;;  %2618 = vmatmul.bf16.gmra.mxu2 %v8011_v35  ;;  %v4535_v18 = vld [vmem:[%s7891_s3 + $0x2a0] sm:$0xf] }
 0x497   :  { %v4536_v8 = vor.u32 %v5031_v16, %v4535_v18 }
 0x498   :  { %v2095_v20 = vpop.f32.mrf.mxu3 }
 0x499   :  { %v2061_v2 = vpop.f32.mrf.mxu2  ;;  %2901 = vmatpush.bf16.msrb.mxu2 %v4536_v8  ;;  %v2440_v8 = vadd.f32 %v7381_v31, %v7383_v11 }
 0x49a   :  { %v2062_v28 = vadd.f32 %v2061_v2, %v8012_v39  ;;  %v2721_v7 = vpop.f32.mrf.mxu1 }
 0x49b   :  { %v2687_v12 = vpop.f32.mrf.mxu0 }
 0x49c   :  { %v7474_v21 = vadd.f32 %v2095_v20, %v2062_v28  ;;  %v2722_v51 = vadd.f32 %v2721_v7, %v2687_v12 }
 0x49e   :  { %v7477_v3 = vadd.f32 %v2722_v51, %v7313_v48 }
 0x4a0   :  { %v2097_v55 = vpop.f32.mrf.mxu3 }
 0x4a1   :  { %v2063_v17 = vpop.f32.mrf.mxu2 }
 0x4a2   :  { %v2064_v25 = vadd.f32 %v2063_v17, %v8013_v59  ;;  %v2723_v54 = vpop.f32.mrf.mxu1 }
 0x4a3   :  { %v2689_v4 = vpop.f32.mrf.mxu0 }
 0x4a4   :  { %v7486_v43 = vadd.f32 %v2097_v55, %v2064_v25  ;;  %v2724_v48 = vadd.f32 %v2723_v54, %v2689_v4  ;;  %v2461_v25 = vadd.f32 %v2440_v8, %v7330_v24 }
 0x4a5   :  { %4505 = vmatmul.msk.bf16.gmra.mxu3 %vm1747_vm3, %v6707_v36  ;;  %v2435_v36 = vadd.f32 %v7356_v61, %v7358_v45 }
 0x4a6   :  { %v7491_v9 = vadd.f32 %v2724_v48, %v7326_v23  ;;  %2623 = vmatmul.bf16.gmra.mxu2 %v6717_v52 }
 0x4a7   :  { %v2457_v28 = vadd.f32 %v2435_v36, %v7307_v30 }
 0x4a8   :  { %v2349_v57 = vpop.f32.mrf.mxu3 }
 0x4a9   :  { %v2315_v50 = vpop.f32.mrf.mxu2 }
 0x4aa   :  { %v2350_v19 = vadd.f32 %v2349_v57, %v2315_v50  ;;  %v2726_v1 = vpop.f32.mrf.mxu1 }
 0x4ab   :  { %v2692_v26 = vpop.f32.mrf.mxu0 }
 0x4ac   :  { %v7495_v42 = vadd.f32 %v2350_v19, %v7341_v47  ;;  %v2727_v14 = vadd.f32 %v2726_v1, %v2692_v26 }
 0x4ae   :  { %v7498_v35 = vadd.f32 %v2727_v14, %v7345_v44 }
 0x4b0   :  { %v2351_v20 = vpop.f32.mrf.mxu3 }
 0x4b1   :  { %v2317_v23 = vpop.f32.mrf.mxu2 }
 0x4b2   :  { %v2352_v2 = vadd.f32 %v2351_v20, %v2317_v23  ;;  %v2728_v39 = vpop.f32.mrf.mxu1 }
 0x4b3   :  { %v2694_v52 = vpop.f32.mrf.mxu0 }
 0x4b4   :  { %v7504_v7 = vadd.f32 %v2352_v2, %v7360_v38  ;;  %v2729_v12 = vadd.f32 %v2728_v39, %v2694_v52 }
 0x4b5   :  { %4506 = vmatmul.msk.bf16.gmra.mxu3 %vm1747_vm3, %v7273_v27 }
 0x4b6   :  { %v7508_v47 = vadd.f32 %v2729_v12, %v2457_v28  ;;  %2628 = vmatmul.bf16.gmra.mxu2 %v7278_v40 }
 0x4b8   :  { %v2354_v44 = vpop.f32.mrf.mxu3 }
 0x4b9   :  { %v2320_v61 = vpop.f32.mrf.mxu2 }
 0x4ba   :  { %v2355_v45 = vadd.f32 %v2354_v44, %v2320_v61  ;;  %v2731_v51 = vpop.f32.mrf.mxu1 }
 0x4bb   :  { %v2697_v18 = vpop.f32.mrf.mxu0 }
 0x4bc   :  { %v7512_v16 = vadd.f32 %v2355_v45, %v7366_v29  ;;  %v2732_v30 = vadd.f32 %v2731_v51, %v2697_v18 }
 0x4be   :  { %v7515_v38 = vadd.f32 %v2732_v30, %v7376_v0 }
 0x4c0   :  { %v2356_v27 = vpop.f32.mrf.mxu3 }
 0x4c1   :  { %v2322_v55 = vpop.f32.mrf.mxu2 }
 0x4c2   :  { %v2357_v17 = vadd.f32 %v2356_v27, %v2322_v55  ;;  %v2733_v59 = vpop.f32.mrf.mxu1 }
 0x4c3   :  { %v2699_v40 = vpop.f32.mrf.mxu0 }
 0x4c4   :  { %v7521_v54 = vadd.f32 %v2357_v17, %v7385_v58  ;;  %v2734_v4 = vadd.f32 %v2733_v59, %v2699_v40  ;;  %v7534_v58 = vld [vmem:[%s7893_s4] sm:$0x3]  ;;  %s5208_s4 = smov 112  }
 0x4c5   :  { %4613 = vmatmul.msk.bf16.vlgmr.msrb.gmra.mxu3 %vm1747_vm3, %v6484_v13 }
 0x4c6   :  { %v7525_v29 = vadd.f32 %v2734_v4, %v2461_v25  ;;  %2902 = vmatmul.bf16.vlgmr.msrb.gmra.mxu2 %v6489_v56  ;;  %v7538_v56 = vperm.slane %v7534_v58, 1 }
 0x4c8   :  { %v2359_v0 = vpop.f32.mrf.mxu3 }
 0x4c9   :  { %v2325_v31 = vpop.f32.mrf.mxu2 }
 0x4ca   :  { %v2360_v11 = vadd.f32 %v2359_v0, %v2325_v31  ;;  %v3005_v48 = vpop.f32.mrf.mxu1 }
 0x4cb   :  { %v2971_v57 = vpop.f32.mrf.mxu0 }
 0x4cc   :  { %v7529_v50 = vadd.f32 %v2360_v11, %v7403_v32  ;;  %v3006_v24 = vadd.f32 %v3005_v48, %v2971_v57 }
 0x4ce   :  { %v3031_v1 = vadd.f32 %v3006_v24, %v7408_v60 }
 0x4d0   :  { %v2361_v19 = vpop.f32.mrf.mxu3  ;;  %v3057_v23 = vadd.f32 %v7538_v56, %v3031_v1 }
 0x4d1   :  { %v2327_v13 = vpop.f32.mrf.mxu2 }
 0x4d2   :  { %v2362_v26 = vadd.f32 %v2361_v19, %v2327_v13  ;;  %v3007_v14 = vpop.f32.mrf.mxu1  ;;  %v3077_v28 = vmax.f32 %v3057_v23, 0.0 }
 0x4d3   :  { %v2973_v36 = vpop.f32.mrf.mxu0 }
 0x4d4   :  { %v7541_v20 = vadd.f32 %v2362_v26, %v7419_v34  ;;  %v3008_v32 = vadd.f32 %v3007_v14, %v2973_v36 }
 0x4d5   :  { %4614 = vmatmul.msk.bf16.gmra.mxu3 %vm1747_vm3, %v6805_v6 }
 0x4d6   :  { %v3033_v2 = vadd.f32 %v3008_v32, %v7425_v33  ;;  %2907 = vmatmul.bf16.gmra.mxu2 %v6809_v53 }
 0x4d8   :  { %v3059_v60 = vadd.f32 %v7538_v56, %v3033_v2  ;;  %v2364_v39 = vpop.f32.mrf.mxu3 }
 0x4d9   :  { %v2330_v52 = vpop.f32.mrf.mxu2 }
 0x4da   :  { %v3079_v12 = vmax.f32 %v3059_v60, 0.0  ;;  %v2365_v44 = vadd.f32 %v2364_v39, %v2330_v52  ;;  %v3010_v61 = vpop.f32.mrf.mxu1 }
 0x4db   :  { %v2976_v34 = vpop.f32.mrf.mxu0 }
 0x4dc   :  { %v7550_v45 = vadd.f32 %v2365_v44, %v7440_v41  ;;  %v7552_v51 = vmax.f32 %v3077_v28, %v3079_v12  ;;  %v3011_v6 = vadd.f32 %v3010_v61, %v2976_v34 }
 0x4de   :  { %v3035_v53 = vadd.f32 %v3011_v6, %v7448_v37 }
 0x4e0   :  { %v7554_v18 = vpop.f32.mrf.mxu3  ;;  %v3061_v55 = vadd.f32 %v7538_v56, %v3035_v53 }
 0x4e1   :  { %v7556_v33 = vpop.f32.mrf.mxu2 }
 0x4e2   :  { %v3012_v30 = vpop.f32.mrf.mxu1  ;;  %v3081_v25 = vmax.f32 %v3061_v55, 0.0 }
 0x4e3   :  { %v2978_v8 = vpop.f32.mrf.mxu0 }
 0x4e4   :  { %v3013_v27 = vadd.f32 %v3012_v30, %v2978_v8 }
 0x4e5   :  { %4615 = vmatmul.msk.bf16.gmra.mxu3 %vm1747_vm3, %v6843_v15 }
 0x4e6   :  { %v3037_v41 = vadd.f32 %v3013_v27, %v7470_v46  ;;  %2912 = vmatmul.bf16.gmra.mxu2 %v6847_v63 }
 0x4e8   :  { %v3063_v17 = vadd.f32 %v7538_v56, %v3037_v41  ;;  %v2369_v59 = vpop.f32.mrf.mxu3 }
 0x4e9   :  { %v2335_v40 = vpop.f32.mrf.mxu2 }
 0x4ea   :  { %v3083_v4 = vmax.f32 %v3063_v17, 0.0  ;;  %v2370_v0 = vadd.f32 %v2369_v59, %v2335_v40  ;;  %v3015_v37 = vpop.f32.mrf.mxu1 }
 0x4eb   :  { %v2981_v31 = vpop.f32.mrf.mxu0 }
 0x4ec   :  { %v7566_v11 = vadd.f32 %v2370_v0, %v7474_v21  ;;  %v7568_v48 = vmax.f32 %v3081_v25, %v3083_v4  ;;  %v3016_v15 = vadd.f32 %v3015_v37, %v2981_v31 }
 0x4ee   :  { %v3039_v63 = vadd.f32 %v3016_v15, %v7477_v3 }
 0x4f0   :  { %v7570_v57 = vpop.f32.mrf.mxu3  ;;  %v3065_v1 = vadd.f32 %v7538_v56, %v3039_v63 }
 0x4f1   :  { %v7572_v46 = vpop.f32.mrf.mxu2 }
 0x4f2   :  { %v3017_v24 = vpop.f32.mrf.mxu1  ;;  %v3085_v32 = vmax.f32 %v3065_v1, 0.0 }
 0x4f3   :  { %v2983_v19 = vpop.f32.mrf.mxu0 }
 0x4f4   :  { %v3018_v13 = vadd.f32 %v3017_v24, %v2983_v19 }
 0x4f5   :  { %4616 = vmatmul.msk.bf16.gmra.mxu3 %vm1747_vm3, %v7033_v5 }
 0x4f6   :  { %v3041_v21 = vadd.f32 %v3018_v13, %v7491_v9  ;;  %2917 = vmatmul.bf16.gmra.mxu2 %v7039_v22 }
 0x4f8   :  { %v3067_v26 = vadd.f32 %v7538_v56, %v3041_v21  ;;  %v2643_v14 = vpop.f32.mrf.mxu3 }
 0x4f9   :  { %v2609_v36 = vpop.f32.mrf.mxu2 }
 0x4fa   :  { %v3087_v23 = vmax.f32 %v3067_v26, 0.0  ;;  %v2644_v2 = vadd.f32 %v2643_v14, %v2609_v36  ;;  %v3020_v3 = vpop.f32.mrf.mxu1 }
 0x4fb   :  { %v2986_v60 = vpop.f32.mrf.mxu0 }
 0x4fc   :  { %v7582_v39 = vadd.f32 %v2644_v2, %v7495_v42  ;;  %v7584_v52 = vmax.f32 %v3085_v32, %v3087_v23  ;;  %v3021_v5 = vadd.f32 %v3020_v3, %v2986_v60  ;;  %v2367_v2 = vadd.f32 %v7554_v18, %v7556_v33 }
 0x4fe   :  { %v3043_v22 = vadd.f32 %v3021_v5, %v7498_v35  ;;  %v2456_v60 = vadd.f32 %v2367_v2, %v7459_v10 }
 0x500   :  { %v7586_v28 = vpop.f32.mrf.mxu3  ;;  %v3069_v34 = vadd.f32 %v7538_v56, %v3043_v22 }
 0x501   :  { %v7588_v9 = vpop.f32.mrf.mxu2 }
 0x502   :  { %v3022_v12 = vpop.f32.mrf.mxu1  ;;  %v3089_v8 = vmax.f32 %v3069_v34, 0.0 }
 0x503   :  { %v2988_v44 = vpop.f32.mrf.mxu0 }
 0x504   :  { %v3023_v61 = vadd.f32 %v3022_v12, %v2988_v44 }
 0x505   :  { %4617 = vmatmul.msk.bf16.gmra.mxu3 %vm1747_vm3, %v7438_v62 }
 0x506   :  { %v3045_v42 = vadd.f32 %v3023_v61, %v7508_v47  ;;  %2922 = vmatmul.bf16.gmra.mxu2 %v7443_v49 }
 0x508   :  { %v3071_v6 = vadd.f32 %v7538_v56, %v3045_v42  ;;  %v2648_v53 = vpop.f32.mrf.mxu3 }
 0x509   :  { %v2614_v30 = vpop.f32.mrf.mxu2 }
 0x50a   :  { %v3091_v27 = vmax.f32 %v3071_v6, 0.0  ;;  %v2649_v55 = vadd.f32 %v2648_v53, %v2614_v30  ;;  %v3025_v35 = vpop.f32.mrf.mxu1 }
 0x50b   :  { %v2991_v41 = vpop.f32.mrf.mxu0 }
 0x50c   :  { %v7598_v17 = vadd.f32 %v2649_v55, %v7512_v16  ;;  %v3026_v59 = vadd.f32 %v3025_v35, %v2991_v41  ;;  %v7600_v62 = vmax.f32 %v3089_v8, %v3091_v27  ;;  %v2646_v8 = vadd.f32 %v7586_v28, %v7588_v9 }
 0x50e   :  { %v3047_v40 = vadd.f32 %v3026_v59, %v7515_v38 }
 0x510   :  { %v3073_v47 = vadd.f32 %v7538_v56, %v3047_v40  ;;  %v2650_v49 = vpop.f32.mrf.mxu3 }
 0x511   :  { %v2616_v25 = vpop.f32.mrf.mxu2 }
 0x512   :  { %v3027_v4 = vpop.f32.mrf.mxu1  ;;  %v3093_v16 = vmax.f32 %v3073_v47, 0.0  ;;  %v2651_v9 = vadd.f32 %v2650_v49, %v2616_v25  ;;  %v5066_v49 = vld [vmem:[%s7894_s5 + $0x80] sm:$0xff] }
 0x513   :  { %v2993_v0 = vpop.f32.mrf.mxu0  ;;  %3261 = vmatpush.bf16.msra.mxu2 %v5066_v49 }
 0x514   :  { %v3028_v37 = vadd.f32 %v3027_v4, %v2993_v0 }
 0x516   :  { %v3049_v31 = vadd.f32 %v3028_v37, %v7525_v29 }
 0x518   :  { %v3075_v15 = vadd.f32 %v7538_v56, %v3049_v31  ;;  %v2653_v63 = vpop.f32.mrf.mxu3 }
 0x519   :  { %v2619_v24 = vpop.f32.mrf.mxu2 }
 0x51a   :  { %v3095_v19 = vmax.f32 %v3075_v15, 0.0  ;;  %v2654_v13 = vadd.f32 %v2653_v63, %v2619_v24  ;;  %v2742_v15 = vadd.f32 %v2651_v9, %v7521_v54 }
 0x51c   :  { %v7607_v1 = vadd.f32 %v2654_v13, %v7529_v50  ;;  %v7609_v38 = vmax.f32 %v3093_v16, %v3095_v19 }
 0x520   :  { %v2655_v21 = vpop.f32.mrf.mxu3 }
 0x521   :  { %v2621_v26 = vpop.f32.mrf.mxu2 }
 0x522   :  { %v2656_v14 = vadd.f32 %v2655_v21, %v2621_v26 }
 0x524   :  { %v7612_v36 = vadd.f32 %v2656_v14, %v7541_v20 }
 0x528   :  { %v2658_v32 = vpop.f32.mrf.mxu3 }
 0x529   :  { %v2624_v29 = vpop.f32.mrf.mxu2 }
 0x52a   :  { %v2659_v23 = vadd.f32 %v2658_v32, %v2624_v29 }
 0x52c   :  { %v7615_v56 = vadd.f32 %v2659_v23, %v7550_v45  ;;  %v2372_v45 = vadd.f32 %v7570_v57, %v7572_v46  ;;  %v2738_v46 = vadd.f32 %v2646_v8, %v7504_v7 }
 0x52e   :  { %v2460_v18 = vadd.f32 %v2372_v45, %v7486_v43  ;;  %v5065_v45 = vld [vmem:[%s7894_s5 + $0x78] sm:$0xff] }
 0x52f   :  { %3262 = vmatpush.bf16.msra.mxu2 %v5065_v45 }
 0x530   :  { %v2660_v3 = vpop.f32.mrf.mxu3 }
 0x531   :  { %v2626_v50 = vpop.f32.mrf.mxu2 }
 0x532   :  { %v2661_v5 = vadd.f32 %v2660_v3, %v2626_v50 }
 0x534   :  { %v7620_v22 = vadd.f32 %v2661_v5, %v2456_v60 }
 0x538   :  { %v2663_v12 = vpop.f32.mrf.mxu3 }
 0x539   :  { %v2629_v44 = vpop.f32.mrf.mxu2 }
 0x53a   :  { %v2664_v20 = vadd.f32 %v2663_v12, %v2629_v44 }
 0x53c   :  { %v7623_v61 = vadd.f32 %v2664_v20, %v7566_v11  ;;  %v7634_v11 = vperm.slane %v7534_v58, 0 }
 0x540   :  { %v2665_v34 = vpop.f32.mrf.mxu3 }
 0x541   :  { %v2631_v42 = vpop.f32.mrf.mxu2 }
 0x542   :  { %v2666_v33 = vadd.f32 %v2665_v34, %v2631_v42 }
 0x544   :  { %v7628_v6 = vadd.f32 %v2666_v33, %v2460_v18  ;;  %v5063_v33 = vld [vmem:[%s7894_s5 + $0x68] sm:$0xff] }
 0x548   :  { %v2937_v10 = vpop.f32.mrf.mxu3 }
 0x549   :  { %v2903_v53 = vpop.f32.mrf.mxu2 }
 0x54a   :  { %v2938_v30 = vadd.f32 %v2937_v10, %v2903_v53  ;;  %v5084_v10 = vld [vmem:[%s7894_s5 + $0x110] sm:$0xff]  ;;  %v5085_v53 = vld [vmem:[%s7894_s5 + $0x118] sm:$0xff] }
 0x54b   :  { %3553 = vmatpush.bf16.msrb.mxu0 %v5084_v10  ;;  %3573 = vmatpush.bf16.msrb.mxu1 %v5085_v53  ;;  %v5073_v53 = vld [vmem:[%s7894_s5 + $0xb8] sm:$0xff] }
 0x54c   :  { %v3030_v27 = vadd.f32 %v2938_v30, %v7582_v39 }
 0x54e   :  { %v3056_v43 = vadd.f32 %v7634_v11, %v3030_v27 }
 0x550   :  { %v2939_v55 = vpop.f32.mrf.mxu3  ;;  %v3076_v40 = vmax.f32 %v3056_v43, 0.0 }
 0x551   :  { %v2905_v57 = vpop.f32.mrf.mxu2 }
 0x552   :  { %v2940_v35 = vadd.f32 %v2939_v55, %v2905_v57  ;;  %v5083_v55 = vld [vmem:[%s7894_s5 + $0x108] sm:$0xff] }
 0x553   :  { %3554 = vmatpush.bf16.msrb.mxu0 %v5083_v55 }
 0x554   :  { %v3032_v41 = vadd.f32 %v2940_v35, %v2738_v46  ;;  %v5062_v46 = vld [vmem:[%s7894_s5 + $0x60] sm:$0xff] }
 0x556   :  { %v3058_v59 = vadd.f32 %v7634_v11, %v3032_v41  ;;  %v5061_v41 = vld [vmem:[%s7894_s5 + $0x58] sm:$0xff] }
 0x558   :  { %v3078_v47 = vmax.f32 %v3058_v59, 0.0  ;;  %v2942_v4 = vpop.f32.mrf.mxu3 }
 0x559   :  { %v2908_v0 = vpop.f32.mrf.mxu2 }
 0x55a   :  { %v7639_v28 = vmax.f32 %v3076_v40, %v3078_v47  ;;  %v2943_v39 = vadd.f32 %v2942_v4, %v2908_v0 }
 0x55c   :  { %v5184_v58 = vpack.i.bf16 %v7552_v51, %v7639_v28  ;;  %v3034_v7 = vadd.f32 %v2943_v39, %v7598_v17  ;;  %v5067_v17 = vld [vmem:[%s7894_s5 + $0x88] sm:$0xff] }
 0x55d   :  { %3281 = vmatpush.bf16.msra.mxu3 %v5067_v17  ;;  %v5055_v17 = vld [vmem:[%s7894_s5 + $0x28] sm:$0xff] }
 0x55e   :  { %5185 = vrot.lane.b32.xlu0 %v5184_v58, %s5208_s4  ;;  %v3060_v24 = vadd.f32 %v7634_v11, %v3034_v7 }
 0x560   :  { %v2944_v37 = vpop.f32.mrf.mxu3  ;;  %v3080_v13 = vmax.f32 %v3060_v24, 0.0 }
 0x561   :  { %v2910_v31 = vpop.f32.mrf.mxu2 }
 0x562   :  { %v2945_v63 = vadd.f32 %v2944_v37, %v2910_v31  ;;  %v5059_v37 = vld [vmem:[%s7894_s5 + $0x48] sm:$0xff]  ;;  %v5057_v31 = vld [vmem:[%s7894_s5 + $0x38] sm:$0xff] }
 0x564   :  { %v3036_v16 = vadd.f32 %v2945_v63, %v2742_v15 }
 0x566   :  { %v3062_v19 = vadd.f32 %v7634_v11, %v3036_v16 }
 0x568   :  { %v3082_v21 = vmax.f32 %v3062_v19, 0.0  ;;  %v2947_v26 = vpop.f32.mrf.mxu3 }
 0x569   :  { %v2913_v25 = vpop.f32.mrf.mxu2 }
 0x56a   :  { %v7654_v14 = vmax.f32 %v3080_v13, %v3082_v21  ;;  %v2948_v54 = vadd.f32 %v2947_v26, %v2913_v25  ;;  %v5053_v25 = vld [vmem:[%s7894_s5 + $0x18] sm:$0xff] }
 0x56c   :  { %v5179_v32 = vpack.i.bf16 %v7568_v48, %v7654_v14  ;;  %v3038_v29 = vadd.f32 %v2948_v54, %v7607_v1  ;;  %v5064_v1 = vld [vmem:[%s7894_s5 + $0x70] sm:$0xff] }
 0x56d   :  { %3263 = vmatpush.bf16.msra.mxu2 %v5064_v1  ;;  %v5052_v54 = vld [vmem:[%s7894_s5 + $0x10] sm:$0xff] }
 0x56e   :  { %5180 = vrot.lane.b32.xlu2 %v5179_v32, %s5208_s4  ;;  %v3064_v50 = vadd.f32 %v7634_v11, %v3038_v29  ;;  %v5058_v32 = vld [vmem:[%s7894_s5 + $0x40] sm:$0xff]  ;;  %v5051_v29 = vld [vmem:[%s7894_s5 + $0x8] sm:$0xff] }
 0x56f   :  { %3364 = vmatpush.bf16.msrb.mxu3 %v5058_v32 }
 0x570   :  { %v2949_v23 = vpop.f32.mrf.mxu3  ;;  %v3084_v12 = vmax.f32 %v3064_v50, 0.0  ;;  %v5079_v50 = vld [vmem:[%s7894_s5 + $0xe8] sm:$0xff] }
 0x571   :  { %v2915_v2 = vpop.f32.mrf.mxu2  ;;  %3264 = vmatpush.bf16.msra.mxu2 %v5063_v33 }
 0x572   :  { %v2950_v3 = vadd.f32 %v2949_v23, %v2915_v2  ;;  %v5081_v23 = vld [vmem:[%s7894_s5 + $0xf8] sm:$0xff]  ;;  %v5050_v2 = vld [vmem:[%s7894_s5] sm:$0xff] }
 0x574   :  { %v3040_v60 = vadd.f32 %v2950_v3, %v7612_v36  ;;  %v5080_v3 = vld [vmem:[%s7894_s5 + $0xf0] sm:$0xff] }
 0x575   :  { %3265 = vmatpush.bf16.msra.mxu2 %v5062_v46  ;;  %v5071_v46 = vld [vmem:[%s7894_s5 + $0xa8] sm:$0xff] }
 0x576   :  { %v3066_v5 = vadd.f32 %v7634_v11, %v3040_v60 }
 0x578   :  { %v3086_v44 = vmax.f32 %v3066_v5, 0.0  ;;  %v2952_v20 = vpop.f32.mrf.mxu3 }
 0x579   :  { %v2918_v34 = vpop.f32.mrf.mxu2  ;;  %3266 = vmatpush.bf16.msra.mxu2 %v5061_v41  ;;  %v5069_v41 = vld [vmem:[%s7894_s5 + $0x98] sm:$0xff] }
 0x57a   :  { %v7666_v42 = vmax.f32 %v3084_v12, %v3086_v44  ;;  %v2953_v18 = vadd.f32 %v2952_v20, %v2918_v34  ;;  %v5075_v34 = vld [vmem:[%s7894_s5 + $0xc8] sm:$0xff] }
 0x57c   :  { %v5189_v36 = vpack.i.bf16 %v7584_v52, %v7666_v42  ;;  %v3042_v30 = vadd.f32 %v2953_v18, %v7615_v56  ;;  %v5076_v18 = vld [vmem:[%s7894_s5 + $0xd0] sm:$0xff] }
 0x57e   :  { %5190 = vrot.lane.b32.xlu1 %v5189_v36, %s5208_s4  ;;  %v3068_v35 = vadd.f32 %v7634_v11, %v3042_v30 }
 0x580   :  { %v2954_v8 = vpop.f32.mrf.mxu3  ;;  %v3088_v59 = vmax.f32 %v3068_v35, 0.0 }
 0x581   :  { %v2920_v27 = vpop.f32.mrf.mxu2 }
 0x582   :  { %v2955_v57 = vadd.f32 %v2954_v8, %v2920_v27  ;;  %v5078_v8 = vld [vmem:[%s7894_s5 + $0xe0] sm:$0xff]  ;;  %v5072_v27 = vld [vmem:[%s7894_s5 + $0xb0] sm:$0xff] }
 0x584   :  { %v3044_v43 = vadd.f32 %v2955_v57, %v7620_v22  ;;  %v5060_v22 = vld [vmem:[%s7894_s5 + $0x50] sm:$0xff] }
 0x585   :  { %3267 = vmatpush.bf16.msra.mxu2 %v5060_v22  ;;  %v5089_v22 = vld [vmem:[%s7894_s5 + $0x138] sm:$0xff] }
 0x586   :  { %v3070_v56 = vadd.f32 %v7634_v11, %v3044_v43  ;;  %v5093_v43 = vld [vmem:[%s7894_s5 + $0x158] sm:$0xff] }
 0x588   :  { %v3090_v40 = vmax.f32 %v3070_v56, 0.0  ;;  %v2957_v47 = vpop.f32.mrf.mxu3 }
 0x589   :  { %v2923_v4 = vpop.f32.mrf.mxu2  ;;  %3268 = vmatpush.bf16.msra.mxu2 %v5059_v37  ;;  %v5088_v37 = vld [vmem:[%s7894_s5 + $0x130] sm:$0xff] }
 0x58a   :  { %v2958_v0 = vadd.f32 %v2957_v47, %v2923_v4  ;;  %v7696_v39 = vmax.f32 %v3088_v59, %v3090_v40  ;;  %v5077_v59 = vld [vmem:[%s7894_s5 + $0xd8] sm:$0xff]  ;;  %v5091_v40 = vld [vmem:[%s7894_s5 + $0x148] sm:$0xff]  ;;  %v5068_v47 = vld [vmem:[%s7894_s5 + $0x90] sm:$0xff] }
 0x58b   :  { %v5090_v4 = vld [vmem:[%s7894_s5 + $0x140] sm:$0xff] }
 0x58c   :  { %v3046_v58 = vadd.f32 %v2958_v0, %v7623_v61  ;;  %v5199_v9 = vpack.i.bf16 %v7600_v62, %v7696_v39  ;;  %v5056_v61 = vld [vmem:[%s7894_s5 + $0x30] sm:$0xff]  ;;  %v5094_v0 = vld [vmem:[%s7894_s5 + $0x160] sm:$0xff] }
 0x58d   :  { %3344 = vmatpush.bf16.msrb.mxu2 %v5057_v31 }
 0x58e   :  { %v3072_v7 = vadd.f32 %v7634_v11, %v3046_v58  ;;  %5200 = vrot.lane.b32.xlu0 %v5199_v9, %s5208_s4 }
 0x590   :  { %v2959_v15 = vpop.f32.mrf.mxu3  ;;  %v3092_v13 = vmax.f32 %v3072_v7, 0.0 }
 0x591   :  { %v2925_v63 = vpop.f32.mrf.mxu2  ;;  %3345 = vmatpush.bf16.msrb.mxu2 %v5056_v61  ;;  %v5087_v61 = vld [vmem:[%s7894_s5 + $0x128] sm:$0xff] }
 0x592   :  { %v2960_v24 = vadd.f32 %v2959_v15, %v2925_v63 }
 0x594   :  { %v3048_v16 = vadd.f32 %v2960_v24, %v7628_v6  ;;  %v5054_v6 = vld [vmem:[%s7894_s5 + $0x20] sm:$0xff] }
 0x595   :  { %3346 = vmatpush.bf16.msrb.mxu2 %v5055_v17 }
 0x596   :  { %v3074_v19 = vadd.f32 %v7634_v11, %v3048_v16  ;;  %v5082_v11 = vld [vmem:[%s7894_s5 + $0x100] sm:$0xff] }
 0x597   :  { %3555 = vmatpush.bf16.msrb.mxu0 %v5082_v11 }
 0x598   :  { %v3094_v21 = vmax.f32 %v3074_v19, 0.0 }
 0x599   :  { %3347 = vmatpush.bf16.msrb.mxu2 %v5054_v6 }
 0x59a   :  { %v7717_v26 = vmax.f32 %v3092_v13, %v3094_v21 }
 0x59b   :  { %3556 = vmatpush.bf16.msrb.mxu0 %v5081_v23 }
 0x59c   :  { %v5194_v49 = vpack.i.bf16 %v7609_v38, %v7717_v26 }
 0x59d   :  { %3348 = vmatpush.bf16.msrb.mxu2 %v5053_v25 }
 0x59e   :  { %5195 = vrot.lane.b32.xlu2 %v5194_v49, %s5208_s4 }
 0x59f   :  { %3557 = vmatpush.bf16.msrb.mxu0 %v5080_v3 }
 0x5a1   :  { %3349 = vmatpush.bf16.msrb.mxu2 %v5052_v54 }
 0x5a3   :  { %3558 = vmatpush.bf16.msrb.mxu0 %v5079_v50 }
 0x5a5   :  { %3350 = vmatpush.bf16.msrb.mxu2 %v5051_v29 }
 0x5a7   :  { %3559 = vmatpush.bf16.msrb.mxu0 %v5078_v8 }
 0x5a9   :  { %3351 = vmatpush.bf16.msrb.mxu2 %v5050_v2 }
 0x5ab   :  { %3560 = vmatpush.bf16.msrb.mxu0 %v5077_v59 }
 0x5c8   :  { %v5181_v60 = vpop.permute.xlu2 %5180 }
 0x5c9   :  { %v5183_v5 = vunpack.i.h.bf16 %v5181_v60  ;;  %v5182_v12 = vunpack.i.l.bf16 %v5181_v60 }
 0x5cb   :  { %v3155_v44 = vmax.f32 %v7568_v48, %v5183_v5  ;;  %v3138_v20 = vsel %vm3136_vm4, %v5182_v12, %v5183_v5  ;;  %v5074_v48 = vld [vmem:[%s7894_s5 + $0xc0] sm:$0xff] }
 0x5cc   :  { %v3154_v45 = vmax.f32 %v7654_v14, %v3138_v20 }
 0x5cd   :  { %v3183_v1 = vpack.c.bf16 %v3155_v44, %v3155_v44  ;;  %v5101_v44 = vld [vmem:[%s7897_s7 + $0x30] sm:$0xff] }
 0x5ce   :  { %v3182_v36 = vpack.c.bf16 %v3154_v45, %v3154_v45  ;;  %v5100_v45 = vld [vmem:[%s7897_s7 + $0x28] sm:$0xff] }
 0x5cf   :  { %4677 = vmatmul.msk.bf16.vlgmr.msra.gmra.mxu3 %vm3257_vm5, %v3183_v1  ;;  %v5099_v1 = vld [vmem:[%s7897_s7 + $0x20] sm:$0xff] }
 0x5d0   :  { %3269 = vmatmul.bf16.vlgmr.msra.gmra.mxu2 %v3182_v36  ;;  %v5186_v33 = vpop.permute.xlu0 %5185  ;;  %3448 = vmatpush.bf16.msra.mxu3 %v5075_v34  ;;  %v5098_v36 = vld [vmem:[%s7897_s7 + $0x18] sm:$0xff] }
 0x5d1   :  { %3468 = vmatpush.bf16.msra.mxu2 %v5076_v18  ;;  %v5188_v14 = vunpack.i.h.bf16 %v5186_v33  ;;  %v5187_v10 = vunpack.i.l.bf16 %v5186_v33 }
 0x5d3   :  { %v3137_v30 = vsel %vm3136_vm4, %v5187_v10, %v5188_v14  ;;  %v3153_v55 = vmax.f32 %v7552_v51, %v5188_v14  ;;  %v5070_v51 = vld [vmem:[%s7894_s5 + $0xa0] sm:$0xff]  ;;  %v5096_v10 = vld [vmem:[%s7897_s7 + $0x8] sm:$0xff] }
 0x5d4   :  { %3449 = vmatpush.bf16.msra.mxu3 %v5074_v48  ;;  %v3152_v57 = vmax.f32 %v7639_v28, %v3137_v30  ;;  %v5092_v28 = vld [vmem:[%s7894_s5 + $0x150] sm:$0xff]  ;;  %v3789_v30 = vld [vmem:[%s7898_s9 + $0x28] sm:$0x3] }
 0x5d5   :  { %v3163_v35 = vpack.c.bf16 %v3153_v55, %v3153_v55  ;;  %v5097_v48 = vld [vmem:[%s7897_s7 + $0x10] sm:$0xff]  ;;  %v3815_v8 = vunpack.c.l.b16 %v3789_v30 }
 0x5d6   :  { %v3162_v56 = vpack.c.bf16 %v3152_v57, %v3152_v57 }
 0x5d8   :  { %3450 = vmatpush.bf16.msra.mxu3 %v5073_v53  ;;  %v5095_v53 = vld [vmem:[%s7897_s7] sm:$0xff] }
 0x5dc   :  { %3451 = vmatpush.bf16.msra.mxu3 %v5072_v27  ;;  %v3821_v27 = vpack.c.b16 %v3815_v8, %v3815_v8 }
 0x5df   :  { %4714 = vmatmul.msk.bf16.vlgmr.msrb.gmra.mxu3 %vm3257_vm5, %v3163_v35  ;;  %v5106_v35 = vld [vmem:[%s7898_s9 + $0x20] sm:$0xff] }
 0x5e0   :  { %3352 = vmatmul.bf16.vlgmr.msrb.gmra.mxu2 %v3162_v56  ;;  %3452 = vmatpush.bf16.msra.mxu3 %v5071_v46  ;;  %v3833_v46 = vsel %vm3831_vm7, %v3821_v27, 0 }
 0x5e1   :  { %3658 = vmatpush.bf16.msrb.mxu2 %v5093_v43  ;;  %3837 = vmatpush.bf16.msra.mxu1 %v3833_v46  ;;  %v5105_v43 = vld [vmem:[%s7898_s9 + $0x18] sm:$0xff] }
 0x5e4   :  { %3453 = vmatpush.bf16.msra.mxu3 %v5070_v51 }
 0x5e5   :  { %3659 = vmatpush.bf16.msrb.mxu2 %v5092_v28  ;;  %3838 = vmatpush.bf16.msra.mxu1 %v5106_v35 }
 0x5e8   :  { %3454 = vmatpush.bf16.msra.mxu3 %v5069_v41 }
 0x5e9   :  { %3660 = vmatpush.bf16.msrb.mxu2 %v5091_v40  ;;  %3839 = vmatpush.bf16.msra.mxu1 %v5105_v43  ;;  %v5104_v40 = vld [vmem:[%s7898_s9 + $0x10] sm:$0xff] }
 0x5ec   :  { %3455 = vmatpush.bf16.msra.mxu3 %v5068_v47 }
 0x5ed   :  { %3661 = vmatpush.bf16.msrb.mxu2 %v5090_v4  ;;  %3840 = vmatpush.bf16.msra.mxu1 %v5104_v40 }
 0x5f0   :  { %3678 = vmatpush.bf16.msrb.mxu3 %v5094_v0  ;;  %v5191_v58 = vpop.permute.xlu1 %5190 }
 0x5f1   :  { %v5193_v9 = vunpack.i.h.bf16 %v5191_v58  ;;  %v5192_v7 = vunpack.i.l.bf16 %v5191_v58  ;;  %3662 = vmatpush.bf16.msrb.mxu2 %v5089_v22 }
 0x5f3   :  { %v3157_v31 = vmax.f32 %v7584_v52, %v5193_v9  ;;  %v3139_v15 = vsel %vm3136_vm4, %v5192_v7, %v5193_v9  ;;  %v5086_v52 = vld [vmem:[%s7894_s5 + $0x120] sm:$0xff] }
 0x5f4   :  { %v3156_v63 = vmax.f32 %v7666_v42, %v3139_v15  ;;  %v5204_v15 = vld [vmem:[%s7895_s6] ss:$0 sm:$0xff] }
 0x5f5   :  { %v3371_v24 = vpack.c.bf16 %v3157_v31, %v3157_v31  ;;  %3663 = vmatpush.bf16.msrb.mxu2 %v5088_v37 }
 0x5f6   :  { %v3370_v16 = vpack.c.bf16 %v3156_v63, %v3156_v63 }
 0x5f7   :  { %4769 = vmatmul.msk.bf16.vlgmr.msra.gmra.mxu2 %vm3257_vm5, %v3371_v24 }
 0x5f8   :  { %v5196_v19 = vpop.permute.xlu2 %5195  ;;  %3456 = vmatmul.bf16.vlgmr.msra.gmra.mxu3 %v3370_v16 }
 0x5f9   :  { %3664 = vmatpush.bf16.msrb.mxu2 %v5087_v61  ;;  %v5198_v13 = vunpack.i.h.bf16 %v5196_v19  ;;  %v5197_v21 = vunpack.i.l.bf16 %v5196_v19 }
 0x5fb   :  { %v3141_v42 = vsel %vm3136_vm4, %v5197_v21, %v5198_v13  ;;  %v3161_v25 = vmax.f32 %v7609_v38, %v5198_v13  ;;  %v3706_v38 = vld [vmem:[%s7897_s7 + $0x38] sm:$0xf] }
 0x5fc   :  { %v3160_v17 = vmax.f32 %v7717_v26, %v3141_v42  ;;  %v3740_v26 = vunpack.c.l.b16 %v3706_v38  ;;  %v5103_v42 = vld [vmem:[%s7898_s9 + $0x8] sm:$0xff] }
 0x5fd   :  { %3665 = vmatpush.bf16.msrb.mxu2 %v5086_v52  ;;  %v3581_v3 = vpack.c.bf16 %v3161_v25, %v3161_v25  ;;  %3841 = vmatpush.bf16.msra.mxu1 %v5103_v42 }
 0x5fe   :  { %v3580_v23 = vpack.c.bf16 %v3160_v17, %v3160_v17  ;;  %v5205_v17 = vld [vmem:[%s7896_s8] ss:$0 sm:$0xff] }
 0x600   :  { %v5201_v49 = vpop.permute.xlu0 %5200 }
 0x601   :  { %v5203_v6 = vunpack.i.h.bf16 %v5201_v49  ;;  %v5202_v11 = vunpack.i.l.bf16 %v5201_v49  ;;  %v5102_v49 = vld [vmem:[%s7898_s9] sm:$0xff] }
 0x602   :  { %3842 = vmatpush.bf16.msra.mxu1 %v5102_v49 }
 0x603   :  { %v3159_v54 = vmax.f32 %v7600_v62, %v5203_v6  ;;  %v3140_v32 = vsel %vm3136_vm4, %v5202_v11, %v5203_v6  ;;  %v3748_v62 = vpack.c.b16 %v3740_v26, %v3740_v26 }
 0x604   :  { %v3158_v29 = vmax.f32 %v7696_v39, %v3140_v32 }
 0x605   :  { %v3476_v2 = vpack.c.bf16 %v3159_v54, %v3159_v54  ;;  %v3762_v60 = vsel %vm3760_vm6, %v3748_v62, 0 }
 0x606   :  { %v3475_v50 = vpack.c.bf16 %v3158_v29, %v3158_v29  ;;  %3764 = vmatpush.bf16.msra.mxu0 %v3762_v60  ;;  %v5206_v29 = vld [vmem:[%s7899_s10] ss:$0 sm:$0xff] }
 0x607   :  { %4824 = vmatmul.msk.bf16.vlgmr.msrb.gmra.mxu1 %vm3257_vm5, %v3476_v2  ;;  %3666 = vmatmul.bf16.vlgmr.msrb.gmra.mxu2 %v3580_v23 }
 0x608   :  { %3561 = vmatmul.bf16.vlgmr.msrb.gmra.mxu0 %v3475_v50  ;;  %4879 = vmatmul.msk.bf16.vlgmr.msrb.gmra.mxu3 %vm3257_vm5, %v3581_v3 }
 0x60a   :  { %3765 = vmatpush.bf16.msra.mxu0 %v5101_v44 }
 0x60e   :  { %3766 = vmatpush.bf16.msra.mxu0 %v5100_v45 }
 0x612   :  { %3767 = vmatpush.bf16.msra.mxu0 %v5099_v1 }
 0x616   :  { %3768 = vmatpush.bf16.msra.mxu0 %v5098_v36 }
 0x61a   :  { %3769 = vmatpush.bf16.msra.mxu0 %v5097_v48 }
 0x61e   :  { %3770 = vmatpush.bf16.msra.mxu0 %v5096_v10 }
 0x622   :  { %3771 = vmatpush.bf16.msra.mxu0 %v5095_v53 }
 0x652   :  { %v3283_v39 = vpop.f32.mrf.mxu3 }
 0x653   :  { %v3270_v5 = vpop.f32.mrf.mxu2 }
 0x654   :  { %v3284_v56 = vadd.f32 %v3283_v39, %v3270_v5 }
 0x65a   :  { %v3285_v12 = vpop.f32.mrf.mxu3 }
 0x65b   :  { %v3272_v20 = vpop.f32.mrf.mxu2 }
 0x662   :  { %v3366_v34 = vpop.f32.mrf.mxu3 }
 0x663   :  { %v3353_v18 = vpop.f32.mrf.mxu2 }
 0x664   :  { %v3354_v41 = vadd.f32 %v3353_v18, %v3284_v56 }
 0x666   :  { %v3367_v0 = vadd.f32 %v3366_v34, %v3354_v41 }
 0x66a   :  { %v3368_v33 = vpop.f32.mrf.mxu3 }
 0x66b   :  { %v3355_v14 = vpop.f32.mrf.mxu2 }
 0x67a   :  { %v3470_v55 = vpop.f32.mrf.mxu2 }
 0x67b   :  { %v3457_v57 = vpop.f32.mrf.mxu3 }
 0x67c   :  { %v3471_v4 = vadd.f32 %v3470_v55, %v3457_v57 }
 0x67e   :  { %v3474_v58 = vadd.f32 %v3471_v4, %v3367_v0 }
 0x682   :  { %v3472_v51 = vpop.f32.mrf.mxu2 }
 0x683   :  { %v3459_v28 = vpop.f32.mrf.mxu3 }
 0x684   :  { %v3575_v59 = vpop.f32.mrf.mxu1 }
 0x685   :  { %v3562_v47 = vpop.f32.mrf.mxu0 }
 0x686   :  { %v3576_v22 = vadd.f32 %v3575_v59, %v3562_v47 }
 0x688   :  { %v3579_v37 = vadd.f32 %v3576_v22, %v3474_v58 }
 0x68a   :  { %v3667_v9 = vpop.f32.mrf.mxu2 }
 0x68b   :  { %v3680_v7 = vpop.f32.mrf.mxu3 }
 0x68c   :  { %v3681_v31 = vadd.f32 %v3680_v7, %v3667_v9  ;;  %v3577_v63 = vpop.f32.mrf.mxu1 }
 0x68d   :  { %v3564_v24 = vpop.f32.mrf.mxu0 }
 0x68e   :  { %v3684_v61 = vadd.f32 %v3681_v31, %v3579_v37 }
 0x690   :  { %v3689_v16 = vadd.f32 %v5204_v15, %v3684_v61 }
 0x692   :  { %v3690_v19 = vmax.f32 %v3689_v16, 0.0  ;;  %v3669_v52 = vpop.f32.mrf.mxu2 }
 0x693   :  { %v3682_v13 = vpop.f32.mrf.mxu3 }
 0x694   :  { %v3691_v21 = vpack.c.bf16 %v3690_v19, %v3690_v19 }
 0x696   :  { %4908 = vmatmul.msk.bf16.vlgmr.msra.gmra.mxu0 %vm3756_vm8, %v3691_v21 }
 0x713   :  { %v3773_v6 = vpop.f32.mrf.mxu0 }
 0x714   :  { %v3774_v11 = vadd.f32 %v5205_v17, %v3773_v6 }
 0x716   :  { %v3777_v25 = vmax.f32 %v3774_v11, 0.0 }
 0x718   :  { %v3778_v54 = vpack.c.bf16 %v3777_v25, %v3777_v25 }
 0x71a   :  { %4929 = vmatmul.msk.bf16.vlgmr.msra.gmra.mxu1 %vm3827_vm9, %v3778_v54 }
 0x71b   :  { %v3775_v32 = vpop.f32.mrf.mxu0 }
 0x797   :  { %v3844_v23 = vpop.f32.mrf.mxu1 }
 0x798   :  { %v3845_v2 = vadd.f32 %v5206_v29, %v3844_v23 }
 0x79a   :  { %3848 = vst [vmem:[%s7900_s11] sm:$0xff] %v3845_v2 }
 0x79f   :  { %v3846_v3 = vpop.f32.mrf.mxu1 }

</bundles_post_ra>
